<compile_context>
chip_gen: v7x
topology: tpu7x:2x2x1
jax: 0.10.0
libtpu: 0.0.40
codegen_flags: <defaults>
</compile_context>

<pallas_src>
import numpy as np
import jax
import jax.numpy as jnp
from jax.experimental import pallas as pl
from jax.experimental.pallas import tpu as pltpu


# ----------------------------------------------------------------------------
# Pallas kernel: bidirectional multi-layer LSTM + pooling + 2 FC layers
# ----------------------------------------------------------------------------
def make_net_kernel(n_layers, T, B, H):
    G = 4 * H          # gate width per direction (reordered: i, f, o | g)
    G2 = 8 * H         # fwd + bwd gate columns fused

    def kernel(emb_ref, mask_ref, wih0_ref, wihr_ref, whh_ref, b_ref,
               wfeat_ref, bfeat_ref, wout_ref, bout_ref,
               out_ref,
               xw_buf, outf_buf, outb_buf):
        bf16 = jnp.bfloat16
        f32 = jnp.float32

        # Hoisted per-timestep validity masks, pre-broadcast to [B, H] in the
        # wrapper; compared to bool exactly once and reused everywhere.
        valid = [mask_ref[t] > 0.5 for t in range(T)]

        def half_cell(gates, c):
            # Gate layout within a direction: (i, f, o | g) -> one wide sigmoid.
            sig = jax.nn.sigmoid(gates[:, 0:3 * H])
            ig = sig[:, 0:H]
            fg = sig[:, H:2 * H]
            og = sig[:, 2 * H:3 * H]
            gg = jnp.tanh(gates[:, 3 * H:4 * H])
            c_new = fg * c + ig * gg
            h_new = og * jnp.tanh(c_new)
            return h_new, c_new

        hid_f = hid_b = None
        sum_f = sum_b = max_f = max_b = None

        for layer in range(n_layers):
            last = layer == n_layers - 1

            # ---- hoisted input projection (+ bias), one matmul per layer ----
            if layer == 0:
                xw = jnp.dot(emb_ref[...].astype(bf16), wih0_ref[...],
                             preferred_element_type=f32)          # [T*B, 8H]
            else:
                prev = jnp.concatenate([outf_buf[...], outb_buf[...]],
                                       axis=1).astype(bf16)       # [T*B, 2H]
                xw = jnp.dot(prev, wihr_ref[layer - 1],
                             preferred_element_type=f32)          # [T*B, 8H]
            xw_buf[...] = xw + b_ref[layer]

            whh_bd = whh_ref[layer]                # [2H, 8H] block-diag, bf16

            hf = jnp.zeros((B, H), f32)
            cf = jnp.zeros((B, H), f32)
            hb = jnp.zeros((B, H), f32)
            cb = jnp.zeros((B, H), f32)

            if last:
                sum_f = jnp.zeros((B, H), f32)
                sum_b = jnp.zeros((B, H), f32)
                max_f = jnp.full((B, H), -jnp.inf, f32)
                max_b = jnp.full((B, H), -jnp.inf, f32)

            # T is small & static: fully unrolled.  One fused recurrent matmul
            # per step drives BOTH directions (block-diagonal W_hh); the two
            # cell evaluations stay on independent gate slices.
            for t in range(T):
                tb = T - 1 - t
                h_cat = jnp.concatenate([hf, hb], axis=1).astype(bf16)  # [B,2H]
                grec = jnp.dot(h_cat, whh_bd,
                               preferred_element_type=f32)              # [B,8H]

                gates_f = xw_buf[pl.ds(t * B, B), 0:G] + grec[:, 0:G]
                gates_b = xw_buf[pl.ds(tb * B, B), G:G2] + grec[:, G:G2]

                hnf, cnf = half_cell(gates_f, cf)
                hnb, cnb = half_cell(gates_b, cb)

                vf = valid[t]
                vb = valid[tb]
                of = jnp.where(vf, hnf, 0.0)      # padded steps -> zeros
                ob = jnp.where(vb, hnb, 0.0)
                hf = jnp.where(vf, hnf, hf)       # freeze state on padding
                cf = jnp.where(vf, cnf, cf)
                hb = jnp.where(vb, hnb, hb)
                cb = jnp.where(vb, cnb, cb)

                if last:
                    sum_f = sum_f + of
                    sum_b = sum_b + ob
                    max_f = jnp.maximum(max_f, of)
                    max_b = jnp.maximum(max_b, ob)
                else:
                    outf_buf[pl.ds(t * B, B), :] = of
                    outb_buf[pl.ds(tb * B, B), :] = ob

            if last:
                hid_f, hid_b = hf, hb

        hidden = jnp.concatenate([hid_f, hid_b], axis=1)              # [B, 2H]
        avg_pool = jnp.concatenate([sum_f, sum_b], axis=1) * (1.0 / T)
        max_pool = jnp.concatenate([max_f, max_b], axis=1)
        x = jnp.concatenate([hidden, avg_pool, max_pool], axis=1)     # [B, 6H]

        feat = jnp.maximum(
            jnp.dot(x.astype(jnp.bfloat16), wfeat_ref[...],
                    preferred_element_type=f32) + bfeat_ref[...],
            0.0)                                                      # [B, 3H]
        # fc_out has a single output column: VPU multiply + lane reduce instead
        # of an N=1 MXU dot (cheaper epilogue).
        out_ref[...] = (jnp.sum(feat * wout_ref[...], axis=1, keepdims=True)
                        + bout_ref[...])                              # [B, 1]

    return kernel


# ----------------------------------------------------------------------------
# Plain-JAX glue
# ----------------------------------------------------------------------------
def embedding_bag_mean(table, seq, offsets):
    """nn.EmbeddingBag(mode='mean') with 1-D seq + offsets."""
    n = seq.shape[0]
    num_bags = offsets.shape[0]
    seg = jnp.sum(jnp.arange(n)[:, None] >= offsets[None, :], axis=1) - 1
    gathered = table[seq]                                        # [n, emb_dim]
    one_hot = (seg[:, None] == jnp.arange(num_bags)[None, :]).astype(jnp.float32)
    sums = one_hot.T @ gathered                                  # [bags, emb_dim]
    counts = jnp.maximum(one_hot.sum(axis=0), 1.0)
    return sums / counts[:, None]


def build_padded(emb, lengths):
    """Split flat bag-embeddings into per-sequence chunks, pad to max_len,
    return time-major [T, B, emb_dim] (matches stack().transpose(1,0))."""
    T = lengths[0]
    D = emb.shape[1]
    rows, start = [], 0
    for L in lengths:
        chunk = emb[start:start + L]
        if T - L > 0:
            chunk = jnp.concatenate([chunk, jnp.zeros((T - L, D), emb.dtype)], 0)
        rows.append(chunk)
        start += L
    return jnp.stack(rows, axis=0).transpose(1, 0, 2)


def init_params(key, input_dim, emb_dim, enc_hid_dim, n_layers):
    H = enc_hid_dim
    G = 4 * H
    keys = iter(jax.random.split(key, 8 * n_layers + 8))

    def u(shape, scale):
        return jax.random.uniform(next(keys), shape, jnp.float32, -scale, scale)

    def reorder(w):
        # PyTorch gate rows (i, f, g, o) -> kernel order (i, f, o, g).
        return jnp.concatenate([w[0:H], w[H:2 * H], w[3 * H:4 * H], w[2 * H:3 * H]],
                               axis=0)

    s = 1.0 / np.sqrt(H)
    params = {"emb_table": u((input_dim, emb_dim), 1.0)}

    wih0 = None
    wihr, whh_bd, bias = [], [], []
    for layer in range(n_layers):
        in_l = emb_dim if layer == 0 else 2 * H
        cols_ih, blocks_hh, cols_b = [], [], []
        for _direction in range(2):
            w_ih = reorder(u((G, in_l), s))        # [4H, in]
            w_hh = reorder(u((G, H), s))           # [4H, H]
            b_i = reorder(u((G,), s))
            b_h = reorder(u((G,), s))
            cols_ih.append(w_ih.T)                 # [in, 4H]
            blocks_hh.append(w_hh.T)               # [H, 4H]
            cols_b.append((b_i + b_h).reshape(1, G))
        wih_l = jnp.concatenate(cols_ih, axis=1)   # [in, 8H]  fwd|bwd columns
        z = jnp.zeros((H, G), jnp.float32)
        whh_l = jnp.concatenate(                   # block-diagonal [2H, 8H]
            [jnp.concatenate([blocks_hh[0], z], axis=1),
             jnp.concatenate([z, blocks_hh[1]], axis=1)], axis=0)
        b_l = jnp.concatenate(cols_b, axis=1)      # [1, 8H]
        if layer == 0:
            wih0 = wih_l
        else:
            wihr.append(wih_l)
        whh_bd.append(whh_l)
        bias.append(b_l)

    params["wih0T"] = wih0.astype(jnp.bfloat16)                    # [emb, 8H]
    if wihr:
        params["wihrT"] = jnp.stack(wihr).astype(jnp.bfloat16)     # [L-1, 2H, 8H]
    else:  # n_layers == 1: dummy, never read by the kernel
        params["wihrT"] = jnp.zeros((1, 2 * H, 2 * G), jnp.bfloat16)
    params["whhBD"] = jnp.stack(whh_bd).astype(jnp.bfloat16)       # [L, 2H, 8H]
    params["b"] = jnp.stack(bias)                                  # [L, 1, 8H] f32

    sf = 1.0 / np.sqrt(6 * H)
    params["wfeatT"] = u((3 * H, 6 * H), sf).T.astype(jnp.bfloat16)  # [6H, 3H]
    params["bfeat"] = u((3 * H,), sf).reshape(1, 3 * H)
    so = 1.0 / np.sqrt(3 * H)
    params["wout_row"] = u((1, 3 * H), so)          # [1, 3H] f32 (VPU reduction)
    params["bout"] = u((1,), so).reshape(1, 1)
    return params


def net_forward(params, seq, offsets, lengths, *, emb_dim, enc_hid_dim, n_layers):
    H = enc_hid_dim
    lengths = [int(l) for l in lengths]
    assert all(l >= 1 for l in lengths), "pack_padded requires length >= 1"
    assert lengths == sorted(lengths, reverse=True), "lengths must be descending"

    emb = embedding_bag_mean(params["emb_table"], seq, offsets)   # dropout = id
    emb_tensor = build_padded(emb, lengths)                       # [T, B, emb_dim]
    T, B, D = emb_tensor.shape

    # Pad batch to a multiple of 8 sublanes (zero rows; masked off, sliced away).
    BP = ((B + 7) // 8) * 8
    emb_pad = jnp.pad(emb_tensor, ((0, 0), (0, BP - B), (0, 0)))
    emb_flat = emb_pad.reshape(T * BP, D)          # wrapper-side flatten (item 6)

    # Validity mask, pre-broadcast to [T, BP, H] in the wrapper (item 3).
    mask_np = (np.arange(T)[:, None] < np.asarray(lengths)[None, :]).astype(np.float32)
    mask_np = np.pad(mask_np, ((0, 0), (0, BP - B)))
    mask = jnp.asarray(np.repeat(mask_np[:, :, None], H, axis=2))  # [T, BP, H]

    # VMEM budget guard: xw_buf is the largest scratch; keep well under the
    # v7x 64 MiB ceiling.  If T*B scales up, split into bf16 halves or add a
    # T-grid with a Buffered BlockSpec.
    xw_bytes = T * BP * 8 * H * 4
    assert xw_bytes < 16 * 1024 * 1024, "xw_buf too large for single-shot VMEM"

    kernel = make_net_kernel(n_layers, T, BP, H)
    vmem = lambda: pl.BlockSpec(memory_space=pltpu.MemorySpace.VMEM)

    out = pl.pallas_call(
        kernel,
        out_shape=jax.ShapeDtypeStruct((BP, 1), jnp.float32),
        in_specs=[vmem() for _ in range(10)],
        out_specs=vmem(),
        scratch_shapes=[
            pltpu.VMEM((T * BP, 8 * H), jnp.float32),   # hoisted input projection
            pltpu.VMEM((T * BP, H), jnp.float32),       # fwd outputs (inter-layer)
            pltpu.VMEM((T * BP, H), jnp.float32),       # bwd outputs (inter-layer)
        ],
    )(emb_flat, mask,
      params["wih0T"], params["wihrT"], params["whhBD"], params["b"],
      params["wfeatT"], params["bfeat"], params["wout_row"], params["bout"])
    return out[:B]


if __name__ == "__main__":
    # Net(input_dim, emb_dim, enc_hid_dim, n_layers, dropout)
    input_dim = 20          # vocabulary size for EmbeddingBag
    emb_dim = 32
    enc_hid_dim = 32
    n_layers = 2
    # dropout = 0.25 in the original module; identity at inference time.

    lengths = [8, 6, 5, 3]             # sorted descending, as pack_padded requires
    bag_size = 3
    num_bags = sum(lengths)            # 22 "bags" = 22 timesteps total
    key = jax.random.PRNGKey(0)
    k_seq, k_par = jax.random.split(key)

    seq = jax.random.randint(k_seq, (num_bags * bag_size,), 0, input_dim,
                             dtype=jnp.int32)
    offsets = jnp.arange(num_bags, dtype=jnp.int32) * bag_size

    params = init_params(k_par, input_dim, emb_dim, enc_hid_dim, n_layers)
    out = net_forward(params, seq, offsets, lengths,
                      emb_dim=emb_dim, enc_hid_dim=enc_hid_dim,
                      n_layers=n_layers)
    out = jax.block_until_ready(out)

    assert out.shape == (len(lengths), 1), out.shape
    assert bool(jnp.all(jnp.isfinite(out)))
    print("KERNEL_OK")
</pallas_src>

<mosaic_0001>
module attributes {stable_mosaic.version = 11 : i64} {
  func.func @kernel(%arg0: memref<64x32xf32, #tpu.memory_space<vmem>>, %arg1: memref<8x8x32xf32, #tpu.memory_space<vmem>>, %arg2: memref<32x256xbf16, #tpu.memory_space<vmem>>, %arg3: memref<1x64x256xbf16, #tpu.memory_space<vmem>>, %arg4: memref<2x64x256xbf16, #tpu.memory_space<vmem>>, %arg5: memref<2x1x256xf32, #tpu.memory_space<vmem>>, %arg6: memref<192x96xbf16, #tpu.memory_space<vmem>>, %arg7: memref<1x96xf32, #tpu.memory_space<vmem>>, %arg8: memref<1x96xf32, #tpu.memory_space<vmem>>, %arg9: memref<1x1xf32, #tpu.memory_space<vmem>>, %arg10: memref<8x1xf32, #tpu.memory_space<vmem>>, %arg11: memref<64x256xf32, #tpu.memory_space<vmem>>, %arg12: memref<64x32xf32, #tpu.memory_space<vmem>>, %arg13: memref<64x32xf32, #tpu.memory_space<vmem>>) attributes {dimension_semantics = [], scalar_prefetch = 0 : i64, scratch_operands = 3 : i64, tpu.core_type = #tpu.core_type<tc>} {
    %c0 = arith.constant 0 : index
    %c0_0 = arith.constant 0 : index
    %c0_1 = arith.constant 0 : index
    %0 = vector.load %arg1[%c0, %c0_0, %c0_1] : memref<8x8x32xf32, #tpu.memory_space<vmem>>, vector<1x8x32xf32>
    %1 = vector.shape_cast %0 : vector<1x8x32xf32> to vector<8x32xf32>
    %cst = arith.constant 5.000000e-01 : f32
    %2 = vector.broadcast %cst : f32 to vector<8x32xf32>
    %3 = arith.cmpf ogt, %1, %2 : vector<8x32xf32>
    %c1 = arith.constant 1 : index
    %c0_2 = arith.constant 0 : index
    %c0_3 = arith.constant 0 : index
    %4 = vector.load %arg1[%c1, %c0_2, %c0_3] : memref<8x8x32xf32, #tpu.memory_space<vmem>>, vector<1x8x32xf32>
    %5 = vector.shape_cast %4 : vector<1x8x32xf32> to vector<8x32xf32>
    %cst_4 = arith.constant 5.000000e-01 : f32
    %6 = vector.broadcast %cst_4 : f32 to vector<8x32xf32>
    %7 = arith.cmpf ogt, %5, %6 : vector<8x32xf32>
    %c2 = arith.constant 2 : index
    %c0_5 = arith.constant 0 : index
    %c0_6 = arith.constant 0 : index
    %8 = vector.load %arg1[%c2, %c0_5, %c0_6] : memref<8x8x32xf32, #tpu.memory_space<vmem>>, vector<1x8x32xf32>
    %9 = vector.shape_cast %8 : vector<1x8x32xf32> to vector<8x32xf32>
    %cst_7 = arith.constant 5.000000e-01 : f32
    %10 = vector.broadcast %cst_7 : f32 to vector<8x32xf32>
    %11 = arith.cmpf ogt, %9, %10 : vector<8x32xf32>
    %c3 = arith.constant 3 : index
    %c0_8 = arith.constant 0 : index
    %c0_9 = arith.constant 0 : index
    %12 = vector.load %arg1[%c3, %c0_8, %c0_9] : memref<8x8x32xf32, #tpu.memory_space<vmem>>, vector<1x8x32xf32>
    %13 = vector.shape_cast %12 : vector<1x8x32xf32> to vector<8x32xf32>
    %cst_10 = arith.constant 5.000000e-01 : f32
    %14 = vector.broadcast %cst_10 : f32 to vector<8x32xf32>
    %15 = arith.cmpf ogt, %13, %14 : vector<8x32xf32>
    %c4 = arith.constant 4 : index
    %c0_11 = arith.constant 0 : index
    %c0_12 = arith.constant 0 : index
    %16 = vector.load %arg1[%c4, %c0_11, %c0_12] : memref<8x8x32xf32, #tpu.memory_space<vmem>>, vector<1x8x32xf32>
    %17 = vector.shape_cast %16 : vector<1x8x32xf32> to vector<8x32xf32>
    %cst_13 = arith.constant 5.000000e-01 : f32
    %18 = vector.broadcast %cst_13 : f32 to vector<8x32xf32>
    %19 = arith.cmpf ogt, %17, %18 : vector<8x32xf32>
    %c5 = arith.constant 5 : index
    %c0_14 = arith.constant 0 : index
    %c0_15 = arith.constant 0 : index
    %20 = vector.load %arg1[%c5, %c0_14, %c0_15] : memref<8x8x32xf32, #tpu.memory_space<vmem>>, vector<1x8x32xf32>
    %21 = vector.shape_cast %20 : vector<1x8x32xf32> to vector<8x32xf32>
    %cst_16 = arith.constant 5.000000e-01 : f32
    %22 = vector.broadcast %cst_16 : f32 to vector<8x32xf32>
    %23 = arith.cmpf ogt, %21, %22 : vector<8x32xf32>
    %c6 = arith.constant 6 : index
    %c0_17 = arith.constant 0 : index
    %c0_18 = arith.constant 0 : index
    %24 = vector.load %arg1[%c6, %c0_17, %c0_18] : memref<8x8x32xf32, #tpu.memory_space<vmem>>, vector<1x8x32xf32>
    %25 = vector.shape_cast %24 : vector<1x8x32xf32> to vector<8x32xf32>
    %cst_19 = arith.constant 5.000000e-01 : f32
    %26 = vector.broadcast %cst_19 : f32 to vector<8x32xf32>
    %27 = arith.cmpf ogt, %25, %26 : vector<8x32xf32>
    %c7 = arith.constant 7 : index
    %c0_20 = arith.constant 0 : index
    %c0_21 = arith.constant 0 : index
    %28 = vector.load %arg1[%c7, %c0_20, %c0_21] : memref<8x8x32xf32, #tpu.memory_space<vmem>>, vector<1x8x32xf32>
    %29 = vector.shape_cast %28 : vector<1x8x32xf32> to vector<8x32xf32>
    %cst_22 = arith.constant 5.000000e-01 : f32
    %30 = vector.broadcast %cst_22 : f32 to vector<8x32xf32>
    %31 = arith.cmpf ogt, %29, %30 : vector<8x32xf32>
    %c0_23 = arith.constant 0 : index
    %c0_24 = arith.constant 0 : index
    %32 = vector.load %arg0[%c0_23, %c0_24] : memref<64x32xf32, #tpu.memory_space<vmem>>, vector<64x32xf32>
    %33 = arith.truncf %32 : vector<64x32xf32> to vector<64x32xbf16>
    %c0_25 = arith.constant 0 : index
    %c0_26 = arith.constant 0 : index
    %34 = vector.load %arg2[%c0_25, %c0_26] : memref<32x256xbf16, #tpu.memory_space<vmem>>, vector<32x256xbf16>
    %cst_27 = arith.constant dense<0.000000e+00> : vector<64x256xf32>
    %35 = tpu.matmul %33, %34, %cst_27 {dimension_numbers = #tpu.dot_dimension_numbers<[1], [0], [0], [1], [0, 0, 1, 1], [], []>} : vector<64x32xbf16>, vector<32x256xbf16>, vector<64x256xf32> -> vector<64x256xf32>
    %c0_28 = arith.constant 0 : index
    %c0_29 = arith.constant 0 : index
    %c0_30 = arith.constant 0 : index
    %36 = vector.load %arg5[%c0_28, %c0_29, %c0_30] : memref<2x1x256xf32, #tpu.memory_space<vmem>>, vector<1x1x256xf32>
    %37 = vector.shape_cast %36 : vector<1x1x256xf32> to vector<1x256xf32>
    %38 = vector.broadcast %37 : vector<1x256xf32> to vector<64x256xf32>
    %39 = arith.addf %35, %38 : vector<64x256xf32>
    %c0_31 = arith.constant 0 : index
    %c0_32 = arith.constant 0 : index
    %40 = vector.load %arg11[%c0_31, %c0_32] : memref<64x256xf32, #tpu.memory_space<vmem>>, vector<64x256xf32>
    tpu.vector_store %arg11[%c0_31, %c0_32], %39 {strides = array<i32>} : memref<64x256xf32, #tpu.memory_space<vmem>>, vector<64x256xf32>,
    %c0_33 = arith.constant 0 : index
    %c0_34 = arith.constant 0 : index
    %c0_35 = arith.constant 0 : index
    %41 = vector.load %arg4[%c0_33, %c0_34, %c0_35] : memref<2x64x256xbf16, #tpu.memory_space<vmem>>, vector<1x64x256xbf16>
    %42 = vector.shape_cast %41 : vector<1x64x256xbf16> to vector<64x256xbf16>
    %cst_36 = arith.constant 0.000000e+00 : f32
    %43 = vector.broadcast %cst_36 : f32 to vector<8x32xf32>
    %cst_37 = arith.constant 0.000000e+00 : f32
    %44 = vector.broadcast %cst_37 : f32 to vector<8x32xf32>
    %cst_38 = arith.constant 0.000000e+00 : f32
    %45 = vector.broadcast %cst_38 : f32 to vector<8x32xf32>
    %cst_39 = arith.constant 0.000000e+00 : f32
    %46 = vector.broadcast %cst_39 : f32 to vector<8x32xf32>
    %47 = tpu.concatenate %43, %45 in 1 : vector<8x32xf32>, vector<8x32xf32> -> vector<8x64xf32>
    %48 = arith.truncf %47 : vector<8x64xf32> to vector<8x64xbf16>
    %cst_40 = arith.constant dense<0.000000e+00> : vector<8x256xf32>
    %49 = tpu.matmul %48, %42, %cst_40 {dimension_numbers = #tpu.dot_dimension_numbers<[1], [0], [0], [1], [0, 0, 1, 1], [], []>} : vector<8x64xbf16>, vector<64x256xbf16>, vector<8x256xf32> -> vector<8x256xf32>
    %c0_41 = arith.constant 0 : index
    %c0_42 = arith.constant 0 : index
    %50 = vector.load %arg11[%c0_41, %c0_42] : memref<64x256xf32, #tpu.memory_space<vmem>>, vector<8x128xf32>
    %51 = vector.extract_strided_slice %49 {offsets = [0, 0], sizes = [8, 128], strides = [1, 1]} : vector<8x256xf32> to vector<8x128xf32>
    %52 = arith.addf %50, %51 : vector<8x128xf32>
    %c56 = arith.constant 56 : index
    %c128 = arith.constant 128 : index
    %53 = vector.load %arg11[%c56, %c128] : memref<64x256xf32, #tpu.memory_space<vmem>>, vector<8x128xf32>
    %54 = vector.extract_strided_slice %49 {offsets = [0, 128], sizes = [8, 128], strides = [1, 1]} : vector<8x256xf32> to vector<8x128xf32>
    %55 = arith.addf %53, %54 : vector<8x128xf32>
    %56 = vector.extract_strided_slice %52 {offsets = [0, 0], sizes = [8, 96], strides = [1, 1]} : vector<8x128xf32> to vector<8x96xf32>
    %57 = arith.negf %56 : vector<8x96xf32>
    %58 = math.exp %57 : vector<8x96xf32>
    %cst_43 = arith.constant 1.000000e+00 : f32
    %59 = vector.broadcast %cst_43 : f32 to vector<8x96xf32>
    %60 = arith.addf %59, %58 : vector<8x96xf32>
    %61 = arith.divf %59, %60 : vector<8x96xf32>
    %62 = vector.extract_strided_slice %61 {offsets = [0, 0], sizes = [8, 32], strides = [1, 1]} : vector<8x96xf32> to vector<8x32xf32>
    %63 = vector.extract_strided_slice %61 {offsets = [0, 32], sizes = [8, 32], strides = [1, 1]} : vector<8x96xf32> to vector<8x32xf32>
    %64 = vector.extract_strided_slice %61 {offsets = [0, 64], sizes = [8, 32], strides = [1, 1]} : vector<8x96xf32> to vector<8x32xf32>
    %65 = vector.extract_strided_slice %52 {offsets = [0, 96], sizes = [8, 32], strides = [1, 1]} : vector<8x128xf32> to vector<8x32xf32>
    %66 = math.tanh %65 : vector<8x32xf32>
    %67 = arith.mulf %63, %44 : vector<8x32xf32>
    %68 = arith.mulf %62, %66 : vector<8x32xf32>
    %69 = arith.addf %67, %68 : vector<8x32xf32>
    %70 = math.tanh %69 : vector<8x32xf32>
    %71 = arith.mulf %64, %70 : vector<8x32xf32>
    %72 = vector.extract_strided_slice %55 {offsets = [0, 0], sizes = [8, 96], strides = [1, 1]} : vector<8x128xf32> to vector<8x96xf32>
    %73 = arith.negf %72 : vector<8x96xf32>
    %74 = math.exp %73 : vector<8x96xf32>
    %cst_44 = arith.constant 1.000000e+00 : f32
    %75 = vector.broadcast %cst_44 : f32 to vector<8x96xf32>
    %76 = arith.addf %75, %74 : vector<8x96xf32>
    %77 = arith.divf %75, %76 : vector<8x96xf32>
    %78 = vector.extract_strided_slice %77 {offsets = [0, 0], sizes = [8, 32], strides = [1, 1]} : vector<8x96xf32> to vector<8x32xf32>
    %79 = vector.extract_strided_slice %77 {offsets = [0, 32], sizes = [8, 32], strides = [1, 1]} : vector<8x96xf32> to vector<8x32xf32>
    %80 = vector.extract_strided_slice %77 {offsets = [0, 64], sizes = [8, 32], strides = [1, 1]} : vector<8x96xf32> to vector<8x32xf32>
    %81 = vector.extract_strided_slice %55 {offsets = [0, 96], sizes = [8, 32], strides = [1, 1]} : vector<8x128xf32> to vector<8x32xf32>
    %82 = math.tanh %81 : vector<8x32xf32>
    %83 = arith.mulf %79, %46 : vector<8x32xf32>
    %84 = arith.mulf %78, %82 : vector<8x32xf32>
    %85 = arith.addf %83, %84 : vector<8x32xf32>
    %86 = math.tanh %85 : vector<8x32xf32>
    %87 = arith.mulf %80, %86 : vector<8x32xf32>
    %cst_45 = arith.constant 0.000000e+00 : f32
    %88 = vector.broadcast %cst_45 : f32 to vector<8x32xf32>
    %89 = arith.select %3, %71, %88 : vector<8x32xi1>, vector<8x32xf32>
    %cst_46 = arith.constant 0.000000e+00 : f32
    %90 = vector.broadcast %cst_46 : f32 to vector<8x32xf32>
    %91 = arith.select %31, %87, %90 : vector<8x32xi1>, vector<8x32xf32>
    %92 = arith.select %3, %71, %43 : vector<8x32xi1>, vector<8x32xf32>
    %93 = arith.select %3, %69, %44 : vector<8x32xi1>, vector<8x32xf32>
    %94 = arith.select %31, %87, %45 : vector<8x32xi1>, vector<8x32xf32>
    %95 = arith.select %31, %85, %46 : vector<8x32xi1>, vector<8x32xf32>
    %c0_47 = arith.constant 0 : index
    %c0_48 = arith.constant 0 : index
    %96 = vector.load %arg12[%c0_47, %c0_48] : memref<64x32xf32, #tpu.memory_space<vmem>>, vector<8x32xf32>
    tpu.vector_store %arg12[%c0_47, %c0_48], %89 {strides = array<i32>} : memref<64x32xf32, #tpu.memory_space<vmem>>, vector<8x32xf32>,
    %c56_49 = arith.constant 56 : index
    %c0_50 = arith.constant 0 : index
    %97 = vector.load %arg13[%c56_49, %c0_50] : memref<64x32xf32, #tpu.memory_space<vmem>>, vector<8x32xf32>
    tpu.vector_store %arg13[%c56_49, %c0_50], %91 {strides = array<i32>} : memref<64x32xf32, #tpu.memory_space<vmem>>, vector<8x32xf32>,
    %98 = tpu.concatenate %92, %94 in 1 : vector<8x32xf32>, vector<8x32xf32> -> vector<8x64xf32>
    %99 = arith.truncf %98 : vector<8x64xf32> to vector<8x64xbf16>
    %cst_51 = arith.constant dense<0.000000e+00> : vector<8x256xf32>
    %100 = tpu.matmul %99, %42, %cst_51 {dimension_numbers = #tpu.dot_dimension_numbers<[1], [0], [0], [1], [0, 0, 1, 1], [], []>} : vector<8x64xbf16>, vector<64x256xbf16>, vector<8x256xf32> -> vector<8x256xf32>
    %c8 = arith.constant 8 : index
    %c0_52 = arith.constant 0 : index
    %101 = vector.load %arg11[%c8, %c0_52] : memref<64x256xf32, #tpu.memory_space<vmem>>, vector<8x128xf32>
    %102 = vector.extract_strided_slice %100 {offsets = [0, 0], sizes = [8, 128], strides = [1, 1]} : vector<8x256xf32> to vector<8x128xf32>
    %103 = arith.addf %101, %102 : vector<8x128xf32>
    %c48 = arith.constant 48 : index
    %c128_53 = arith.constant 128 : index
    %104 = vector.load %arg11[%c48, %c128_53] : memref<64x256xf32, #tpu.memory_space<vmem>>, vector<8x128xf32>
    %105 = vector.extract_strided_slice %100 {offsets = [0, 128], sizes = [8, 128], strides = [1, 1]} : vector<8x256xf32> to vector<8x128xf32>
    %106 = arith.addf %104, %105 : vector<8x128xf32>
    %107 = vector.extract_strided_slice %103 {offsets = [0, 0], sizes = [8, 96], strides = [1, 1]} : vector<8x128xf32> to vector<8x96xf32>
    %108 = arith.negf %107 : vector<8x96xf32>
    %109 = math.exp %108 : vector<8x96xf32>
    %cst_54 = arith.constant 1.000000e+00 : f32
    %110 = vector.broadcast %cst_54 : f32 to vector<8x96xf32>
    %111 = arith.addf %110, %109 : vector<8x96xf32>
    %112 = arith.divf %110, %111 : vector<8x96xf32>
    %113 = vector.extract_strided_slice %112 {offsets = [0, 0], sizes = [8, 32], strides = [1, 1]} : vector<8x96xf32> to vector<8x32xf32>
    %114 = vector.extract_strided_slice %112 {offsets = [0, 32], sizes = [8, 32], strides = [1, 1]} : vector<8x96xf32> to vector<8x32xf32>
    %115 = vector.extract_strided_slice %112 {offsets = [0, 64], sizes = [8, 32], strides = [1, 1]} : vector<8x96xf32> to vector<8x32xf32>
    %116 = vector.extract_strided_slice %103 {offsets = [0, 96], sizes = [8, 32], strides = [1, 1]} : vector<8x128xf32> to vector<8x32xf32>
    %117 = math.tanh %116 : vector<8x32xf32>
    %118 = arith.mulf %114, %93 : vector<8x32xf32>
    %119 = arith.mulf %113, %117 : vector<8x32xf32>
    %120 = arith.addf %118, %119 : vector<8x32xf32>
    %121 = math.tanh %120 : vector<8x32xf32>
    %122 = arith.mulf %115, %121 : vector<8x32xf32>
    %123 = vector.extract_strided_slice %106 {offsets = [0, 0], sizes = [8, 96], strides = [1, 1]} : vector<8x128xf32> to vector<8x96xf32>
    %124 = arith.negf %123 : vector<8x96xf32>
    %125 = math.exp %124 : vector<8x96xf32>
    %cst_55 = arith.constant 1.000000e+00 : f32
    %126 = vector.broadcast %cst_55 : f32 to vector<8x96xf32>
    %127 = arith.addf %126, %125 : vector<8x96xf32>
    %128 = arith.divf %126, %127 : vector<8x96xf32>
    %129 = vector.extract_strided_slice %128 {offsets = [0, 0], sizes = [8, 32], strides = [1, 1]} : vector<8x96xf32> to vector<8x32xf32>
    %130 = vector.extract_strided_slice %128 {offsets = [0, 32], sizes = [8, 32], strides = [1, 1]} : vector<8x96xf32> to vector<8x32xf32>
    %131 = vector.extract_strided_slice %128 {offsets = [0, 64], sizes = [8, 32], strides = [1, 1]} : vector<8x96xf32> to vector<8x32xf32>
    %132 = vector.extract_strided_slice %106 {offsets = [0, 96], sizes = [8, 32], strides = [1, 1]} : vector<8x128xf32> to vector<8x32xf32>
    %133 = math.tanh %132 : vector<8x32xf32>
    %134 = arith.mulf %130, %95 : vector<8x32xf32>
    %135 = arith.mulf %129, %133 : vector<8x32xf32>
    %136 = arith.addf %134, %135 : vector<8x32xf32>
    %137 = math.tanh %136 : vector<8x32xf32>
    %138 = arith.mulf %131, %137 : vector<8x32xf32>
    %cst_56 = arith.constant 0.000000e+00 : f32
    %139 = vector.broadcast %cst_56 : f32 to vector<8x32xf32>
    %140 = arith.select %7, %122, %139 : vector<8x32xi1>, vector<8x32xf32>
    %cst_57 = arith.constant 0.000000e+00 : f32
    %141 = vector.broadcast %cst_57 : f32 to vector<8x32xf32>
    %142 = arith.select %27, %138, %141 : vector<8x32xi1>, vector<8x32xf32>
    %143 = arith.select %7, %122, %92 : vector<8x32xi1>, vector<8x32xf32>
    %144 = arith.select %7, %120, %93 : vector<8x32xi1>, vector<8x32xf32>
    %145 = arith.select %27, %138, %94 : vector<8x32xi1>, vector<8x32xf32>
    %146 = arith.select %27, %136, %95 : vector<8x32xi1>, vector<8x32xf32>
    %c8_58 = arith.constant 8 : index
    %c0_59 = arith.constant 0 : index
    %147 = vector.load %arg12[%c8_58, %c0_59] : memref<64x32xf32, #tpu.memory_space<vmem>>, vector<8x32xf32>
    tpu.vector_store %arg12[%c8_58, %c0_59], %140 {strides = array<i32>} : memref<64x32xf32, #tpu.memory_space<vmem>>, vector<8x32xf32>,
    %c48_60 = arith.constant 48 : index
    %c0_61 = arith.constant 0 : index
    %148 = vector.load %arg13[%c48_60, %c0_61] : memref<64x32xf32, #tpu.memory_space<vmem>>, vector<8x32xf32>
    tpu.vector_store %arg13[%c48_60, %c0_61], %142 {strides = array<i32>} : memref<64x32xf32, #tpu.memory_space<vmem>>, vector<8x32xf32>,
    %149 = tpu.concatenate %143, %145 in 1 : vector<8x32xf32>, vector<8x32xf32> -> vector<8x64xf32>
    %150 = arith.truncf %149 : vector<8x64xf32> to vector<8x64xbf16>
    %cst_62 = arith.constant dense<0.000000e+00> : vector<8x256xf32>
    %151 = tpu.matmul %150, %42, %cst_62 {dimension_numbers = #tpu.dot_dimension_numbers<[1], [0], [0], [1], [0, 0, 1, 1], [], []>} : vector<8x64xbf16>, vector<64x256xbf16>, vector<8x256xf32> -> vector<8x256xf32>
    %c16 = arith.constant 16 : index
    %c0_63 = arith.constant 0 : index
    %152 = vector.load %arg11[%c16, %c0_63] : memref<64x256xf32, #tpu.memory_space<vmem>>, vector<8x128xf32>
    %153 = vector.extract_strided_slice %151 {offsets = [0, 0], sizes = [8, 128], strides = [1, 1]} : vector<8x256xf32> to vector<8x128xf32>
    %154 = arith.addf %152, %153 : vector<8x128xf32>
    %c40 = arith.constant 40 : index
    %c128_64 = arith.constant 128 : index
    %155 = vector.load %arg11[%c40, %c128_64] : memref<64x256xf32, #tpu.memory_space<vmem>>, vector<8x128xf32>
    %156 = vector.extract_strided_slice %151 {offsets = [0, 128], sizes = [8, 128], strides = [1, 1]} : vector<8x256xf32> to vector<8x128xf32>
    %157 = arith.addf %155, %156 : vector<8x128xf32>
    %158 = vector.extract_strided_slice %154 {offsets = [0, 0], sizes = [8, 96], strides = [1, 1]} : vector<8x128xf32> to vector<8x96xf32>
    %159 = arith.negf %158 : vector<8x96xf32>
    %160 = math.exp %159 : vector<8x96xf32>
    %cst_65 = arith.constant 1.000000e+00 : f32
    %161 = vector.broadcast %cst_65 : f32 to vector<8x96xf32>
    %162 = arith.addf %161, %160 : vector<8x96xf32>
    %163 = arith.divf %161, %162 : vector<8x96xf32>
    %164 = vector.extract_strided_slice %163 {offsets = [0, 0], sizes = [8, 32], strides = [1, 1]} : vector<8x96xf32> to vector<8x32xf32>
    %165 = vector.extract_strided_slice %163 {offsets = [0, 32], sizes = [8, 32], strides = [1, 1]} : vector<8x96xf32> to vector<8x32xf32>
    %166 = vector.extract_strided_slice %163 {offsets = [0, 64], sizes = [8, 32], strides = [1, 1]} : vector<8x96xf32> to vector<8x32xf32>
    %167 = vector.extract_strided_slice %154 {offsets = [0, 96], sizes = [8, 32], strides = [1, 1]} : vector<8x128xf32> to vector<8x32xf32>
    %168 = math.tanh %167 : vector<8x32xf32>
    %169 = arith.mulf %165, %144 : vector<8x32xf32>
    %170 = arith.mulf %164, %168 : vector<8x32xf32>
    %171 = arith.addf %169, %170 : vector<8x32xf32>
    %172 = math.tanh %171 : vector<8x32xf32>
    %173 = arith.mulf %166, %172 : vector<8x32xf32>
    %174 = vector.extract_strided_slice %157 {offsets = [0, 0], sizes = [8, 96], strides = [1, 1]} : vector<8x128xf32> to vector<8x96xf32>
    %175 = arith.negf %174 : vector<8x96xf32>
    %176 = math.exp %175 : vector<8x96xf32>
    %cst_66 = arith.constant 1.000000e+00 : f32
    %177 = vector.broadcast %cst_66 : f32 to vector<8x96xf32>
    %178 = arith.addf %177, %176 : vector<8x96xf32>
    %179 = arith.divf %177, %178 : vector<8x96xf32>
    %180 = vector.extract_strided_slice %179 {offsets = [0, 0], sizes = [8, 32], strides = [1, 1]} : vector<8x96xf32> to vector<8x32xf32>
    %181 = vector.extract_strided_slice %179 {offsets = [0, 32], sizes = [8, 32], strides = [1, 1]} : vector<8x96xf32> to vector<8x32xf32>
    %182 = vector.extract_strided_slice %179 {offsets = [0, 64], sizes = [8, 32], strides = [1, 1]} : vector<8x96xf32> to vector<8x32xf32>
    %183 = vector.extract_strided_slice %157 {offsets = [0, 96], sizes = [8, 32], strides = [1, 1]} : vector<8x128xf32> to vector<8x32xf32>
    %184 = math.tanh %183 : vector<8x32xf32>
    %185 = arith.mulf %181, %146 : vector<8x32xf32>
    %186 = arith.mulf %180, %184 : vector<8x32xf32>
    %187 = arith.addf %185, %186 : vector<8x32xf32>
    %188 = math.tanh %187 : vector<8x32xf32>
    %189 = arith.mulf %182, %188 : vector<8x32xf32>
    %cst_67 = arith.constant 0.000000e+00 : f32
    %190 = vector.broadcast %cst_67 : f32 to vector<8x32xf32>
    %191 = arith.select %11, %173, %190 : vector<8x32xi1>, vector<8x32xf32>
    %cst_68 = arith.constant 0.000000e+00 : f32
    %192 = vector.broadcast %cst_68 : f32 to vector<8x32xf32>
    %193 = arith.select %23, %189, %192 : vector<8x32xi1>, vector<8x32xf32>
    %194 = arith.select %11, %173, %143 : vector<8x32xi1>, vector<8x32xf32>
    %195 = arith.select %11, %171, %144 : vector<8x32xi1>, vector<8x32xf32>
    %196 = arith.select %23, %189, %145 : vector<8x32xi1>, vector<8x32xf32>
    %197 = arith.select %23, %187, %146 : vector<8x32xi1>, vector<8x32xf32>
    %c16_69 = arith.constant 16 : index
    %c0_70 = arith.constant 0 : index
    %198 = vector.load %arg12[%c16_69, %c0_70] : memref<64x32xf32, #tpu.memory_space<vmem>>, vector<8x32xf32>
    tpu.vector_store %arg12[%c16_69, %c0_70], %191 {strides = array<i32>} : memref<64x32xf32, #tpu.memory_space<vmem>>, vector<8x32xf32>,
    %c40_71 = arith.constant 40 : index
    %c0_72 = arith.constant 0 : index
    %199 = vector.load %arg13[%c40_71, %c0_72] : memref<64x32xf32, #tpu.memory_space<vmem>>, vector<8x32xf32>
    tpu.vector_store %arg13[%c40_71, %c0_72], %193 {strides = array<i32>} : memref<64x32xf32, #tpu.memory_space<vmem>>, vector<8x32xf32>,
    %200 = tpu.concatenate %194, %196 in 1 : vector<8x32xf32>, vector<8x32xf32> -> vector<8x64xf32>
    %201 = arith.truncf %200 : vector<8x64xf32> to vector<8x64xbf16>
    %cst_73 = arith.constant dense<0.000000e+00> : vector<8x256xf32>
    %202 = tpu.matmul %201, %42, %cst_73 {dimension_numbers = #tpu.dot_dimension_numbers<[1], [0], [0], [1], [0, 0, 1, 1], [], []>} : vector<8x64xbf16>, vector<64x256xbf16>, vector<8x256xf32> -> vector<8x256xf32>
    %c24 = arith.constant 24 : index
    %c0_74 = arith.constant 0 : index
    %203 = vector.load %arg11[%c24, %c0_74] : memref<64x256xf32, #tpu.memory_space<vmem>>, vector<8x128xf32>
    %204 = vector.extract_strided_slice %202 {offsets = [0, 0], sizes = [8, 128], strides = [1, 1]} : vector<8x256xf32> to vector<8x128xf32>
    %205 = arith.addf %203, %204 : vector<8x128xf32>
    %c32 = arith.constant 32 : index
    %c128_75 = arith.constant 128 : index
    %206 = vector.load %arg11[%c32, %c128_75] : memref<64x256xf32, #tpu.memory_space<vmem>>, vector<8x128xf32>
    %207 = vector.extract_strided_slice %202 {offsets = [0, 128], sizes = [8, 128], strides = [1, 1]} : vector<8x256xf32> to vector<8x128xf32>
    %208 = arith.addf %206, %207 : vector<8x128xf32>
    %209 = vector.extract_strided_slice %205 {offsets = [0, 0], sizes = [8, 96], strides = [1, 1]} : vector<8x128xf32> to vector<8x96xf32>
    %210 = arith.negf %209 : vector<8x96xf32>
    %211 = math.exp %210 : vector<8x96xf32>
    %cst_76 = arith.constant 1.000000e+00 : f32
    %212 = vector.broadcast %cst_76 : f32 to vector<8x96xf32>
    %213 = arith.addf %212, %211 : vector<8x96xf32>
    %214 = arith.divf %212, %213 : vector<8x96xf32>
    %215 = vector.extract_strided_slice %214 {offsets = [0, 0], sizes = [8, 32], strides = [1, 1]} : vector<8x96xf32> to vector<8x32xf32>
    %216 = vector.extract_strided_slice %214 {offsets = [0, 32], sizes = [8, 32], strides = [1, 1]} : vector<8x96xf32> to vector<8x32xf32>
    %217 = vector.extract_strided_slice %214 {offsets = [0, 64], sizes = [8, 32], strides = [1, 1]} : vector<8x96xf32> to vector<8x32xf32>
    %218 = vector.extract_strided_slice %205 {offsets = [0, 96], sizes = [8, 32], strides = [1, 1]} : vector<8x128xf32> to vector<8x32xf32>
    %219 = math.tanh %218 : vector<8x32xf32>
    %220 = arith.mulf %216, %195 : vector<8x32xf32>
    %221 = arith.mulf %215, %219 : vector<8x32xf32>
    %222 = arith.addf %220, %221 : vector<8x32xf32>
    %223 = math.tanh %222 : vector<8x32xf32>
    %224 = arith.mulf %217, %223 : vector<8x32xf32>
    %225 = vector.extract_strided_slice %208 {offsets = [0, 0], sizes = [8, 96], strides = [1, 1]} : vector<8x128xf32> to vector<8x96xf32>
    %226 = arith.negf %225 : vector<8x96xf32>
    %227 = math.exp %226 : vector<8x96xf32>
    %cst_77 = arith.constant 1.000000e+00 : f32
    %228 = vector.broadcast %cst_77 : f32 to vector<8x96xf32>
    %229 = arith.addf %228, %227 : vector<8x96xf32>
    %230 = arith.divf %228, %229 : vector<8x96xf32>
    %231 = vector.extract_strided_slice %230 {offsets = [0, 0], sizes = [8, 32], strides = [1, 1]} : vector<8x96xf32> to vector<8x32xf32>
    %232 = vector.extract_strided_slice %230 {offsets = [0, 32], sizes = [8, 32], strides = [1, 1]} : vector<8x96xf32> to vector<8x32xf32>
    %233 = vector.extract_strided_slice %230 {offsets = [0, 64], sizes = [8, 32], strides = [1, 1]} : vector<8x96xf32> to vector<8x32xf32>
    %234 = vector.extract_strided_slice %208 {offsets = [0, 96], sizes = [8, 32], strides = [1, 1]} : vector<8x128xf32> to vector<8x32xf32>
    %235 = math.tanh %234 : vector<8x32xf32>
    %236 = arith.mulf %232, %197 : vector<8x32xf32>
    %237 = arith.mulf %231, %235 : vector<8x32xf32>
    %238 = arith.addf %236, %237 : vector<8x32xf32>
    %239 = math.tanh %238 : vector<8x32xf32>
    %240 = arith.mulf %233, %239 : vector<8x32xf32>
    %cst_78 = arith.constant 0.000000e+00 : f32
    %241 = vector.broadcast %cst_78 : f32 to vector<8x32xf32>
    %242 = arith.select %15, %224, %241 : vector<8x32xi1>, vector<8x32xf32>
    %cst_79 = arith.constant 0.000000e+00 : f32
    %243 = vector.broadcast %cst_79 : f32 to vector<8x32xf32>
    %244 = arith.select %19, %240, %243 : vector<8x32xi1>, vector<8x32xf32>
    %245 = arith.select %15, %224, %194 : vector<8x32xi1>, vector<8x32xf32>
    %246 = arith.select %15, %222, %195 : vector<8x32xi1>, vector<8x32xf32>
    %247 = arith.select %19, %240, %196 : vector<8x32xi1>, vector<8x32xf32>
    %248 = arith.select %19, %238, %197 : vector<8x32xi1>, vector<8x32xf32>
    %c24_80 = arith.constant 24 : index
    %c0_81 = arith.constant 0 : index
    %249 = vector.load %arg12[%c24_80, %c0_81] : memref<64x32xf32, #tpu.memory_space<vmem>>, vector<8x32xf32>
    tpu.vector_store %arg12[%c24_80, %c0_81], %242 {strides = array<i32>} : memref<64x32xf32, #tpu.memory_space<vmem>>, vector<8x32xf32>,
    %c32_82 = arith.constant 32 : index
    %c0_83 = arith.constant 0 : index
    %250 = vector.load %arg13[%c32_82, %c0_83] : memref<64x32xf32, #tpu.memory_space<vmem>>, vector<8x32xf32>
    tpu.vector_store %arg13[%c32_82, %c0_83], %244 {strides = array<i32>} : memref<64x32xf32, #tpu.memory_space<vmem>>, vector<8x32xf32>,
    %251 = tpu.concatenate %245, %247 in 1 : vector<8x32xf32>, vector<8x32xf32> -> vector<8x64xf32>
    %252 = arith.truncf %251 : vector<8x64xf32> to vector<8x64xbf16>
    %cst_84 = arith.constant dense<0.000000e+00> : vector<8x256xf32>
    %253 = tpu.matmul %252, %42, %cst_84 {dimension_numbers = #tpu.dot_dimension_numbers<[1], [0], [0], [1], [0, 0, 1, 1], [], []>} : vector<8x64xbf16>, vector<64x256xbf16>, vector<8x256xf32> -> vector<8x256xf32>
    %c32_85 = arith.constant 32 : index
    %c0_86 = arith.constant 0 : index
    %254 = vector.load %arg11[%c32_85, %c0_86] : memref<64x256xf32, #tpu.memory_space<vmem>>, vector<8x128xf32>
    %255 = vector.extract_strided_slice %253 {offsets = [0, 0], sizes = [8, 128], strides = [1, 1]} : vector<8x256xf32> to vector<8x128xf32>
    %256 = arith.addf %254, %255 : vector<8x128xf32>
    %c24_87 = arith.constant 24 : index
    %c128_88 = arith.constant 128 : index
    %257 = vector.load %arg11[%c24_87, %c128_88] : memref<64x256xf32, #tpu.memory_space<vmem>>, vector<8x128xf32>
    %258 = vector.extract_strided_slice %253 {offsets = [0, 128], sizes = [8, 128], strides = [1, 1]} : vector<8x256xf32> to vector<8x128xf32>
    %259 = arith.addf %257, %258 : vector<8x128xf32>
    %260 = vector.extract_strided_slice %256 {offsets = [0, 0], sizes = [8, 96], strides = [1, 1]} : vector<8x128xf32> to vector<8x96xf32>
    %261 = arith.negf %260 : vector<8x96xf32>
    %262 = math.exp %261 : vector<8x96xf32>
    %cst_89 = arith.constant 1.000000e+00 : f32
    %263 = vector.broadcast %cst_89 : f32 to vector<8x96xf32>
    %264 = arith.addf %263, %262 : vector<8x96xf32>
    %265 = arith.divf %263, %264 : vector<8x96xf32>
    %266 = vector.extract_strided_slice %265 {offsets = [0, 0], sizes = [8, 32], strides = [1, 1]} : vector<8x96xf32> to vector<8x32xf32>
    %267 = vector.extract_strided_slice %265 {offsets = [0, 32], sizes = [8, 32], strides = [1, 1]} : vector<8x96xf32> to vector<8x32xf32>
    %268 = vector.extract_strided_slice %265 {offsets = [0, 64], sizes = [8, 32], strides = [1, 1]} : vector<8x96xf32> to vector<8x32xf32>
    %269 = vector.extract_strided_slice %256 {offsets = [0, 96], sizes = [8, 32], strides = [1, 1]} : vector<8x128xf32> to vector<8x32xf32>
    %270 = math.tanh %269 : vector<8x32xf32>
    %271 = arith.mulf %267, %246 : vector<8x32xf32>
    %272 = arith.mulf %266, %270 : vector<8x32xf32>
    %273 = arith.addf %271, %272 : vector<8x32xf32>
    %274 = math.tanh %273 : vector<8x32xf32>
    %275 = arith.mulf %268, %274 : vector<8x32xf32>
    %276 = vector.extract_strided_slice %259 {offsets = [0, 0], sizes = [8, 96], strides = [1, 1]} : vector<8x128xf32> to vector<8x96xf32>
    %277 = arith.negf %276 : vector<8x96xf32>
    %278 = math.exp %277 : vector<8x96xf32>
    %cst_90 = arith.constant 1.000000e+00 : f32
    %279 = vector.broadcast %cst_90 : f32 to vector<8x96xf32>
    %280 = arith.addf %279, %278 : vector<8x96xf32>
    %281 = arith.divf %279, %280 : vector<8x96xf32>
    %282 = vector.extract_strided_slice %281 {offsets = [0, 0], sizes = [8, 32], strides = [1, 1]} : vector<8x96xf32> to vector<8x32xf32>
    %283 = vector.extract_strided_slice %281 {offsets = [0, 32], sizes = [8, 32], strides = [1, 1]} : vector<8x96xf32> to vector<8x32xf32>
    %284 = vector.extract_strided_slice %281 {offsets = [0, 64], sizes = [8, 32], strides = [1, 1]} : vector<8x96xf32> to vector<8x32xf32>
    %285 = vector.extract_strided_slice %259 {offsets = [0, 96], sizes = [8, 32], strides = [1, 1]} : vector<8x128xf32> to vector<8x32xf32>
    %286 = math.tanh %285 : vector<8x32xf32>
    %287 = arith.mulf %283, %248 : vector<8x32xf32>
    %288 = arith.mulf %282, %286 : vector<8x32xf32>
    %289 = arith.addf %287, %288 : vector<8x32xf32>
    %290 = math.tanh %289 : vector<8x32xf32>
    %291 = arith.mulf %284, %290 : vector<8x32xf32>
    %cst_91 = arith.constant 0.000000e+00 : f32
    %292 = vector.broadcast %cst_91 : f32 to vector<8x32xf32>
    %293 = arith.select %19, %275, %292 : vector<8x32xi1>, vector<8x32xf32>
    %cst_92 = arith.constant 0.000000e+00 : f32
    %294 = vector.broadcast %cst_92 : f32 to vector<8x32xf32>
    %295 = arith.select %15, %291, %294 : vector<8x32xi1>, vector<8x32xf32>
    %296 = arith.select %19, %275, %245 : vector<8x32xi1>, vector<8x32xf32>
    %297 = arith.select %19, %273, %246 : vector<8x32xi1>, vector<8x32xf32>
    %298 = arith.select %15, %291, %247 : vector<8x32xi1>, vector<8x32xf32>
    %299 = arith.select %15, %289, %248 : vector<8x32xi1>, vector<8x32xf32>
    %c32_93 = arith.constant 32 : index
    %c0_94 = arith.constant 0 : index
    %300 = vector.load %arg12[%c32_93, %c0_94] : memref<64x32xf32, #tpu.memory_space<vmem>>, vector<8x32xf32>
    tpu.vector_store %arg12[%c32_93, %c0_94], %293 {strides = array<i32>} : memref<64x32xf32, #tpu.memory_space<vmem>>, vector<8x32xf32>,
    %c24_95 = arith.constant 24 : index
    %c0_96 = arith.constant 0 : index
    %301 = vector.load %arg13[%c24_95, %c0_96] : memref<64x32xf32, #tpu.memory_space<vmem>>, vector<8x32xf32>
    tpu.vector_store %arg13[%c24_95, %c0_96], %295 {strides = array<i32>} : memref<64x32xf32, #tpu.memory_space<vmem>>, vector<8x32xf32>,
    %302 = tpu.concatenate %296, %298 in 1 : vector<8x32xf32>, vector<8x32xf32> -> vector<8x64xf32>
    %303 = arith.truncf %302 : vector<8x64xf32> to vector<8x64xbf16>
    %cst_97 = arith.constant dense<0.000000e+00> : vector<8x256xf32>
    %304 = tpu.matmul %303, %42, %cst_97 {dimension_numbers = #tpu.dot_dimension_numbers<[1], [0], [0], [1], [0, 0, 1, 1], [], []>} : vector<8x64xbf16>, vector<64x256xbf16>, vector<8x256xf32> -> vector<8x256xf32>
    %c40_98 = arith.constant 40 : index
    %c0_99 = arith.constant 0 : index
    %305 = vector.load %arg11[%c40_98, %c0_99] : memref<64x256xf32, #tpu.memory_space<vmem>>, vector<8x128xf32>
    %306 = vector.extract_strided_slice %304 {offsets = [0, 0], sizes = [8, 128], strides = [1, 1]} : vector<8x256xf32> to vector<8x128xf32>
    %307 = arith.addf %305, %306 : vector<8x128xf32>
    %c16_100 = arith.constant 16 : index
    %c128_101 = arith.constant 128 : index
    %308 = vector.load %arg11[%c16_100, %c128_101] : memref<64x256xf32, #tpu.memory_space<vmem>>, vector<8x128xf32>
    %309 = vector.extract_strided_slice %304 {offsets = [0, 128], sizes = [8, 128], strides = [1, 1]} : vector<8x256xf32> to vector<8x128xf32>
    %310 = arith.addf %308, %309 : vector<8x128xf32>
    %311 = vector.extract_strided_slice %307 {offsets = [0, 0], sizes = [8, 96], strides = [1, 1]} : vector<8x128xf32> to vector<8x96xf32>
    %312 = arith.negf %311 : vector<8x96xf32>
    %313 = math.exp %312 : vector<8x96xf32>
    %cst_102 = arith.constant 1.000000e+00 : f32
    %314 = vector.broadcast %cst_102 : f32 to vector<8x96xf32>
    %315 = arith.addf %314, %313 : vector<8x96xf32>
    %316 = arith.divf %314, %315 : vector<8x96xf32>
    %317 = vector.extract_strided_slice %316 {offsets = [0, 0], sizes = [8, 32], strides = [1, 1]} : vector<8x96xf32> to vector<8x32xf32>
    %318 = vector.extract_strided_slice %316 {offsets = [0, 32], sizes = [8, 32], strides = [1, 1]} : vector<8x96xf32> to vector<8x32xf32>
    %319 = vector.extract_strided_slice %316 {offsets = [0, 64], sizes = [8, 32], strides = [1, 1]} : vector<8x96xf32> to vector<8x32xf32>
    %320 = vector.extract_strided_slice %307 {offsets = [0, 96], sizes = [8, 32], strides = [1, 1]} : vector<8x128xf32> to vector<8x32xf32>
    %321 = math.tanh %320 : vector<8x32xf32>
    %322 = arith.mulf %318, %297 : vector<8x32xf32>
    %323 = arith.mulf %317, %321 : vector<8x32xf32>
    %324 = arith.addf %322, %323 : vector<8x32xf32>
    %325 = math.tanh %324 : vector<8x32xf32>
    %326 = arith.mulf %319, %325 : vector<8x32xf32>
    %327 = vector.extract_strided_slice %310 {offsets = [0, 0], sizes = [8, 96], strides = [1, 1]} : vector<8x128xf32> to vector<8x96xf32>
    %328 = arith.negf %327 : vector<8x96xf32>
    %329 = math.exp %328 : vector<8x96xf32>
    %cst_103 = arith.constant 1.000000e+00 : f32
    %330 = vector.broadcast %cst_103 : f32 to vector<8x96xf32>
    %331 = arith.addf %330, %329 : vector<8x96xf32>
    %332 = arith.divf %330, %331 : vector<8x96xf32>
    %333 = vector.extract_strided_slice %332 {offsets = [0, 0], sizes = [8, 32], strides = [1, 1]} : vector<8x96xf32> to vector<8x32xf32>
    %334 = vector.extract_strided_slice %332 {offsets = [0, 32], sizes = [8, 32], strides = [1, 1]} : vector<8x96xf32> to vector<8x32xf32>
    %335 = vector.extract_strided_slice %332 {offsets = [0, 64], sizes = [8, 32], strides = [1, 1]} : vector<8x96xf32> to vector<8x32xf32>
    %336 = vector.extract_strided_slice %310 {offsets = [0, 96], sizes = [8, 32], strides = [1, 1]} : vector<8x128xf32> to vector<8x32xf32>
    %337 = math.tanh %336 : vector<8x32xf32>
    %338 = arith.mulf %334, %299 : vector<8x32xf32>
    %339 = arith.mulf %333, %337 : vector<8x32xf32>
    %340 = arith.addf %338, %339 : vector<8x32xf32>
    %341 = math.tanh %340 : vector<8x32xf32>
    %342 = arith.mulf %335, %341 : vector<8x32xf32>
    %cst_104 = arith.constant 0.000000e+00 : f32
    %343 = vector.broadcast %cst_104 : f32 to vector<8x32xf32>
    %344 = arith.select %23, %326, %343 : vector<8x32xi1>, vector<8x32xf32>
    %cst_105 = arith.constant 0.000000e+00 : f32
    %345 = vector.broadcast %cst_105 : f32 to vector<8x32xf32>
    %346 = arith.select %11, %342, %345 : vector<8x32xi1>, vector<8x32xf32>
    %347 = arith.select %23, %326, %296 : vector<8x32xi1>, vector<8x32xf32>
    %348 = arith.select %23, %324, %297 : vector<8x32xi1>, vector<8x32xf32>
    %349 = arith.select %11, %342, %298 : vector<8x32xi1>, vector<8x32xf32>
    %350 = arith.select %11, %340, %299 : vector<8x32xi1>, vector<8x32xf32>
    %c40_106 = arith.constant 40 : index
    %c0_107 = arith.constant 0 : index
    %351 = vector.load %arg12[%c40_106, %c0_107] : memref<64x32xf32, #tpu.memory_space<vmem>>, vector<8x32xf32>
    tpu.vector_store %arg12[%c40_106, %c0_107], %344 {strides = array<i32>} : memref<64x32xf32, #tpu.memory_space<vmem>>, vector<8x32xf32>,
    %c16_108 = arith.constant 16 : index
    %c0_109 = arith.constant 0 : index
    %352 = vector.load %arg13[%c16_108, %c0_109] : memref<64x32xf32, #tpu.memory_space<vmem>>, vector<8x32xf32>
    tpu.vector_store %arg13[%c16_108, %c0_109], %346 {strides = array<i32>} : memref<64x32xf32, #tpu.memory_space<vmem>>, vector<8x32xf32>,
    %353 = tpu.concatenate %347, %349 in 1 : vector<8x32xf32>, vector<8x32xf32> -> vector<8x64xf32>
    %354 = arith.truncf %353 : vector<8x64xf32> to vector<8x64xbf16>
    %cst_110 = arith.constant dense<0.000000e+00> : vector<8x256xf32>
    %355 = tpu.matmul %354, %42, %cst_110 {dimension_numbers = #tpu.dot_dimension_numbers<[1], [0], [0], [1], [0, 0, 1, 1], [], []>} : vector<8x64xbf16>, vector<64x256xbf16>, vector<8x256xf32> -> vector<8x256xf32>
    %c48_111 = arith.constant 48 : index
    %c0_112 = arith.constant 0 : index
    %356 = vector.load %arg11[%c48_111, %c0_112] : memref<64x256xf32, #tpu.memory_space<vmem>>, vector<8x128xf32>
    %357 = vector.extract_strided_slice %355 {offsets = [0, 0], sizes = [8, 128], strides = [1, 1]} : vector<8x256xf32> to vector<8x128xf32>
    %358 = arith.addf %356, %357 : vector<8x128xf32>
    %c8_113 = arith.constant 8 : index
    %c128_114 = arith.constant 128 : index
    %359 = vector.load %arg11[%c8_113, %c128_114] : memref<64x256xf32, #tpu.memory_space<vmem>>, vector<8x128xf32>
    %360 = vector.extract_strided_slice %355 {offsets = [0, 128], sizes = [8, 128], strides = [1, 1]} : vector<8x256xf32> to vector<8x128xf32>
    %361 = arith.addf %359, %360 : vector<8x128xf32>
    %362 = vector.extract_strided_slice %358 {offsets = [0, 0], sizes = [8, 96], strides = [1, 1]} : vector<8x128xf32> to vector<8x96xf32>
    %363 = arith.negf %362 : vector<8x96xf32>
    %364 = math.exp %363 : vector<8x96xf32>
    %cst_115 = arith.constant 1.000000e+00 : f32
    %365 = vector.broadcast %cst_115 : f32 to vector<8x96xf32>
    %366 = arith.addf %365, %364 : vector<8x96xf32>
    %367 = arith.divf %365, %366 : vector<8x96xf32>
    %368 = vector.extract_strided_slice %367 {offsets = [0, 0], sizes = [8, 32], strides = [1, 1]} : vector<8x96xf32> to vector<8x32xf32>
    %369 = vector.extract_strided_slice %367 {offsets = [0, 32], sizes = [8, 32], strides = [1, 1]} : vector<8x96xf32> to vector<8x32xf32>
    %370 = vector.extract_strided_slice %367 {offsets = [0, 64], sizes = [8, 32], strides = [1, 1]} : vector<8x96xf32> to vector<8x32xf32>
    %371 = vector.extract_strided_slice %358 {offsets = [0, 96], sizes = [8, 32], strides = [1, 1]} : vector<8x128xf32> to vector<8x32xf32>
    %372 = math.tanh %371 : vector<8x32xf32>
    %373 = arith.mulf %369, %348 : vector<8x32xf32>
    %374 = arith.mulf %368, %372 : vector<8x32xf32>
    %375 = arith.addf %373, %374 : vector<8x32xf32>
    %376 = math.tanh %375 : vector<8x32xf32>
    %377 = arith.mulf %370, %376 : vector<8x32xf32>
    %378 = vector.extract_strided_slice %361 {offsets = [0, 0], sizes = [8, 96], strides = [1, 1]} : vector<8x128xf32> to vector<8x96xf32>
    %379 = arith.negf %378 : vector<8x96xf32>
    %380 = math.exp %379 : vector<8x96xf32>
    %cst_116 = arith.constant 1.000000e+00 : f32
    %381 = vector.broadcast %cst_116 : f32 to vector<8x96xf32>
    %382 = arith.addf %381, %380 : vector<8x96xf32>
    %383 = arith.divf %381, %382 : vector<8x96xf32>
    %384 = vector.extract_strided_slice %383 {offsets = [0, 0], sizes = [8, 32], strides = [1, 1]} : vector<8x96xf32> to vector<8x32xf32>
    %385 = vector.extract_strided_slice %383 {offsets = [0, 32], sizes = [8, 32], strides = [1, 1]} : vector<8x96xf32> to vector<8x32xf32>
    %386 = vector.extract_strided_slice %383 {offsets = [0, 64], sizes = [8, 32], strides = [1, 1]} : vector<8x96xf32> to vector<8x32xf32>
    %387 = vector.extract_strided_slice %361 {offsets = [0, 96], sizes = [8, 32], strides = [1, 1]} : vector<8x128xf32> to vector<8x32xf32>
    %388 = math.tanh %387 : vector<8x32xf32>
    %389 = arith.mulf %385, %350 : vector<8x32xf32>
    %390 = arith.mulf %384, %388 : vector<8x32xf32>
    %391 = arith.addf %389, %390 : vector<8x32xf32>
    %392 = math.tanh %391 : vector<8x32xf32>
    %393 = arith.mulf %386, %392 : vector<8x32xf32>
    %cst_117 = arith.constant 0.000000e+00 : f32
    %394 = vector.broadcast %cst_117 : f32 to vector<8x32xf32>
    %395 = arith.select %27, %377, %394 : vector<8x32xi1>, vector<8x32xf32>
    %cst_118 = arith.constant 0.000000e+00 : f32
    %396 = vector.broadcast %cst_118 : f32 to vector<8x32xf32>
    %397 = arith.select %7, %393, %396 : vector<8x32xi1>, vector<8x32xf32>
    %398 = arith.select %27, %377, %347 : vector<8x32xi1>, vector<8x32xf32>
    %399 = arith.select %27, %375, %348 : vector<8x32xi1>, vector<8x32xf32>
    %400 = arith.select %7, %393, %349 : vector<8x32xi1>, vector<8x32xf32>
    %401 = arith.select %7, %391, %350 : vector<8x32xi1>, vector<8x32xf32>
    %c48_119 = arith.constant 48 : index
    %c0_120 = arith.constant 0 : index
    %402 = vector.load %arg12[%c48_119, %c0_120] : memref<64x32xf32, #tpu.memory_space<vmem>>, vector<8x32xf32>
    tpu.vector_store %arg12[%c48_119, %c0_120], %395 {strides = array<i32>} : memref<64x32xf32, #tpu.memory_space<vmem>>, vector<8x32xf32>,
    %c8_121 = arith.constant 8 : index
    %c0_122 = arith.constant 0 : index
    %403 = vector.load %arg13[%c8_121, %c0_122] : memref<64x32xf32, #tpu.memory_space<vmem>>, vector<8x32xf32>
    tpu.vector_store %arg13[%c8_121, %c0_122], %397 {strides = array<i32>} : memref<64x32xf32, #tpu.memory_space<vmem>>, vector<8x32xf32>,
    %404 = tpu.concatenate %398, %400 in 1 : vector<8x32xf32>, vector<8x32xf32> -> vector<8x64xf32>
    %405 = arith.truncf %404 : vector<8x64xf32> to vector<8x64xbf16>
    %cst_123 = arith.constant dense<0.000000e+00> : vector<8x256xf32>
    %406 = tpu.matmul %405, %42, %cst_123 {dimension_numbers = #tpu.dot_dimension_numbers<[1], [0], [0], [1], [0, 0, 1, 1], [], []>} : vector<8x64xbf16>, vector<64x256xbf16>, vector<8x256xf32> -> vector<8x256xf32>
    %c56_124 = arith.constant 56 : index
    %c0_125 = arith.constant 0 : index
    %407 = vector.load %arg11[%c56_124, %c0_125] : memref<64x256xf32, #tpu.memory_space<vmem>>, vector<8x128xf32>
    %408 = vector.extract_strided_slice %406 {offsets = [0, 0], sizes = [8, 128], strides = [1, 1]} : vector<8x256xf32> to vector<8x128xf32>
    %409 = arith.addf %407, %408 : vector<8x128xf32>
    %c0_126 = arith.constant 0 : index
    %c128_127 = arith.constant 128 : index
    %410 = vector.load %arg11[%c0_126, %c128_127] : memref<64x256xf32, #tpu.memory_space<vmem>>, vector<8x128xf32>
    %411 = vector.extract_strided_slice %406 {offsets = [0, 128], sizes = [8, 128], strides = [1, 1]} : vector<8x256xf32> to vector<8x128xf32>
    %412 = arith.addf %410, %411 : vector<8x128xf32>
    %413 = vector.extract_strided_slice %409 {offsets = [0, 0], sizes = [8, 96], strides = [1, 1]} : vector<8x128xf32> to vector<8x96xf32>
    %414 = arith.negf %413 : vector<8x96xf32>
    %415 = math.exp %414 : vector<8x96xf32>
    %cst_128 = arith.constant 1.000000e+00 : f32
    %416 = vector.broadcast %cst_128 : f32 to vector<8x96xf32>
    %417 = arith.addf %416, %415 : vector<8x96xf32>
    %418 = arith.divf %416, %417 : vector<8x96xf32>
    %419 = vector.extract_strided_slice %418 {offsets = [0, 0], sizes = [8, 32], strides = [1, 1]} : vector<8x96xf32> to vector<8x32xf32>
    %420 = vector.extract_strided_slice %418 {offsets = [0, 32], sizes = [8, 32], strides = [1, 1]} : vector<8x96xf32> to vector<8x32xf32>
    %421 = vector.extract_strided_slice %418 {offsets = [0, 64], sizes = [8, 32], strides = [1, 1]} : vector<8x96xf32> to vector<8x32xf32>
    %422 = vector.extract_strided_slice %409 {offsets = [0, 96], sizes = [8, 32], strides = [1, 1]} : vector<8x128xf32> to vector<8x32xf32>
    %423 = math.tanh %422 : vector<8x32xf32>
    %424 = arith.mulf %420, %399 : vector<8x32xf32>
    %425 = arith.mulf %419, %423 : vector<8x32xf32>
    %426 = arith.addf %424, %425 : vector<8x32xf32>
    %427 = math.tanh %426 : vector<8x32xf32>
    %428 = arith.mulf %421, %427 : vector<8x32xf32>
    %429 = vector.extract_strided_slice %412 {offsets = [0, 0], sizes = [8, 96], strides = [1, 1]} : vector<8x128xf32> to vector<8x96xf32>
    %430 = arith.negf %429 : vector<8x96xf32>
    %431 = math.exp %430 : vector<8x96xf32>
    %cst_129 = arith.constant 1.000000e+00 : f32
    %432 = vector.broadcast %cst_129 : f32 to vector<8x96xf32>
    %433 = arith.addf %432, %431 : vector<8x96xf32>
    %434 = arith.divf %432, %433 : vector<8x96xf32>
    %435 = vector.extract_strided_slice %434 {offsets = [0, 0], sizes = [8, 32], strides = [1, 1]} : vector<8x96xf32> to vector<8x32xf32>
    %436 = vector.extract_strided_slice %434 {offsets = [0, 32], sizes = [8, 32], strides = [1, 1]} : vector<8x96xf32> to vector<8x32xf32>
    %437 = vector.extract_strided_slice %434 {offsets = [0, 64], sizes = [8, 32], strides = [1, 1]} : vector<8x96xf32> to vector<8x32xf32>
    %438 = vector.extract_strided_slice %412 {offsets = [0, 96], sizes = [8, 32], strides = [1, 1]} : vector<8x128xf32> to vector<8x32xf32>
    %439 = math.tanh %438 : vector<8x32xf32>
    %440 = arith.mulf %436, %401 : vector<8x32xf32>
    %441 = arith.mulf %435, %439 : vector<8x32xf32>
    %442 = arith.addf %440, %441 : vector<8x32xf32>
    %443 = math.tanh %442 : vector<8x32xf32>
    %444 = arith.mulf %437, %443 : vector<8x32xf32>
    %cst_130 = arith.constant 0.000000e+00 : f32
    %445 = vector.broadcast %cst_130 : f32 to vector<8x32xf32>
    %446 = arith.select %31, %428, %445 : vector<8x32xi1>, vector<8x32xf32>
    %cst_131 = arith.constant 0.000000e+00 : f32
    %447 = vector.broadcast %cst_131 : f32 to vector<8x32xf32>
    %448 = arith.select %3, %444, %447 : vector<8x32xi1>, vector<8x32xf32>
    %c56_132 = arith.constant 56 : index
    %c0_133 = arith.constant 0 : index
    %449 = vector.load %arg12[%c56_132, %c0_133] : memref<64x32xf32, #tpu.memory_space<vmem>>, vector<8x32xf32>
    tpu.vector_store %arg12[%c56_132, %c0_133], %446 {strides = array<i32>} : memref<64x32xf32, #tpu.memory_space<vmem>>, vector<8x32xf32>,
    %c0_134 = arith.constant 0 : index
    %c0_135 = arith.constant 0 : index
    %450 = vector.load %arg13[%c0_134, %c0_135] : memref<64x32xf32, #tpu.memory_space<vmem>>, vector<8x32xf32>
    tpu.vector_store %arg13[%c0_134, %c0_135], %448 {strides = array<i32>} : memref<64x32xf32, #tpu.memory_space<vmem>>, vector<8x32xf32>,
    %c0_136 = arith.constant 0 : index
    %c0_137 = arith.constant 0 : index
    %451 = vector.load %arg12[%c0_136, %c0_137] : memref<64x32xf32, #tpu.memory_space<vmem>>, vector<64x32xf32>
    %c0_138 = arith.constant 0 : index
    %c0_139 = arith.constant 0 : index
    %452 = vector.load %arg13[%c0_138, %c0_139] : memref<64x32xf32, #tpu.memory_space<vmem>>, vector<64x32xf32>
    %453 = tpu.concatenate %451, %452 in 1 : vector<64x32xf32>, vector<64x32xf32> -> vector<64x64xf32>
    %454 = arith.truncf %453 : vector<64x64xf32> to vector<64x64xbf16>
    %c0_140 = arith.constant 0 : index
    %c0_141 = arith.constant 0 : index
    %c0_142 = arith.constant 0 : index
    %455 = vector.load %arg3[%c0_140, %c0_141, %c0_142] : memref<1x64x256xbf16, #tpu.memory_space<vmem>>, vector<1x64x256xbf16>
    %456 = vector.shape_cast %455 : vector<1x64x256xbf16> to vector<64x256xbf16>
    %cst_143 = arith.constant dense<0.000000e+00> : vector<64x256xf32>
    %457 = tpu.matmul %454, %456, %cst_143 {dimension_numbers = #tpu.dot_dimension_numbers<[1], [0], [0], [1], [0, 0, 1, 1], [], []>} : vector<64x64xbf16>, vector<64x256xbf16>, vector<64x256xf32> -> vector<64x256xf32>
    %c1_144 = arith.constant 1 : index
    %c0_145 = arith.constant 0 : index
    %c0_146 = arith.constant 0 : index
    %458 = vector.load %arg5[%c1_144, %c0_145, %c0_146] : memref<2x1x256xf32, #tpu.memory_space<vmem>>, vector<1x1x256xf32>
    %459 = vector.shape_cast %458 : vector<1x1x256xf32> to vector<1x256xf32>
    %460 = vector.broadcast %459 : vector<1x256xf32> to vector<64x256xf32>
    %461 = arith.addf %457, %460 : vector<64x256xf32>
    %c0_147 = arith.constant 0 : index
    %c0_148 = arith.constant 0 : index
    %462 = vector.load %arg11[%c0_147, %c0_148] : memref<64x256xf32, #tpu.memory_space<vmem>>, vector<64x256xf32>
    tpu.vector_store %arg11[%c0_147, %c0_148], %461 {strides = array<i32>} : memref<64x256xf32, #tpu.memory_space<vmem>>, vector<64x256xf32>,
    %c1_149 = arith.constant 1 : index
    %c0_150 = arith.constant 0 : index
    %c0_151 = arith.constant 0 : index
    %463 = vector.load %arg4[%c1_149, %c0_150, %c0_151] : memref<2x64x256xbf16, #tpu.memory_space<vmem>>, vector<1x64x256xbf16>
    %464 = vector.shape_cast %463 : vector<1x64x256xbf16> to vector<64x256xbf16>
    %cst_152 = arith.constant 0.000000e+00 : f32
    %465 = vector.broadcast %cst_152 : f32 to vector<8x32xf32>
    %cst_153 = arith.constant 0.000000e+00 : f32
    %466 = vector.broadcast %cst_153 : f32 to vector<8x32xf32>
    %cst_154 = arith.constant 0.000000e+00 : f32
    %467 = vector.broadcast %cst_154 : f32 to vector<8x32xf32>
    %cst_155 = arith.constant 0.000000e+00 : f32
    %468 = vector.broadcast %cst_155 : f32 to vector<8x32xf32>
    %cst_156 = arith.constant 0.000000e+00 : f32
    %469 = vector.broadcast %cst_156 : f32 to vector<8x32xf32>
    %cst_157 = arith.constant 0.000000e+00 : f32
    %470 = vector.broadcast %cst_157 : f32 to vector<8x32xf32>
    %cst_158 = arith.constant 0xFF800000 : f32
    %471 = vector.broadcast %cst_158 : f32 to vector<8x32xf32>
    %cst_159 = arith.constant 0xFF800000 : f32
    %472 = vector.broadcast %cst_159 : f32 to vector<8x32xf32>
    %473 = tpu.concatenate %465, %467 in 1 : vector<8x32xf32>, vector<8x32xf32> -> vector<8x64xf32>
    %474 = arith.truncf %473 : vector<8x64xf32> to vector<8x64xbf16>
    %cst_160 = arith.constant dense<0.000000e+00> : vector<8x256xf32>
    %475 = tpu.matmul %474, %464, %cst_160 {dimension_numbers = #tpu.dot_dimension_numbers<[1], [0], [0], [1], [0, 0, 1, 1], [], []>} : vector<8x64xbf16>, vector<64x256xbf16>, vector<8x256xf32> -> vector<8x256xf32>
    %c0_161 = arith.constant 0 : index
    %c0_162 = arith.constant 0 : index
    %476 = vector.load %arg11[%c0_161, %c0_162] : memref<64x256xf32, #tpu.memory_space<vmem>>, vector<8x128xf32>
    %477 = vector.extract_strided_slice %475 {offsets = [0, 0], sizes = [8, 128], strides = [1, 1]} : vector<8x256xf32> to vector<8x128xf32>
    %478 = arith.addf %476, %477 : vector<8x128xf32>
    %c56_163 = arith.constant 56 : index
    %c128_164 = arith.constant 128 : index
    %479 = vector.load %arg11[%c56_163, %c128_164] : memref<64x256xf32, #tpu.memory_space<vmem>>, vector<8x128xf32>
    %480 = vector.extract_strided_slice %475 {offsets = [0, 128], sizes = [8, 128], strides = [1, 1]} : vector<8x256xf32> to vector<8x128xf32>
    %481 = arith.addf %479, %480 : vector<8x128xf32>
    %482 = vector.extract_strided_slice %478 {offsets = [0, 0], sizes = [8, 96], strides = [1, 1]} : vector<8x128xf32> to vector<8x96xf32>
    %483 = arith.negf %482 : vector<8x96xf32>
    %484 = math.exp %483 : vector<8x96xf32>
    %cst_165 = arith.constant 1.000000e+00 : f32
    %485 = vector.broadcast %cst_165 : f32 to vector<8x96xf32>
    %486 = arith.addf %485, %484 : vector<8x96xf32>
    %487 = arith.divf %485, %486 : vector<8x96xf32>
    %488 = vector.extract_strided_slice %487 {offsets = [0, 0], sizes = [8, 32], strides = [1, 1]} : vector<8x96xf32> to vector<8x32xf32>
    %489 = vector.extract_strided_slice %487 {offsets = [0, 32], sizes = [8, 32], strides = [1, 1]} : vector<8x96xf32> to vector<8x32xf32>
    %490 = vector.extract_strided_slice %487 {offsets = [0, 64], sizes = [8, 32], strides = [1, 1]} : vector<8x96xf32> to vector<8x32xf32>
    %491 = vector.extract_strided_slice %478 {offsets = [0, 96], sizes = [8, 32], strides = [1, 1]} : vector<8x128xf32> to vector<8x32xf32>
    %492 = math.tanh %491 : vector<8x32xf32>
    %493 = arith.mulf %489, %466 : vector<8x32xf32>
    %494 = arith.mulf %488, %492 : vector<8x32xf32>
    %495 = arith.addf %493, %494 : vector<8x32xf32>
    %496 = math.tanh %495 : vector<8x32xf32>
    %497 = arith.mulf %490, %496 : vector<8x32xf32>
    %498 = vector.extract_strided_slice %481 {offsets = [0, 0], sizes = [8, 96], strides = [1, 1]} : vector<8x128xf32> to vector<8x96xf32>
    %499 = arith.negf %498 : vector<8x96xf32>
    %500 = math.exp %499 : vector<8x96xf32>
    %cst_166 = arith.constant 1.000000e+00 : f32
    %501 = vector.broadcast %cst_166 : f32 to vector<8x96xf32>
    %502 = arith.addf %501, %500 : vector<8x96xf32>
    %503 = arith.divf %501, %502 : vector<8x96xf32>
    %504 = vector.extract_strided_slice %503 {offsets = [0, 0], sizes = [8, 32], strides = [1, 1]} : vector<8x96xf32> to vector<8x32xf32>
    %505 = vector.extract_strided_slice %503 {offsets = [0, 32], sizes = [8, 32], strides = [1, 1]} : vector<8x96xf32> to vector<8x32xf32>
    %506 = vector.extract_strided_slice %503 {offsets = [0, 64], sizes = [8, 32], strides = [1, 1]} : vector<8x96xf32> to vector<8x32xf32>
    %507 = vector.extract_strided_slice %481 {offsets = [0, 96], sizes = [8, 32], strides = [1, 1]} : vector<8x128xf32> to vector<8x32xf32>
    %508 = math.tanh %507 : vector<8x32xf32>
    %509 = arith.mulf %505, %468 : vector<8x32xf32>
    %510 = arith.mulf %504, %508 : vector<8x32xf32>
    %511 = arith.addf %509, %510 : vector<8x32xf32>
    %512 = math.tanh %511 : vector<8x32xf32>
    %513 = arith.mulf %506, %512 : vector<8x32xf32>
    %cst_167 = arith.constant 0.000000e+00 : f32
    %514 = vector.broadcast %cst_167 : f32 to vector<8x32xf32>
    %515 = arith.select %3, %497, %514 : vector<8x32xi1>, vector<8x32xf32>
    %cst_168 = arith.constant 0.000000e+00 : f32
    %516 = vector.broadcast %cst_168 : f32 to vector<8x32xf32>
    %517 = arith.select %31, %513, %516 : vector<8x32xi1>, vector<8x32xf32>
    %518 = arith.select %3, %497, %465 : vector<8x32xi1>, vector<8x32xf32>
    %519 = arith.select %3, %495, %466 : vector<8x32xi1>, vector<8x32xf32>
    %520 = arith.select %31, %513, %467 : vector<8x32xi1>, vector<8x32xf32>
    %521 = arith.select %31, %511, %468 : vector<8x32xi1>, vector<8x32xf32>
    %522 = arith.addf %469, %515 : vector<8x32xf32>
    %523 = arith.addf %470, %517 : vector<8x32xf32>
    %524 = arith.maximumf %471, %515 : vector<8x32xf32>
    %525 = arith.maximumf %472, %517 : vector<8x32xf32>
    %526 = tpu.concatenate %518, %520 in 1 : vector<8x32xf32>, vector<8x32xf32> -> vector<8x64xf32>
    %527 = arith.truncf %526 : vector<8x64xf32> to vector<8x64xbf16>
    %cst_169 = arith.constant dense<0.000000e+00> : vector<8x256xf32>
    %528 = tpu.matmul %527, %464, %cst_169 {dimension_numbers = #tpu.dot_dimension_numbers<[1], [0], [0], [1], [0, 0, 1, 1], [], []>} : vector<8x64xbf16>, vector<64x256xbf16>, vector<8x256xf32> -> vector<8x256xf32>
    %c8_170 = arith.constant 8 : index
    %c0_171 = arith.constant 0 : index
    %529 = vector.load %arg11[%c8_170, %c0_171] : memref<64x256xf32, #tpu.memory_space<vmem>>, vector<8x128xf32>
    %530 = vector.extract_strided_slice %528 {offsets = [0, 0], sizes = [8, 128], strides = [1, 1]} : vector<8x256xf32> to vector<8x128xf32>
    %531 = arith.addf %529, %530 : vector<8x128xf32>
    %c48_172 = arith.constant 48 : index
    %c128_173 = arith.constant 128 : index
    %532 = vector.load %arg11[%c48_172, %c128_173] : memref<64x256xf32, #tpu.memory_space<vmem>>, vector<8x128xf32>
    %533 = vector.extract_strided_slice %528 {offsets = [0, 128], sizes = [8, 128], strides = [1, 1]} : vector<8x256xf32> to vector<8x128xf32>
    %534 = arith.addf %532, %533 : vector<8x128xf32>
    %535 = vector.extract_strided_slice %531 {offsets = [0, 0], sizes = [8, 96], strides = [1, 1]} : vector<8x128xf32> to vector<8x96xf32>
    %536 = arith.negf %535 : vector<8x96xf32>
    %537 = math.exp %536 : vector<8x96xf32>
    %cst_174 = arith.constant 1.000000e+00 : f32
    %538 = vector.broadcast %cst_174 : f32 to vector<8x96xf32>
    %539 = arith.addf %538, %537 : vector<8x96xf32>
    %540 = arith.divf %538, %539 : vector<8x96xf32>
    %541 = vector.extract_strided_slice %540 {offsets = [0, 0], sizes = [8, 32], strides = [1, 1]} : vector<8x96xf32> to vector<8x32xf32>
    %542 = vector.extract_strided_slice %540 {offsets = [0, 32], sizes = [8, 32], strides = [1, 1]} : vector<8x96xf32> to vector<8x32xf32>
    %543 = vector.extract_strided_slice %540 {offsets = [0, 64], sizes = [8, 32], strides = [1, 1]} : vector<8x96xf32> to vector<8x32xf32>
    %544 = vector.extract_strided_slice %531 {offsets = [0, 96], sizes = [8, 32], strides = [1, 1]} : vector<8x128xf32> to vector<8x32xf32>
    %545 = math.tanh %544 : vector<8x32xf32>
    %546 = arith.mulf %542, %519 : vector<8x32xf32>
    %547 = arith.mulf %541, %545 : vector<8x32xf32>
    %548 = arith.addf %546, %547 : vector<8x32xf32>
    %549 = math.tanh %548 : vector<8x32xf32>
    %550 = arith.mulf %543, %549 : vector<8x32xf32>
    %551 = vector.extract_strided_slice %534 {offsets = [0, 0], sizes = [8, 96], strides = [1, 1]} : vector<8x128xf32> to vector<8x96xf32>
    %552 = arith.negf %551 : vector<8x96xf32>
    %553 = math.exp %552 : vector<8x96xf32>
    %cst_175 = arith.constant 1.000000e+00 : f32
    %554 = vector.broadcast %cst_175 : f32 to vector<8x96xf32>
    %555 = arith.addf %554, %553 : vector<8x96xf32>
    %556 = arith.divf %554, %555 : vector<8x96xf32>
    %557 = vector.extract_strided_slice %556 {offsets = [0, 0], sizes = [8, 32], strides = [1, 1]} : vector<8x96xf32> to vector<8x32xf32>
    %558 = vector.extract_strided_slice %556 {offsets = [0, 32], sizes = [8, 32], strides = [1, 1]} : vector<8x96xf32> to vector<8x32xf32>
    %559 = vector.extract_strided_slice %556 {offsets = [0, 64], sizes = [8, 32], strides = [1, 1]} : vector<8x96xf32> to vector<8x32xf32>
    %560 = vector.extract_strided_slice %534 {offsets = [0, 96], sizes = [8, 32], strides = [1, 1]} : vector<8x128xf32> to vector<8x32xf32>
    %561 = math.tanh %560 : vector<8x32xf32>
    %562 = arith.mulf %558, %521 : vector<8x32xf32>
    %563 = arith.mulf %557, %561 : vector<8x32xf32>
    %564 = arith.addf %562, %563 : vector<8x32xf32>
    %565 = math.tanh %564 : vector<8x32xf32>
    %566 = arith.mulf %559, %565 : vector<8x32xf32>
    %cst_176 = arith.constant 0.000000e+00 : f32
    %567 = vector.broadcast %cst_176 : f32 to vector<8x32xf32>
    %568 = arith.select %7, %550, %567 : vector<8x32xi1>, vector<8x32xf32>
    %cst_177 = arith.constant 0.000000e+00 : f32
    %569 = vector.broadcast %cst_177 : f32 to vector<8x32xf32>
    %570 = arith.select %27, %566, %569 : vector<8x32xi1>, vector<8x32xf32>
    %571 = arith.select %7, %550, %518 : vector<8x32xi1>, vector<8x32xf32>
    %572 = arith.select %7, %548, %519 : vector<8x32xi1>, vector<8x32xf32>
    %573 = arith.select %27, %566, %520 : vector<8x32xi1>, vector<8x32xf32>
    %574 = arith.select %27, %564, %521 : vector<8x32xi1>, vector<8x32xf32>
    %575 = arith.addf %522, %568 : vector<8x32xf32>
    %576 = arith.addf %523, %570 : vector<8x32xf32>
    %577 = arith.maximumf %524, %568 : vector<8x32xf32>
    %578 = arith.maximumf %525, %570 : vector<8x32xf32>
    %579 = tpu.concatenate %571, %573 in 1 : vector<8x32xf32>, vector<8x32xf32> -> vector<8x64xf32>
    %580 = arith.truncf %579 : vector<8x64xf32> to vector<8x64xbf16>
    %cst_178 = arith.constant dense<0.000000e+00> : vector<8x256xf32>
    %581 = tpu.matmul %580, %464, %cst_178 {dimension_numbers = #tpu.dot_dimension_numbers<[1], [0], [0], [1], [0, 0, 1, 1], [], []>} : vector<8x64xbf16>, vector<64x256xbf16>, vector<8x256xf32> -> vector<8x256xf32>
    %c16_179 = arith.constant 16 : index
    %c0_180 = arith.constant 0 : index
    %582 = vector.load %arg11[%c16_179, %c0_180] : memref<64x256xf32, #tpu.memory_space<vmem>>, vector<8x128xf32>
    %583 = vector.extract_strided_slice %581 {offsets = [0, 0], sizes = [8, 128], strides = [1, 1]} : vector<8x256xf32> to vector<8x128xf32>
    %584 = arith.addf %582, %583 : vector<8x128xf32>
    %c40_181 = arith.constant 40 : index
    %c128_182 = arith.constant 128 : index
    %585 = vector.load %arg11[%c40_181, %c128_182] : memref<64x256xf32, #tpu.memory_space<vmem>>, vector<8x128xf32>
    %586 = vector.extract_strided_slice %581 {offsets = [0, 128], sizes = [8, 128], strides = [1, 1]} : vector<8x256xf32> to vector<8x128xf32>
    %587 = arith.addf %585, %586 : vector<8x128xf32>
    %588 = vector.extract_strided_slice %584 {offsets = [0, 0], sizes = [8, 96], strides = [1, 1]} : vector<8x128xf32> to vector<8x96xf32>
    %589 = arith.negf %588 : vector<8x96xf32>
    %590 = math.exp %589 : vector<8x96xf32>
    %cst_183 = arith.constant 1.000000e+00 : f32
    %591 = vector.broadcast %cst_183 : f32 to vector<8x96xf32>
    %592 = arith.addf %591, %590 : vector<8x96xf32>
    %593 = arith.divf %591, %592 : vector<8x96xf32>
    %594 = vector.extract_strided_slice %593 {offsets = [0, 0], sizes = [8, 32], strides = [1, 1]} : vector<8x96xf32> to vector<8x32xf32>
    %595 = vector.extract_strided_slice %593 {offsets = [0, 32], sizes = [8, 32], strides = [1, 1]} : vector<8x96xf32> to vector<8x32xf32>
    %596 = vector.extract_strided_slice %593 {offsets = [0, 64], sizes = [8, 32], strides = [1, 1]} : vector<8x96xf32> to vector<8x32xf32>
    %597 = vector.extract_strided_slice %584 {offsets = [0, 96], sizes = [8, 32], strides = [1, 1]} : vector<8x128xf32> to vector<8x32xf32>
    %598 = math.tanh %597 : vector<8x32xf32>
    %599 = arith.mulf %595, %572 : vector<8x32xf32>
    %600 = arith.mulf %594, %598 : vector<8x32xf32>
    %601 = arith.addf %599, %600 : vector<8x32xf32>
    %602 = math.tanh %601 : vector<8x32xf32>
    %603 = arith.mulf %596, %602 : vector<8x32xf32>
    %604 = vector.extract_strided_slice %587 {offsets = [0, 0], sizes = [8, 96], strides = [1, 1]} : vector<8x128xf32> to vector<8x96xf32>
    %605 = arith.negf %604 : vector<8x96xf32>
    %606 = math.exp %605 : vector<8x96xf32>
    %cst_184 = arith.constant 1.000000e+00 : f32
    %607 = vector.broadcast %cst_184 : f32 to vector<8x96xf32>
    %608 = arith.addf %607, %606 : vector<8x96xf32>
    %609 = arith.divf %607, %608 : vector<8x96xf32>
    %610 = vector.extract_strided_slice %609 {offsets = [0, 0], sizes = [8, 32], strides = [1, 1]} : vector<8x96xf32> to vector<8x32xf32>
    %611 = vector.extract_strided_slice %609 {offsets = [0, 32], sizes = [8, 32], strides = [1, 1]} : vector<8x96xf32> to vector<8x32xf32>
    %612 = vector.extract_strided_slice %609 {offsets = [0, 64], sizes = [8, 32], strides = [1, 1]} : vector<8x96xf32> to vector<8x32xf32>
    %613 = vector.extract_strided_slice %587 {offsets = [0, 96], sizes = [8, 32], strides = [1, 1]} : vector<8x128xf32> to vector<8x32xf32>
    %614 = math.tanh %613 : vector<8x32xf32>
    %615 = arith.mulf %611, %574 : vector<8x32xf32>
    %616 = arith.mulf %610, %614 : vector<8x32xf32>
    %617 = arith.addf %615, %616 : vector<8x32xf32>
    %618 = math.tanh %617 : vector<8x32xf32>
    %619 = arith.mulf %612, %618 : vector<8x32xf32>
    %cst_185 = arith.constant 0.000000e+00 : f32
    %620 = vector.broadcast %cst_185 : f32 to vector<8x32xf32>
    %621 = arith.select %11, %603, %620 : vector<8x32xi1>, vector<8x32xf32>
    %cst_186 = arith.constant 0.000000e+00 : f32
    %622 = vector.broadcast %cst_186 : f32 to vector<8x32xf32>
    %623 = arith.select %23, %619, %622 : vector<8x32xi1>, vector<8x32xf32>
    %624 = arith.select %11, %603, %571 : vector<8x32xi1>, vector<8x32xf32>
    %625 = arith.select %11, %601, %572 : vector<8x32xi1>, vector<8x32xf32>
    %626 = arith.select %23, %619, %573 : vector<8x32xi1>, vector<8x32xf32>
    %627 = arith.select %23, %617, %574 : vector<8x32xi1>, vector<8x32xf32>
    %628 = arith.addf %575, %621 : vector<8x32xf32>
    %629 = arith.addf %576, %623 : vector<8x32xf32>
    %630 = arith.maximumf %577, %621 : vector<8x32xf32>
    %631 = arith.maximumf %578, %623 : vector<8x32xf32>
    %632 = tpu.concatenate %624, %626 in 1 : vector<8x32xf32>, vector<8x32xf32> -> vector<8x64xf32>
    %633 = arith.truncf %632 : vector<8x64xf32> to vector<8x64xbf16>
    %cst_187 = arith.constant dense<0.000000e+00> : vector<8x256xf32>
    %634 = tpu.matmul %633, %464, %cst_187 {dimension_numbers = #tpu.dot_dimension_numbers<[1], [0], [0], [1], [0, 0, 1, 1], [], []>} : vector<8x64xbf16>, vector<64x256xbf16>, vector<8x256xf32> -> vector<8x256xf32>
    %c24_188 = arith.constant 24 : index
    %c0_189 = arith.constant 0 : index
    %635 = vector.load %arg11[%c24_188, %c0_189] : memref<64x256xf32, #tpu.memory_space<vmem>>, vector<8x128xf32>
    %636 = vector.extract_strided_slice %634 {offsets = [0, 0], sizes = [8, 128], strides = [1, 1]} : vector<8x256xf32> to vector<8x128xf32>
    %637 = arith.addf %635, %636 : vector<8x128xf32>
    %c32_190 = arith.constant 32 : index
    %c128_191 = arith.constant 128 : index
    %638 = vector.load %arg11[%c32_190, %c128_191] : memref<64x256xf32, #tpu.memory_space<vmem>>, vector<8x128xf32>
    %639 = vector.extract_strided_slice %634 {offsets = [0, 128], sizes = [8, 128], strides = [1, 1]} : vector<8x256xf32> to vector<8x128xf32>
    %640 = arith.addf %638, %639 : vector<8x128xf32>
    %641 = vector.extract_strided_slice %637 {offsets = [0, 0], sizes = [8, 96], strides = [1, 1]} : vector<8x128xf32> to vector<8x96xf32>
    %642 = arith.negf %641 : vector<8x96xf32>
    %643 = math.exp %642 : vector<8x96xf32>
    %cst_192 = arith.constant 1.000000e+00 : f32
    %644 = vector.broadcast %cst_192 : f32 to vector<8x96xf32>
    %645 = arith.addf %644, %643 : vector<8x96xf32>
    %646 = arith.divf %644, %645 : vector<8x96xf32>
    %647 = vector.extract_strided_slice %646 {offsets = [0, 0], sizes = [8, 32], strides = [1, 1]} : vector<8x96xf32> to vector<8x32xf32>
    %648 = vector.extract_strided_slice %646 {offsets = [0, 32], sizes = [8, 32], strides = [1, 1]} : vector<8x96xf32> to vector<8x32xf32>
    %649 = vector.extract_strided_slice %646 {offsets = [0, 64], sizes = [8, 32], strides = [1, 1]} : vector<8x96xf32> to vector<8x32xf32>
    %650 = vector.extract_strided_slice %637 {offsets = [0, 96], sizes = [8, 32], strides = [1, 1]} : vector<8x128xf32> to vector<8x32xf32>
    %651 = math.tanh %650 : vector<8x32xf32>
    %652 = arith.mulf %648, %625 : vector<8x32xf32>
    %653 = arith.mulf %647, %651 : vector<8x32xf32>
    %654 = arith.addf %652, %653 : vector<8x32xf32>
    %655 = math.tanh %654 : vector<8x32xf32>
    %656 = arith.mulf %649, %655 : vector<8x32xf32>
    %657 = vector.extract_strided_slice %640 {offsets = [0, 0], sizes = [8, 96], strides = [1, 1]} : vector<8x128xf32> to vector<8x96xf32>
    %658 = arith.negf %657 : vector<8x96xf32>
    %659 = math.exp %658 : vector<8x96xf32>
    %cst_193 = arith.constant 1.000000e+00 : f32
    %660 = vector.broadcast %cst_193 : f32 to vector<8x96xf32>
    %661 = arith.addf %660, %659 : vector<8x96xf32>
    %662 = arith.divf %660, %661 : vector<8x96xf32>
    %663 = vector.extract_strided_slice %662 {offsets = [0, 0], sizes = [8, 32], strides = [1, 1]} : vector<8x96xf32> to vector<8x32xf32>
    %664 = vector.extract_strided_slice %662 {offsets = [0, 32], sizes = [8, 32], strides = [1, 1]} : vector<8x96xf32> to vector<8x32xf32>
    %665 = vector.extract_strided_slice %662 {offsets = [0, 64], sizes = [8, 32], strides = [1, 1]} : vector<8x96xf32> to vector<8x32xf32>
    %666 = vector.extract_strided_slice %640 {offsets = [0, 96], sizes = [8, 32], strides = [1, 1]} : vector<8x128xf32> to vector<8x32xf32>
    %667 = math.tanh %666 : vector<8x32xf32>
    %668 = arith.mulf %664, %627 : vector<8x32xf32>
    %669 = arith.mulf %663, %667 : vector<8x32xf32>
    %670 = arith.addf %668, %669 : vector<8x32xf32>
    %671 = math.tanh %670 : vector<8x32xf32>
    %672 = arith.mulf %665, %671 : vector<8x32xf32>
    %cst_194 = arith.constant 0.000000e+00 : f32
    %673 = vector.broadcast %cst_194 : f32 to vector<8x32xf32>
    %674 = arith.select %15, %656, %673 : vector<8x32xi1>, vector<8x32xf32>
    %cst_195 = arith.constant 0.000000e+00 : f32
    %675 = vector.broadcast %cst_195 : f32 to vector<8x32xf32>
    %676 = arith.select %19, %672, %675 : vector<8x32xi1>, vector<8x32xf32>
    %677 = arith.select %15, %656, %624 : vector<8x32xi1>, vector<8x32xf32>
    %678 = arith.select %15, %654, %625 : vector<8x32xi1>, vector<8x32xf32>
    %679 = arith.select %19, %672, %626 : vector<8x32xi1>, vector<8x32xf32>
    %680 = arith.select %19, %670, %627 : vector<8x32xi1>, vector<8x32xf32>
    %681 = arith.addf %628, %674 : vector<8x32xf32>
    %682 = arith.addf %629, %676 : vector<8x32xf32>
    %683 = arith.maximumf %630, %674 : vector<8x32xf32>
    %684 = arith.maximumf %631, %676 : vector<8x32xf32>
    %685 = tpu.concatenate %677, %679 in 1 : vector<8x32xf32>, vector<8x32xf32> -> vector<8x64xf32>
    %686 = arith.truncf %685 : vector<8x64xf32> to vector<8x64xbf16>
    %cst_196 = arith.constant dense<0.000000e+00> : vector<8x256xf32>
    %687 = tpu.matmul %686, %464, %cst_196 {dimension_numbers = #tpu.dot_dimension_numbers<[1], [0], [0], [1], [0, 0, 1, 1], [], []>} : vector<8x64xbf16>, vector<64x256xbf16>, vector<8x256xf32> -> vector<8x256xf32>
    %c32_197 = arith.constant 32 : index
    %c0_198 = arith.constant 0 : index
    %688 = vector.load %arg11[%c32_197, %c0_198] : memref<64x256xf32, #tpu.memory_space<vmem>>, vector<8x128xf32>
    %689 = vector.extract_strided_slice %687 {offsets = [0, 0], sizes = [8, 128], strides = [1, 1]} : vector<8x256xf32> to vector<8x128xf32>
    %690 = arith.addf %688, %689 : vector<8x128xf32>
    %c24_199 = arith.constant 24 : index
    %c128_200 = arith.constant 128 : index
    %691 = vector.load %arg11[%c24_199, %c128_200] : memref<64x256xf32, #tpu.memory_space<vmem>>, vector<8x128xf32>
    %692 = vector.extract_strided_slice %687 {offsets = [0, 128], sizes = [8, 128], strides = [1, 1]} : vector<8x256xf32> to vector<8x128xf32>
    %693 = arith.addf %691, %692 : vector<8x128xf32>
    %694 = vector.extract_strided_slice %690 {offsets = [0, 0], sizes = [8, 96], strides = [1, 1]} : vector<8x128xf32> to vector<8x96xf32>
    %695 = arith.negf %694 : vector<8x96xf32>
    %696 = math.exp %695 : vector<8x96xf32>
    %cst_201 = arith.constant 1.000000e+00 : f32
    %697 = vector.broadcast %cst_201 : f32 to vector<8x96xf32>
    %698 = arith.addf %697, %696 : vector<8x96xf32>
    %699 = arith.divf %697, %698 : vector<8x96xf32>
    %700 = vector.extract_strided_slice %699 {offsets = [0, 0], sizes = [8, 32], strides = [1, 1]} : vector<8x96xf32> to vector<8x32xf32>
    %701 = vector.extract_strided_slice %699 {offsets = [0, 32], sizes = [8, 32], strides = [1, 1]} : vector<8x96xf32> to vector<8x32xf32>
    %702 = vector.extract_strided_slice %699 {offsets = [0, 64], sizes = [8, 32], strides = [1, 1]} : vector<8x96xf32> to vector<8x32xf32>
    %703 = vector.extract_strided_slice %690 {offsets = [0, 96], sizes = [8, 32], strides = [1, 1]} : vector<8x128xf32> to vector<8x32xf32>
    %704 = math.tanh %703 : vector<8x32xf32>
    %705 = arith.mulf %701, %678 : vector<8x32xf32>
    %706 = arith.mulf %700, %704 : vector<8x32xf32>
    %707 = arith.addf %705, %706 : vector<8x32xf32>
    %708 = math.tanh %707 : vector<8x32xf32>
    %709 = arith.mulf %702, %708 : vector<8x32xf32>
    %710 = vector.extract_strided_slice %693 {offsets = [0, 0], sizes = [8, 96], strides = [1, 1]} : vector<8x128xf32> to vector<8x96xf32>
    %711 = arith.negf %710 : vector<8x96xf32>
    %712 = math.exp %711 : vector<8x96xf32>
    %cst_202 = arith.constant 1.000000e+00 : f32
    %713 = vector.broadcast %cst_202 : f32 to vector<8x96xf32>
    %714 = arith.addf %713, %712 : vector<8x96xf32>
    %715 = arith.divf %713, %714 : vector<8x96xf32>
    %716 = vector.extract_strided_slice %715 {offsets = [0, 0], sizes = [8, 32], strides = [1, 1]} : vector<8x96xf32> to vector<8x32xf32>
    %717 = vector.extract_strided_slice %715 {offsets = [0, 32], sizes = [8, 32], strides = [1, 1]} : vector<8x96xf32> to vector<8x32xf32>
    %718 = vector.extract_strided_slice %715 {offsets = [0, 64], sizes = [8, 32], strides = [1, 1]} : vector<8x96xf32> to vector<8x32xf32>
    %719 = vector.extract_strided_slice %693 {offsets = [0, 96], sizes = [8, 32], strides = [1, 1]} : vector<8x128xf32> to vector<8x32xf32>
    %720 = math.tanh %719 : vector<8x32xf32>
    %721 = arith.mulf %717, %680 : vector<8x32xf32>
    %722 = arith.mulf %716, %720 : vector<8x32xf32>
    %723 = arith.addf %721, %722 : vector<8x32xf32>
    %724 = math.tanh %723 : vector<8x32xf32>
    %725 = arith.mulf %718, %724 : vector<8x32xf32>
    %cst_203 = arith.constant 0.000000e+00 : f32
    %726 = vector.broadcast %cst_203 : f32 to vector<8x32xf32>
    %727 = arith.select %19, %709, %726 : vector<8x32xi1>, vector<8x32xf32>
    %cst_204 = arith.constant 0.000000e+00 : f32
    %728 = vector.broadcast %cst_204 : f32 to vector<8x32xf32>
    %729 = arith.select %15, %725, %728 : vector<8x32xi1>, vector<8x32xf32>
    %730 = arith.select %19, %709, %677 : vector<8x32xi1>, vector<8x32xf32>
    %731 = arith.select %19, %707, %678 : vector<8x32xi1>, vector<8x32xf32>
    %732 = arith.select %15, %725, %679 : vector<8x32xi1>, vector<8x32xf32>
    %733 = arith.select %15, %723, %680 : vector<8x32xi1>, vector<8x32xf32>
    %734 = arith.addf %681, %727 : vector<8x32xf32>
    %735 = arith.addf %682, %729 : vector<8x32xf32>
    %736 = arith.maximumf %683, %727 : vector<8x32xf32>
    %737 = arith.maximumf %684, %729 : vector<8x32xf32>
    %738 = tpu.concatenate %730, %732 in 1 : vector<8x32xf32>, vector<8x32xf32> -> vector<8x64xf32>
    %739 = arith.truncf %738 : vector<8x64xf32> to vector<8x64xbf16>
    %cst_205 = arith.constant dense<0.000000e+00> : vector<8x256xf32>
    %740 = tpu.matmul %739, %464, %cst_205 {dimension_numbers = #tpu.dot_dimension_numbers<[1], [0], [0], [1], [0, 0, 1, 1], [], []>} : vector<8x64xbf16>, vector<64x256xbf16>, vector<8x256xf32> -> vector<8x256xf32>
    %c40_206 = arith.constant 40 : index
    %c0_207 = arith.constant 0 : index
    %741 = vector.load %arg11[%c40_206, %c0_207] : memref<64x256xf32, #tpu.memory_space<vmem>>, vector<8x128xf32>
    %742 = vector.extract_strided_slice %740 {offsets = [0, 0], sizes = [8, 128], strides = [1, 1]} : vector<8x256xf32> to vector<8x128xf32>
    %743 = arith.addf %741, %742 : vector<8x128xf32>
    %c16_208 = arith.constant 16 : index
    %c128_209 = arith.constant 128 : index
    %744 = vector.load %arg11[%c16_208, %c128_209] : memref<64x256xf32, #tpu.memory_space<vmem>>, vector<8x128xf32>
    %745 = vector.extract_strided_slice %740 {offsets = [0, 128], sizes = [8, 128], strides = [1, 1]} : vector<8x256xf32> to vector<8x128xf32>
    %746 = arith.addf %744, %745 : vector<8x128xf32>
    %747 = vector.extract_strided_slice %743 {offsets = [0, 0], sizes = [8, 96], strides = [1, 1]} : vector<8x128xf32> to vector<8x96xf32>
    %748 = arith.negf %747 : vector<8x96xf32>
    %749 = math.exp %748 : vector<8x96xf32>
    %cst_210 = arith.constant 1.000000e+00 : f32
    %750 = vector.broadcast %cst_210 : f32 to vector<8x96xf32>
    %751 = arith.addf %750, %749 : vector<8x96xf32>
    %752 = arith.divf %750, %751 : vector<8x96xf32>
    %753 = vector.extract_strided_slice %752 {offsets = [0, 0], sizes = [8, 32], strides = [1, 1]} : vector<8x96xf32> to vector<8x32xf32>
    %754 = vector.extract_strided_slice %752 {offsets = [0, 32], sizes = [8, 32], strides = [1, 1]} : vector<8x96xf32> to vector<8x32xf32>
    %755 = vector.extract_strided_slice %752 {offsets = [0, 64], sizes = [8, 32], strides = [1, 1]} : vector<8x96xf32> to vector<8x32xf32>
    %756 = vector.extract_strided_slice %743 {offsets = [0, 96], sizes = [8, 32], strides = [1, 1]} : vector<8x128xf32> to vector<8x32xf32>
    %757 = math.tanh %756 : vector<8x32xf32>
    %758 = arith.mulf %754, %731 : vector<8x32xf32>
    %759 = arith.mulf %753, %757 : vector<8x32xf32>
    %760 = arith.addf %758, %759 : vector<8x32xf32>
    %761 = math.tanh %760 : vector<8x32xf32>
    %762 = arith.mulf %755, %761 : vector<8x32xf32>
    %763 = vector.extract_strided_slice %746 {offsets = [0, 0], sizes = [8, 96], strides = [1, 1]} : vector<8x128xf32> to vector<8x96xf32>
    %764 = arith.negf %763 : vector<8x96xf32>
    %765 = math.exp %764 : vector<8x96xf32>
    %cst_211 = arith.constant 1.000000e+00 : f32
    %766 = vector.broadcast %cst_211 : f32 to vector<8x96xf32>
    %767 = arith.addf %766, %765 : vector<8x96xf32>
    %768 = arith.divf %766, %767 : vector<8x96xf32>
    %769 = vector.extract_strided_slice %768 {offsets = [0, 0], sizes = [8, 32], strides = [1, 1]} : vector<8x96xf32> to vector<8x32xf32>
    %770 = vector.extract_strided_slice %768 {offsets = [0, 32], sizes = [8, 32], strides = [1, 1]} : vector<8x96xf32> to vector<8x32xf32>
    %771 = vector.extract_strided_slice %768 {offsets = [0, 64], sizes = [8, 32], strides = [1, 1]} : vector<8x96xf32> to vector<8x32xf32>
    %772 = vector.extract_strided_slice %746 {offsets = [0, 96], sizes = [8, 32], strides = [1, 1]} : vector<8x128xf32> to vector<8x32xf32>
    %773 = math.tanh %772 : vector<8x32xf32>
    %774 = arith.mulf %770, %733 : vector<8x32xf32>
    %775 = arith.mulf %769, %773 : vector<8x32xf32>
    %776 = arith.addf %774, %775 : vector<8x32xf32>
    %777 = math.tanh %776 : vector<8x32xf32>
    %778 = arith.mulf %771, %777 : vector<8x32xf32>
    %cst_212 = arith.constant 0.000000e+00 : f32
    %779 = vector.broadcast %cst_212 : f32 to vector<8x32xf32>
    %780 = arith.select %23, %762, %779 : vector<8x32xi1>, vector<8x32xf32>
    %cst_213 = arith.constant 0.000000e+00 : f32
    %781 = vector.broadcast %cst_213 : f32 to vector<8x32xf32>
    %782 = arith.select %11, %778, %781 : vector<8x32xi1>, vector<8x32xf32>
    %783 = arith.select %23, %762, %730 : vector<8x32xi1>, vector<8x32xf32>
    %784 = arith.select %23, %760, %731 : vector<8x32xi1>, vector<8x32xf32>
    %785 = arith.select %11, %778, %732 : vector<8x32xi1>, vector<8x32xf32>
    %786 = arith.select %11, %776, %733 : vector<8x32xi1>, vector<8x32xf32>
    %787 = arith.addf %734, %780 : vector<8x32xf32>
    %788 = arith.addf %735, %782 : vector<8x32xf32>
    %789 = arith.maximumf %736, %780 : vector<8x32xf32>
    %790 = arith.maximumf %737, %782 : vector<8x32xf32>
    %791 = tpu.concatenate %783, %785 in 1 : vector<8x32xf32>, vector<8x32xf32> -> vector<8x64xf32>
    %792 = arith.truncf %791 : vector<8x64xf32> to vector<8x64xbf16>
    %cst_214 = arith.constant dense<0.000000e+00> : vector<8x256xf32>
    %793 = tpu.matmul %792, %464, %cst_214 {dimension_numbers = #tpu.dot_dimension_numbers<[1], [0], [0], [1], [0, 0, 1, 1], [], []>} : vector<8x64xbf16>, vector<64x256xbf16>, vector<8x256xf32> -> vector<8x256xf32>
    %c48_215 = arith.constant 48 : index
    %c0_216 = arith.constant 0 : index
    %794 = vector.load %arg11[%c48_215, %c0_216] : memref<64x256xf32, #tpu.memory_space<vmem>>, vector<8x128xf32>
    %795 = vector.extract_strided_slice %793 {offsets = [0, 0], sizes = [8, 128], strides = [1, 1]} : vector<8x256xf32> to vector<8x128xf32>
    %796 = arith.addf %794, %795 : vector<8x128xf32>
    %c8_217 = arith.constant 8 : index
    %c128_218 = arith.constant 128 : index
    %797 = vector.load %arg11[%c8_217, %c128_218] : memref<64x256xf32, #tpu.memory_space<vmem>>, vector<8x128xf32>
    %798 = vector.extract_strided_slice %793 {offsets = [0, 128], sizes = [8, 128], strides = [1, 1]} : vector<8x256xf32> to vector<8x128xf32>
    %799 = arith.addf %797, %798 : vector<8x128xf32>
    %800 = vector.extract_strided_slice %796 {offsets = [0, 0], sizes = [8, 96], strides = [1, 1]} : vector<8x128xf32> to vector<8x96xf32>
    %801 = arith.negf %800 : vector<8x96xf32>
    %802 = math.exp %801 : vector<8x96xf32>
    %cst_219 = arith.constant 1.000000e+00 : f32
    %803 = vector.broadcast %cst_219 : f32 to vector<8x96xf32>
    %804 = arith.addf %803, %802 : vector<8x96xf32>
    %805 = arith.divf %803, %804 : vector<8x96xf32>
    %806 = vector.extract_strided_slice %805 {offsets = [0, 0], sizes = [8, 32], strides = [1, 1]} : vector<8x96xf32> to vector<8x32xf32>
    %807 = vector.extract_strided_slice %805 {offsets = [0, 32], sizes = [8, 32], strides = [1, 1]} : vector<8x96xf32> to vector<8x32xf32>
    %808 = vector.extract_strided_slice %805 {offsets = [0, 64], sizes = [8, 32], strides = [1, 1]} : vector<8x96xf32> to vector<8x32xf32>
    %809 = vector.extract_strided_slice %796 {offsets = [0, 96], sizes = [8, 32], strides = [1, 1]} : vector<8x128xf32> to vector<8x32xf32>
    %810 = math.tanh %809 : vector<8x32xf32>
    %811 = arith.mulf %807, %784 : vector<8x32xf32>
    %812 = arith.mulf %806, %810 : vector<8x32xf32>
    %813 = arith.addf %811, %812 : vector<8x32xf32>
    %814 = math.tanh %813 : vector<8x32xf32>
    %815 = arith.mulf %808, %814 : vector<8x32xf32>
    %816 = vector.extract_strided_slice %799 {offsets = [0, 0], sizes = [8, 96], strides = [1, 1]} : vector<8x128xf32> to vector<8x96xf32>
    %817 = arith.negf %816 : vector<8x96xf32>
    %818 = math.exp %817 : vector<8x96xf32>
    %cst_220 = arith.constant 1.000000e+00 : f32
    %819 = vector.broadcast %cst_220 : f32 to vector<8x96xf32>
    %820 = arith.addf %819, %818 : vector<8x96xf32>
    %821 = arith.divf %819, %820 : vector<8x96xf32>
    %822 = vector.extract_strided_slice %821 {offsets = [0, 0], sizes = [8, 32], strides = [1, 1]} : vector<8x96xf32> to vector<8x32xf32>
    %823 = vector.extract_strided_slice %821 {offsets = [0, 32], sizes = [8, 32], strides = [1, 1]} : vector<8x96xf32> to vector<8x32xf32>
    %824 = vector.extract_strided_slice %821 {offsets = [0, 64], sizes = [8, 32], strides = [1, 1]} : vector<8x96xf32> to vector<8x32xf32>
    %825 = vector.extract_strided_slice %799 {offsets = [0, 96], sizes = [8, 32], strides = [1, 1]} : vector<8x128xf32> to vector<8x32xf32>
    %826 = math.tanh %825 : vector<8x32xf32>
    %827 = arith.mulf %823, %786 : vector<8x32xf32>
    %828 = arith.mulf %822, %826 : vector<8x32xf32>
    %829 = arith.addf %827, %828 : vector<8x32xf32>
    %830 = math.tanh %829 : vector<8x32xf32>
    %831 = arith.mulf %824, %830 : vector<8x32xf32>
    %cst_221 = arith.constant 0.000000e+00 : f32
    %832 = vector.broadcast %cst_221 : f32 to vector<8x32xf32>
    %833 = arith.select %27, %815, %832 : vector<8x32xi1>, vector<8x32xf32>
    %cst_222 = arith.constant 0.000000e+00 : f32
    %834 = vector.broadcast %cst_222 : f32 to vector<8x32xf32>
    %835 = arith.select %7, %831, %834 : vector<8x32xi1>, vector<8x32xf32>
    %836 = arith.select %27, %815, %783 : vector<8x32xi1>, vector<8x32xf32>
    %837 = arith.select %27, %813, %784 : vector<8x32xi1>, vector<8x32xf32>
    %838 = arith.select %7, %831, %785 : vector<8x32xi1>, vector<8x32xf32>
    %839 = arith.select %7, %829, %786 : vector<8x32xi1>, vector<8x32xf32>
    %840 = arith.addf %787, %833 : vector<8x32xf32>
    %841 = arith.addf %788, %835 : vector<8x32xf32>
    %842 = arith.maximumf %789, %833 : vector<8x32xf32>
    %843 = arith.maximumf %790, %835 : vector<8x32xf32>
    %844 = tpu.concatenate %836, %838 in 1 : vector<8x32xf32>, vector<8x32xf32> -> vector<8x64xf32>
    %845 = arith.truncf %844 : vector<8x64xf32> to vector<8x64xbf16>
    %cst_223 = arith.constant dense<0.000000e+00> : vector<8x256xf32>
    %846 = tpu.matmul %845, %464, %cst_223 {dimension_numbers = #tpu.dot_dimension_numbers<[1], [0], [0], [1], [0, 0, 1, 1], [], []>} : vector<8x64xbf16>, vector<64x256xbf16>, vector<8x256xf32> -> vector<8x256xf32>
    %c56_224 = arith.constant 56 : index
    %c0_225 = arith.constant 0 : index
    %847 = vector.load %arg11[%c56_224, %c0_225] : memref<64x256xf32, #tpu.memory_space<vmem>>, vector<8x128xf32>
    %848 = vector.extract_strided_slice %846 {offsets = [0, 0], sizes = [8, 128], strides = [1, 1]} : vector<8x256xf32> to vector<8x128xf32>
    %849 = arith.addf %847, %848 : vector<8x128xf32>
    %c0_226 = arith.constant 0 : index
    %c128_227 = arith.constant 128 : index
    %850 = vector.load %arg11[%c0_226, %c128_227] : memref<64x256xf32, #tpu.memory_space<vmem>>, vector<8x128xf32>
    %851 = vector.extract_strided_slice %846 {offsets = [0, 128], sizes = [8, 128], strides = [1, 1]} : vector<8x256xf32> to vector<8x128xf32>
    %852 = arith.addf %850, %851 : vector<8x128xf32>
    %853 = vector.extract_strided_slice %849 {offsets = [0, 0], sizes = [8, 96], strides = [1, 1]} : vector<8x128xf32> to vector<8x96xf32>
    %854 = arith.negf %853 : vector<8x96xf32>
    %855 = math.exp %854 : vector<8x96xf32>
    %cst_228 = arith.constant 1.000000e+00 : f32
    %856 = vector.broadcast %cst_228 : f32 to vector<8x96xf32>
    %857 = arith.addf %856, %855 : vector<8x96xf32>
    %858 = arith.divf %856, %857 : vector<8x96xf32>
    %859 = vector.extract_strided_slice %858 {offsets = [0, 0], sizes = [8, 32], strides = [1, 1]} : vector<8x96xf32> to vector<8x32xf32>
    %860 = vector.extract_strided_slice %858 {offsets = [0, 32], sizes = [8, 32], strides = [1, 1]} : vector<8x96xf32> to vector<8x32xf32>
    %861 = vector.extract_strided_slice %858 {offsets = [0, 64], sizes = [8, 32], strides = [1, 1]} : vector<8x96xf32> to vector<8x32xf32>
    %862 = vector.extract_strided_slice %849 {offsets = [0, 96], sizes = [8, 32], strides = [1, 1]} : vector<8x128xf32> to vector<8x32xf32>
    %863 = math.tanh %862 : vector<8x32xf32>
    %864 = arith.mulf %860, %837 : vector<8x32xf32>
    %865 = arith.mulf %859, %863 : vector<8x32xf32>
    %866 = arith.addf %864, %865 : vector<8x32xf32>
    %867 = math.tanh %866 : vector<8x32xf32>
    %868 = arith.mulf %861, %867 : vector<8x32xf32>
    %869 = vector.extract_strided_slice %852 {offsets = [0, 0], sizes = [8, 96], strides = [1, 1]} : vector<8x128xf32> to vector<8x96xf32>
    %870 = arith.negf %869 : vector<8x96xf32>
    %871 = math.exp %870 : vector<8x96xf32>
    %cst_229 = arith.constant 1.000000e+00 : f32
    %872 = vector.broadcast %cst_229 : f32 to vector<8x96xf32>
    %873 = arith.addf %872, %871 : vector<8x96xf32>
    %874 = arith.divf %872, %873 : vector<8x96xf32>
    %875 = vector.extract_strided_slice %874 {offsets = [0, 0], sizes = [8, 32], strides = [1, 1]} : vector<8x96xf32> to vector<8x32xf32>
    %876 = vector.extract_strided_slice %874 {offsets = [0, 32], sizes = [8, 32], strides = [1, 1]} : vector<8x96xf32> to vector<8x32xf32>
    %877 = vector.extract_strided_slice %874 {offsets = [0, 64], sizes = [8, 32], strides = [1, 1]} : vector<8x96xf32> to vector<8x32xf32>
    %878 = vector.extract_strided_slice %852 {offsets = [0, 96], sizes = [8, 32], strides = [1, 1]} : vector<8x128xf32> to vector<8x32xf32>
    %879 = math.tanh %878 : vector<8x32xf32>
    %880 = arith.mulf %876, %839 : vector<8x32xf32>
    %881 = arith.mulf %875, %879 : vector<8x32xf32>
    %882 = arith.addf %880, %881 : vector<8x32xf32>
    %883 = math.tanh %882 : vector<8x32xf32>
    %884 = arith.mulf %877, %883 : vector<8x32xf32>
    %cst_230 = arith.constant 0.000000e+00 : f32
    %885 = vector.broadcast %cst_230 : f32 to vector<8x32xf32>
    %886 = arith.select %31, %868, %885 : vector<8x32xi1>, vector<8x32xf32>
    %cst_231 = arith.constant 0.000000e+00 : f32
    %887 = vector.broadcast %cst_231 : f32 to vector<8x32xf32>
    %888 = arith.select %3, %884, %887 : vector<8x32xi1>, vector<8x32xf32>
    %889 = arith.select %31, %868, %836 : vector<8x32xi1>, vector<8x32xf32>
    %890 = arith.select %3, %884, %838 : vector<8x32xi1>, vector<8x32xf32>
    %891 = arith.addf %840, %886 : vector<8x32xf32>
    %892 = arith.addf %841, %888 : vector<8x32xf32>
    %893 = arith.maximumf %842, %886 : vector<8x32xf32>
    %894 = arith.maximumf %843, %888 : vector<8x32xf32>
    %895 = tpu.concatenate %889, %890 in 1 : vector<8x32xf32>, vector<8x32xf32> -> vector<8x64xf32>
    %896 = tpu.concatenate %891, %892 in 1 : vector<8x32xf32>, vector<8x32xf32> -> vector<8x64xf32>
    %cst_232 = arith.constant 1.250000e-01 : f32
    %897 = vector.broadcast %cst_232 : f32 to vector<8x64xf32>
    %898 = arith.mulf %896, %897 : vector<8x64xf32>
    %899 = tpu.concatenate %893, %894 in 1 : vector<8x32xf32>, vector<8x32xf32> -> vector<8x64xf32>
    %900 = tpu.concatenate %895, %898, %899 in 1 : vector<8x64xf32>, vector<8x64xf32>, vector<8x64xf32> -> vector<8x192xf32>
    %901 = arith.truncf %900 : vector<8x192xf32> to vector<8x192xbf16>
    %c0_233 = arith.constant 0 : index
    %c0_234 = arith.constant 0 : index
    %902 = vector.load %arg6[%c0_233, %c0_234] : memref<192x96xbf16, #tpu.memory_space<vmem>>, vector<192x96xbf16>
    %cst_235 = arith.constant dense<0.000000e+00> : vector<8x96xf32>
    %903 = tpu.matmul %901, %902, %cst_235 {dimension_numbers = #tpu.dot_dimension_numbers<[1], [0], [0], [1], [0, 0, 1, 1], [], []>} : vector<8x192xbf16>, vector<192x96xbf16>, vector<8x96xf32> -> vector<8x96xf32>
    %c0_236 = arith.constant 0 : index
    %c0_237 = arith.constant 0 : index
    %904 = vector.load %arg7[%c0_236, %c0_237] : memref<1x96xf32, #tpu.memory_space<vmem>>, vector<1x96xf32>
    %905 = vector.broadcast %904 : vector<1x96xf32> to vector<8x96xf32>
    %906 = arith.addf %903, %905 : vector<8x96xf32>
    %cst_238 = arith.constant 0.000000e+00 : f32
    %907 = vector.broadcast %cst_238 : f32 to vector<8x96xf32>
    %908 = arith.maximumf %906, %907 : vector<8x96xf32>
    %c0_239 = arith.constant 0 : index
    %c0_240 = arith.constant 0 : index
    %909 = vector.load %arg8[%c0_239, %c0_240] : memref<1x96xf32, #tpu.memory_space<vmem>>, vector<1x96xf32>
    %910 = vector.broadcast %909 : vector<1x96xf32> to vector<8x96xf32>
    %911 = arith.mulf %908, %910 : vector<8x96xf32>
    %cst_241 = arith.constant dense<0.000000e+00> : vector<8xf32>
    %912 = vector.multi_reduction <add>, %911, %cst_241 [1] : vector<8x96xf32> to vector<8xf32>
    %913 = vector.shape_cast %912 : vector<8xf32> to vector<8x1xf32>
    %c0_242 = arith.constant 0 : index
    %c0_243 = arith.constant 0 : index
    %914 = vector.load %arg9[%c0_242, %c0_243] : memref<1x1xf32, #tpu.memory_space<vmem>>, vector<1x1xf32>
    %915 = vector.broadcast %914 : vector<1x1xf32> to vector<8x1xf32>
    %916 = arith.addf %913, %915 : vector<8x1xf32>
    %c0_244 = arith.constant 0 : index
    %c0_245 = arith.constant 0 : index
    %917 = vector.load %arg10[%c0_244, %c0_245] : memref<8x1xf32, #tpu.memory_space<vmem>>, vector<8x1xf32>
    tpu.vector_store %arg10[%c0_244, %c0_245], %916 {strides = array<i32>} : memref<8x1xf32, #tpu.memory_space<vmem>>, vector<8x1xf32>,
    return
  }
}

</mosaic_0001>

<bundles_post_ra>
// kernel: tpu_custom_call.1
= control target key start
LH: loop header
LB: loop body
LE: loop exit
PB: predicated region body
PF: predicated region fallthrough
CT: control target
= control target key end

     0   :  { %s4681_s0 = inlined_call_operand.vmem [shape: f32[64,32], index: 0, kind: input, shape index: {}]   ;;  %s4682_s1 = inlined_call_operand.hbm [shape: f32[8,8,32], index: 1, kind: input, shape index: {}]   ;;  %s4683_s2 = inlined_call_operand.hbm [shape: bf16[32,256], index: 2, kind: input, shape index: {}]   ;;  %s4684_s3 = inlined_call_operand.hbm [shape: bf16[1,64,256], index: 3, kind: input, shape index: {}]   ;;  %s4685_s4 = inlined_call_operand.hbm [shape: bf16[2,64,256], index: 4, kind: input, shape index: {}]   ;;  %s4686_s5 = inlined_call_operand.vmem [shape: f32[2,1,256], index: 5, kind: input, shape index: {}]   ;;  %s4687_s6 = inlined_call_operand.vmem [shape: bf16[192,96], index: 6, kind: input, shape index: {}]   ;;  %s4688_s7 = inlined_call_operand.vmem [shape: f32[1,96], index: 7, kind: input, shape index: {}]   ;;  %s4689_s8 = inlined_call_operand.vmem [shape: f32[1,96], index: 8, kind: input, shape index: {}]   ;;  %s4690_s9 = inlined_call_operand.<no memory space> [shape: f32[1,1], index: 9, kind: input, shape index: {}]   ;;  %s4691_s10 = inlined_call_operand.vmem [shape: f32[8,1], index: 10, kind: output, shape index: {}]  }
   0x1   :  { %v15_v0 = vstv %s4690_s9 }
   0x2   :  { %16 = vst [vmem:[#allocation5] sm:$0x1] %v15_v0 }
   0x3   :  { %17 = vsyncpa [#allocation7], 0 }
   0x4   :  { %18 = vsyncpa [#allocation9], 0 }
   0x5   :  { %19 = vsyncpa [#allocation12], 0  ;;  %s3436_s15 = smov [#allocation8]   ;;  %s3437_s17 = smov [#allocation6]  }
   0x6   :  { %s39_s16 = sshll.u32 %s3436_s15, 4  ;;  %s27_s18 = sshll.u32 %s3437_s17, 4  ;;  %s40_s16 = int_to_ptr.vmem [resolvable:$true] %s39_s16  ;;  %s3505_s18 = int_to_ptr.vmem [resolvable:$true] %s27_s18 }
   0x7   :  { %s3342_s21 = scalar_lea.hbm %s4683_s2, 512 }
   0x8   :  { %p3343_p0 = scmp.ne.s32.totalorder %s4683_s2, %s3342_s21  ;;  %p3346_p1 = scmp.lt.u32.totalorder %s3342_s21, %s4683_s2 }
   0xa   :  { %p3348_p2 = pnand %p3346_p1, %p3343_p0 }
   0xc   :  { %3351 = shalt.err (!%p3348_p2)
}
   0xd   :  { %s3352_s25 = scalar_lea.vmem %s40_s16, 512  ;;  %p3357_p4 = scmp.lt.s32.totalorder %s40_s16, %s40_s16 }
   0xe   :  { %p3353_p3 = scmp.ne.s32.totalorder %s40_s16, %s3352_s25  ;;  %p3358_p5 = scmp.lt.s32.totalorder %s3352_s25, %s3352_s25 }
  0x10   :  { %p3359_p6 = por %p3358_p5, %p3357_p4 }
  0x12   :  { %p3360_p7 = pnand %p3359_p6, %p3353_p3 }
  0x14   :  { %3363 = shalt.err (!%p3360_p7)
}
  0x15   :  { %s3438_s26 = smov 128   ;;  %s3439_s27 = smov 8  }
  0x16   :  { %45 = dma.hbm_to_vmem [thread:$0]  %s4683_s2, 512, %s40_s16, [#allocation9], %s3438_s26, %s3438_s26, %s3439_s27  }
  0x17   :  { %s3364_s12 = scalar_lea.hbm %s4682_s1, 1024 }
  0x18   :  { %p3365_p8 = scmp.ne.s32.totalorder %s4682_s1, %s3364_s12  ;;  %p3368_p9 = scmp.lt.u32.totalorder %s3364_s12, %s4682_s1 }
  0x1a   :  { %p3370_p10 = pnand %p3368_p9, %p3365_p8 }
  0x1c   :  { %3373 = shalt.err (!%p3370_p10)
}
  0x1d   :  { %s3374_s19 = scalar_lea.vmem %s3505_s18, 1024  ;;  %p3379_p12 = scmp.lt.s32.totalorder %s3505_s18, %s3505_s18 }
  0x1e   :  { %p3375_p11 = scmp.ne.s32.totalorder %s3505_s18, %s3374_s19  ;;  %p3380_p13 = scmp.lt.s32.totalorder %s3374_s19, %s3374_s19 }
  0x20   :  { %p3381_p0 = por %p3380_p13, %p3379_p12 }
  0x22   :  { %p3382_p1 = pnand %p3381_p0, %p3375_p11 }
  0x24   :  { %3385 = shalt.err (!%p3382_p1)
}
  0x25   :  { %33 = dma.hbm_to_vmem [thread:$0]  %s4682_s1, 1024, %s3505_s18, [#allocation7], %s3438_s26, %s3438_s26, %s3439_s27  }
  0x26   :  { %s3440_s20 = smov [#allocation10]   ;;  %s3441_s22 = smov [#allocation11]  }
  0x27   :  { %s51_s21 = sshll.u32 %s3440_s20, 4  ;;  %s63_s23 = sshll.u32 %s3441_s22, 4  ;;  %s52_s21 = int_to_ptr.vmem [resolvable:$true] %s51_s21  ;;  %s3542_s23 = int_to_ptr.vmem [resolvable:$true] %s63_s23 }
  0x28   :  { %s3386_s25 = scalar_lea.hbm %s4684_s3, 1024 }
  0x29   :  { %p3387_p2 = scmp.ne.s32.totalorder %s4684_s3, %s3386_s25  ;;  %p3390_p3 = scmp.lt.u32.totalorder %s3386_s25, %s4684_s3 }
  0x2b   :  { %p3392_p4 = pnand %p3390_p3, %p3387_p2 }
  0x2d   :  { %3395 = shalt.err (!%p3392_p4)
}
  0x2e   :  { %s3396_s1 = scalar_lea.vmem %s52_s21, 1024  ;;  %p3401_p6 = scmp.lt.s32.totalorder %s52_s21, %s52_s21 }
  0x2f   :  { %p3397_p5 = scmp.ne.s32.totalorder %s52_s21, %s3396_s1  ;;  %p3402_p7 = scmp.lt.s32.totalorder %s3396_s1, %s3396_s1 }
  0x31   :  { %p3403_p8 = por %p3402_p7, %p3401_p6 }
  0x33   :  { %p3404_p9 = pnand %p3403_p8, %p3397_p5 }
  0x35   :  { %3407 = shalt.err (!%p3404_p9)
}
  0x36   :  { %57 = dma.hbm_to_vmem [thread:$0]  %s4684_s3, 1024, %s52_s21, [#allocation9], %s3438_s26, %s3438_s26, %s3439_s27  }
  0x37   :  { %s3408_s15 = scalar_lea.hbm %s4685_s4, 2048 }
  0x38   :  { %p3409_p10 = scmp.ne.s32.totalorder %s4685_s4, %s3408_s15  ;;  %p3412_p11 = scmp.lt.u32.totalorder %s3408_s15, %s4685_s4 }
  0x3a   :  { %p3414_p12 = pnand %p3412_p11, %p3409_p10 }
  0x3c   :  { %3417 = shalt.err (!%p3414_p12)
}
  0x3d   :  { %s3418_s20 = scalar_lea.vmem %s3542_s23, 2048  ;;  %p3423_p0 = scmp.lt.s32.totalorder %s3542_s23, %s3542_s23 }
  0x3e   :  { %p3419_p13 = scmp.ne.s32.totalorder %s3542_s23, %s3418_s20  ;;  %p3424_p1 = scmp.lt.s32.totalorder %s3418_s20, %s3418_s20 }
  0x40   :  { %p3425_p2 = por %p3424_p1, %p3423_p0 }
  0x42   :  { %p3426_p3 = pnand %p3425_p2, %p3419_p13 }
  0x44   :  { %3429 = shalt.err (!%p3426_p3)
}
  0x45   :  { %69 = dma.hbm_to_vmem [thread:$0]  %s4685_s4, 2048, %s3542_s23, [#allocation12], %s3438_s26, %s3438_s26, %s3439_s27  }
  0x46   :  { %3430 = dma.done.wait [#allocation7], 1024  }
  0x47   :  { %3431 = vsyncadd [#allocation7], 4294966272 }
  0x48   :  { %3432 = dma.done.wait [#allocation9], 1536  }
  0x49   :  { %3433 = vsyncadd [#allocation9], 4294965760 }
  0x4a   :  { %3434 = dma.done.wait [#allocation12], 2048  }
  0x4b   :  { %3435 = vsyncadd [#allocation12], 4294965248  ;;  %v3442_v1 = vmov 0   ;;  %v3022_v2 = vld [vmem:[#allocation8 + $0x4] ss:$8 sps:$4 sm:$0xff]   ;;  %vm164_vm0 = vcmask 261120   ;;  %v134_v27 = vlaneseq }
  0x4c   :  { %209 = vmatprep.mubr.bf16.mxu1 %v3442_v1  ;;  %609 = vmatprep.mubr.bf16.mxu0 %v3442_v1  ;;  %v3024_v3 = vld [vmem:[#allocation8] ss:$8 sps:$4 sm:$0xff]   ;;  %v3025_v4 = vld [vmem:[#allocation8 + $0x14] ss:$8 sps:$4 sm:$0xff]   ;;  %v3027_v5 = vld [vmem:[#allocation8 + $0x10] ss:$8 sps:$4 sm:$0xff]  }
  0x4d   :  { %177 = vmatprep.subr.bf16.mxu1 %v3022_v2  ;;  %v116_v6 = vld [vmem:[%s4681_s0] sm:$0xff]  ;;  %v117_v7 = vld [vmem:[%s4681_s0 + $0x8] sm:$0xff]  ;;  %v118_v12 = vld [vmem:[%s4681_s0 + $0x10] sm:$0xff]  ;;  %v3443_v26 = vmov 0.0|0.0   ;;  %v3657_v28 = vshrl.u32 %v134_v27, 7  ;;  %s3444_s15 = smov 32  }
  0x4e   :  { %178 = vmatpush1.bf16.msra.mxu1 %v3024_v3  ;;  %v3587_v8 = vld [vmem:[#allocation11 + $0x4] ss:$8 sps:$4 sm:$0xff]   ;;  %v3589_v9 = vld [vmem:[#allocation11] ss:$8 sps:$4 sm:$0xff]   ;;  %v124_v10 = vpack.c.bf16 %v117_v7, %v116_v6  ;;  %v3591_v11 = vld [vmem:[#allocation11 + $0x14] ss:$8 sps:$4 sm:$0xff]  }
  0x4f   :  { %179 = vmatprep.subr.bf16.mxu1 %v3025_v4  ;;  %577 = vmatprep.subr.bf16.mxu0 %v3587_v8  ;;  %v119_v13 = vld [vmem:[%s4681_s0 + $0x18] sm:$0xff]  ;;  %v3606_v15 = vld [vmem:[#allocation11 + $0x24] ss:$8 sps:$4 sm:$0xff]   ;;  %v3611_v16 = vld [vmem:[#allocation11 + $0x20] ss:$8 sps:$4 sm:$0xff]   ;;  %v140_v29 = vsub.s32 1, %v3657_v28 }
  0x50   :  { %578 = vmatpush1.bf16.msra.mxu0 %v3589_v9  ;;  %v3604_v14 = vld [vmem:[#allocation11 + $0x10] ss:$8 sps:$4 sm:$0xff]   ;;  %v3614_v17 = vld [vmem:[#allocation11 + $0x34] ss:$8 sps:$4 sm:$0xff]   ;;  %v125_v18 = vpack.c.bf16 %v119_v13, %v118_v12  ;;  %v121_v21 = vld [vmem:[%s4681_s0 + $0x28] sm:$0xff]  ;;  %v136_v31 = vsub.s32 0, %v3657_v28 }
  0x51   :  { %579 = vmatprep.subr.bf16.mxu0 %v3591_v11  ;;  %v3619_v19 = vld [vmem:[#allocation11 + $0x30] ss:$8 sps:$4 sm:$0xff]   ;;  %v120_v20 = vld [vmem:[%s4681_s0 + $0x20] sm:$0xff]  ;;  %s3445_s17 = smov 64   ;;  %s3446_s19 = smov 96   ;;  %vm315_vm3 = vcmask 523264  }
  0x52   :  { %180 = vmatpush1.bf16.msra.mxu1 %v3027_v5  ;;  %v126_v22 = vpack.c.bf16 %v121_v21, %v120_v20  ;;  %v122_v23 = vld [vmem:[%s4681_s0 + $0x30] sm:$0xff]  ;;  %v123_v24 = vld [vmem:[%s4681_s0 + $0x38] sm:$0xff]  ;;  %v132_v30 = vld [vmem:[%s4686_s5] sm:$0x3]  ;;  %vm2866_vm10 = vcmask 785408   ;;  %vm2878_vm11 = vcmask 7168  }
  0x53   :  { %319 = vmatprep.subr.bf16.mxu1 %v3587_v8  ;;  %v127_v25 = vpack.c.bf16 %v123_v24, %v122_v23  ;;  %v141_v32 = vrot.slane %v132_v30, %v140_v29  ;;  %v137_v34 = vrot.slane %v132_v30, %v136_v31 }
  0x54   :  { %580 = vmatpush1.bf16.msra.mxu0 %v3604_v14 }
  0x55   :  { %2891 = vmatmul.mubr.msk.bf16.vlgmr.msra.gmra.mrb[0].mxu1 %vm164_vm0, %v124_v10  ;;  %581 = vmatprep.subr.bf16.mxu0 %v3606_v15 }
  0x56   :  { %320 = vmatpush1.bf16.msra.mxu1 %v3589_v9  ;;  %219 = vmatprep.mubr.bf16.mxu1 %v3442_v1 }
  0x57   :  { %321 = vmatprep.subr.bf16.mxu1 %v3591_v11 }
  0x58   :  { %582 = vmatpush1.bf16.msra.mxu0 %v3611_v16 }
  0x59   :  { %583 = vmatprep.subr.bf16.mxu0 %v3614_v17 }
  0x5a   :  { %322 = vmatpush1.bf16.msra.mxu1 %v3604_v14 }
  0x5b   :  { %323 = vmatprep.subr.bf16.mxu1 %v3606_v15 }
  0x5c   :  { %584 = vmatpush1.bf16.msra.mxu0 %v3619_v19 }
  0x5d   :  { %2892 = vmatmul.mubr.msk.bf16.gmra.mrb[4].mxu1 %vm164_vm0, %v125_v18  ;;  %845 = vmatprep.subr.bf16.mxu0 %v3587_v8 }
  0x5e   :  { %229 = vmatprep.mubr.bf16.mxu1 %v3442_v1  ;;  %324 = vmatpush1.bf16.msra.mxu1 %v3611_v16 }
  0x5f   :  { %325 = vmatprep.subr.bf16.mxu1 %v3614_v17 }
  0x62   :  { %326 = vmatpush1.bf16.msra.mxu1 %v3619_v19 }
  0x63   :  { %443 = vmatprep.subr.bf16.mxu1 %v3587_v8 }
  0x65   :  { %2893 = vmatmul.mubr.msk.bf16.gmra.mrb[8].mxu1 %vm164_vm0, %v126_v22 }
  0x66   :  { %239 = vmatprep.mubr.bf16.mxu1 %v3442_v1 }
  0x6d   :  { %2894 = vmatmul.mubr.msk.bf16.gmra.mrb[12].mxu1 %vm164_vm0, %v127_v25 }
  0x6e   :  { %351 = vmatprep.mubr.bf16.mxu1 %v3442_v1 }
  0x75   :  { %352 = vmatmul.mubr.bf16.vlgmr.msra.gmra.mrb[16].mxu1 %v3443_v26 }
  0x76   :  { %444 = vmatpush1.bf16.msra.mxu1 %v3589_v9  ;;  %475 = vmatprep.mubr.bf16.mxu1 %v3442_v1 }
  0x77   :  { %445 = vmatprep.subr.bf16.mxu1 %v3591_v11 }
  0x7a   :  { %446 = vmatpush1.bf16.msra.mxu1 %v3604_v14 }
  0x7b   :  { %447 = vmatprep.subr.bf16.mxu1 %v3606_v15 }
  0x7e   :  { %448 = vmatpush1.bf16.msra.mxu1 %v3611_v16 }
  0x7f   :  { %449 = vmatprep.subr.bf16.mxu1 %v3614_v17 }
  0x82   :  { %450 = vmatpush1.bf16.msra.mxu1 %v3619_v19 }
  0x83   :  { %711 = vmatprep.subr.bf16.mxu1 %v3587_v8 }
 0x128   :  { %v211_v33 = vpop.f32.mrb[0].mxu1 }
 0x129   :  { %v213_v35 = vpop.f32.mrb[1].mxu1  ;;  %v212_v0 = vadd.f32 %v211_v33, %v137_v34 }
 0x12a   :  { %v3668_v36 = vadd.f32 %v213_v35, %v141_v32  ;;  %v215_v37 = vpop.f32.mrb[2].mxu1 }
 0x12b   :  { %v3670_v38 = vadd.f32 %v215_v37, %v137_v34  ;;  %v217_v39 = vpop.f32.mrb[3].mxu1 }
 0x12c   :  { %v3672_v40 = vadd.f32 %v217_v39, %v141_v32 }
 0x130   :  { %v221_v41 = vpop.f32.mrb[4].mxu1 }
 0x131   :  { %v3674_v42 = vadd.f32 %v221_v41, %v137_v34  ;;  %v223_v43 = vpop.f32.mrb[5].mxu1 }
 0x132   :  { %v3676_v44 = vadd.f32 %v223_v43, %v141_v32  ;;  %v225_v45 = vpop.f32.mrb[6].mxu1 }
 0x133   :  { %v3678_v46 = vadd.f32 %v225_v45, %v137_v34  ;;  %v227_v47 = vpop.f32.mrb[7].mxu1 }
 0x134   :  { %v3680_v48 = vadd.f32 %v227_v47, %v141_v32 }
 0x138   :  { %v231_v49 = vpop.f32.mrb[8].mxu1 }
 0x139   :  { %v3682_v50 = vadd.f32 %v231_v49, %v137_v34  ;;  %v233_v51 = vpop.f32.mrb[9].mxu1 }
 0x13a   :  { %v3684_v52 = vadd.f32 %v233_v51, %v141_v32  ;;  %v235_v53 = vpop.f32.mrb[10].mxu1 }
 0x13b   :  { %v3686_v54 = vadd.f32 %v235_v53, %v137_v34  ;;  %v237_v55 = vpop.f32.mrb[11].mxu1 }
 0x13c   :  { %v3688_v56 = vadd.f32 %v237_v55, %v141_v32 }
 0x140   :  { %v241_v57 = vpop.f32.mrb[12].mxu1 }
 0x141   :  { %v3690_v58 = vadd.f32 %v241_v57, %v137_v34  ;;  %v243_v59 = vpop.f32.mrb[13].mxu1 }
 0x142   :  { %v3692_v60 = vadd.f32 %v243_v59, %v141_v32  ;;  %v245_v61 = vpop.f32.mrb[14].mxu1  ;;  %v3706_v59 = vld [vmem:[#allocation6 + $0x38] sm:$0xff] }
 0x143   :  { %v3694_v62 = vadd.f32 %v245_v61, %v137_v34  ;;  %v247_v63 = vpop.f32.mrb[15].mxu1  ;;  %vm115_vm1 = vcmp.gt.f32.partialorder %v3706_v59, 0.5  ;;  %v3709_v61 = vld [vmem:[#allocation6] sm:$0xff] }
 0x144   :  { %v248_v2 = vadd.f32 %v247_v63, %v141_v32  ;;  %vm94_vm2 = vcmp.gt.f32.partialorder %v3709_v61, 0.5  ;;  %v3068_v61 = vld [vmem:[%s4687_s6 + $0x20] sm:$0xff]  }
 0x148   :  { %v353_v3 = vpop.f32.mrb[16].mxu1 }
 0x149   :  { %v361_v4 = vadd.f32 %v353_v3, %v212_v0  ;;  %v355_v5 = vpop.f32.mrb[17].mxu1 }
 0x14a   :  { %v363_v6 = vadd.f32 %v355_v5, %v248_v2  ;;  %v357_v7 = vpop.f32.mrb[18].mxu1 }
 0x14b   :  { %v358_v10 = vpop.f32.mrb[19].mxu1  ;;  %v2903_v20 = vmul.f32 -1.442695, %v361_v4 }
 0x14c   :  { %3076 = vtanh.f32 %v363_v6  ;;  %v2904_v18 = vmul.f32 -1.442695, %v363_v6 }
 0x14d   :  { %3078 = vtanh.f32 %v361_v4 }
 0x14e   :  { %3080 = vpow2.f32 %v2904_v18 }
 0x14f   :  { %3082 = vpow2.f32 %v2903_v20 }
 0x156   :  { %v3077_v12 = vpop.eup %3076 }
 0x157   :  { %397 = vrot.lane.b32.xlu0 %v3077_v12, %s3444_s15  ;;  %v3079_v13 = vpop.eup %3078 }
 0x158   :  { %v3081_v21 = vpop.eup %3080 }
 0x159   :  { %v391_v22 = vadd.f32 1.0, %v3081_v21  ;;  %v3083_v23 = vpop.eup %3082 }
 0x15a   :  { %v367_v24 = vadd.f32 1.0, %v3083_v23 }
 0x15b   :  { %373 = vrot.lane.b32.xlu0 %v3079_v13, %s3444_s15  ;;  %3084 = vrcp.f32 %v391_v22 }
 0x15c   :  { %3086 = vrcp.f32 %v367_v24 }
 0x165   :  { %v3085_v25 = vpop.eup %3084 }
 0x166   :  { %v3087_v32 = vpop.eup %3086  ;;  %v395_v35 = vmul.f32 0.0, %v3085_v25 }
 0x167   :  { %v371_v41 = vmul.f32 0.0, %v3087_v32 }
 0x1c9   :  { %v398_v27 = vpop.permute.xlu0 %397 }
 0x1ca   :  { %v400_v30 = vmul.f32 %v3085_v25, %v398_v27 }
 0x1cc   :  { %402 = vrot.lane.b32.xlu1 %v400_v30, %s3444_s15 }
 0x1cd   :  { %v374_v33 = vpop.permute.xlu0 %373 }
 0x1ce   :  { %v376_v34 = vmul.f32 %v3087_v32, %v374_v33 }
 0x1d0   :  { %378 = vrot.lane.b32.xlu1 %v376_v34, %s3444_s15 }
 0x23e   :  { %v403_v37 = vpop.permute.xlu1 %402 }
 0x23f   :  { %v405_v39 = vadd.f32 %v403_v37, %v395_v35 }
 0x241   :  { %3088 = vtanh.f32 %v405_v39 }
 0x242   :  { %v379_v43 = vpop.permute.xlu1 %378 }
 0x243   :  { %v381_v45 = vadd.f32 %v379_v43, %v371_v41 }
 0x245   :  { %3090 = vtanh.f32 %v381_v45 }
 0x24b   :  { %v3089_v47 = vpop.eup %3088 }
 0x24c   :  { %408 = vrot.lane.b32.xlu0 %v3089_v47, %s3444_s15 }
 0x24f   :  { %v3091_v49 = vpop.eup %3090 }
 0x250   :  { %384 = vrot.lane.b32.xlu1 %v3091_v49, %s3444_s15 }
 0x2be   :  { %v409_v51 = vpop.permute.xlu0 %408 }
 0x2bf   :  { %v411_v53 = vmul.f32 %v3085_v25, %v409_v51 }
 0x2c1   :  { %418 = vrot.lane.b32.xlu0 %v411_v53, %s3445_s17 }
 0x2c2   :  { %v385_v55 = vpop.permute.xlu1 %384 }
 0x2c3   :  { %v387_v57 = vmul.f32 %v3087_v32, %v385_v55 }
 0x2c5   :  { %413 = vrot.lane.b32.xlu1 %v387_v57, %s3445_s17 }
 0x2c9   :  { %428 = vrot.lane.b32.xlu1 %v405_v39, %s3446_s19 }
 0x2cd   :  { %423 = vrot.lane.b32.xlu1 %v381_v45, %s3446_s19 }
 0x333   :  { %v419_v63 = vpop.permute.xlu0 %418 }
 0x334   :  { %v3713_v0 = vsel %vm115_vm1, %v419_v63, 0.0 }
 0x335   :  { %435 = vrot.lane.b32.xlu0 %v3713_v0, %s3444_s15  ;;  %433 = vst.msk [vmem:[#allocation4 + $0x38] sm:$0xff] %vm164_vm0, %v3713_v0 }
 0x337   :  { %v414_v2 = vpop.permute.xlu1 %413 }
 0x338   :  { %v3722_v3 = vsel %vm94_vm2, %v414_v2, 0.0 }
 0x339   :  { %432 = vst.msk [vmem:[#allocation3] sm:$0xff] %vm164_vm0, %v3722_v3 }
 0x33b   :  { %v429_v4 = vpop.permute.xlu1 %428 }
 0x33c   :  { %v3728_v5 = vsel %vm115_vm1, %v429_v4, 0.0 }
 0x33d   :  { %524 = vrot.lane.b32.xlu1 %v3728_v5, %s3444_s15 }
 0x33f   :  { %v424_v6 = vpop.permute.xlu1 %423 }
 0x340   :  { %v3734_v7 = vsel %vm94_vm2, %v424_v6, 0.0 }
 0x341   :  { %496 = vrot.lane.b32.xlu1 %v3734_v7, %s3444_s15 }
 0x3a7   :  { %v436_v10 = vpop.permute.xlu0 %435 }
 0x3a8   :  { %v438_v12 = vsel %vm164_vm0, %v3722_v3, %v436_v10 }
 0x3a9   :  { %v439_v13 = vpack.c.bf16 %v438_v12, %v438_v12 }
 0x3ab   :  { %2905 = vmatmul.mubr.msk.bf16.vlgmr.msra.gmra.mrb[20].mxu1 %vm315_vm3, %v439_v13 }
 0x3ac   :  { %712 = vmatpush1.bf16.msra.mxu1 %v3589_v9  ;;  %743 = vmatprep.mubr.bf16.mxu1 %v3442_v1 }
 0x3ad   :  { %713 = vmatprep.subr.bf16.mxu1 %v3591_v11 }
 0x3af   :  { %v525_v47 = vpop.permute.xlu1 %524 }
 0x3b0   :  { %714 = vmatpush1.bf16.msra.mxu1 %v3604_v14 }
 0x3b1   :  { %715 = vmatprep.subr.bf16.mxu1 %v3606_v15 }
 0x3b3   :  { %v497_v55 = vpop.permute.xlu1 %496 }
 0x3b4   :  { %716 = vmatpush1.bf16.msra.mxu1 %v3611_v16 }
 0x3b5   :  { %717 = vmatprep.subr.bf16.mxu1 %v3614_v17 }
 0x3b8   :  { %718 = vmatpush1.bf16.msra.mxu1 %v3619_v19 }
 0x3b9   :  { %979 = vmatprep.subr.bf16.mxu1 %v3587_v8 }
 0x47e   :  { %v477_v18 = vpop.f32.mrb[20].mxu1 }
 0x47f   :  { %v485_v20 = vadd.f32 %v477_v18, %v3670_v38  ;;  %v479_v21 = vpop.f32.mrb[21].mxu1 }
 0x480   :  { %v487_v22 = vadd.f32 %v479_v21, %v3692_v60  ;;  %v481_v23 = vpop.f32.mrb[22].mxu1  ;;  %v3765_v21 = vld [vmem:[#allocation6 + $0x8] sm:$0xff] }
 0x481   :  { %v482_v24 = vpop.f32.mrb[23].mxu1  ;;  %v2906_v32 = vmul.f32 -1.442695, %v485_v20  ;;  %vm97_vm5 = vcmp.gt.f32.partialorder %v3765_v21, 0.5 }
 0x482   :  { %3092 = vtanh.f32 %v487_v22  ;;  %v2907_v30 = vmul.f32 -1.442695, %v487_v22 }
 0x483   :  { %3094 = vtanh.f32 %v485_v20  ;;  %v3762_v20 = vld [vmem:[#allocation6 + $0x30] sm:$0xff] }
 0x484   :  { %3096 = vpow2.f32 %v2907_v30  ;;  %vm112_vm4 = vcmp.gt.f32.partialorder %v3762_v20, 0.5 }
 0x485   :  { %3098 = vpow2.f32 %v2906_v32 }
 0x48c   :  { %v3093_v25 = vpop.eup %3092 }
 0x48d   :  { %529 = vrot.lane.b32.xlu0 %v3093_v25, %s3444_s15  ;;  %v3095_v27 = vpop.eup %3094 }
 0x48e   :  { %v3097_v33 = vpop.eup %3096 }
 0x48f   :  { %v519_v34 = vadd.f32 1.0, %v3097_v33  ;;  %v3099_v38 = vpop.eup %3098 }
 0x490   :  { %v491_v35 = vadd.f32 1.0, %v3099_v38 }
 0x491   :  { %501 = vrot.lane.b32.xlu0 %v3095_v27, %s3444_s15  ;;  %3100 = vrcp.f32 %v519_v34 }
 0x492   :  { %3102 = vrcp.f32 %v491_v35 }
 0x49b   :  { %v3101_v60 = vpop.eup %3100 }
 0x49c   :  { %v3103_v41 = vpop.eup %3102  ;;  %v527_v49 = vmul.f32 %v3101_v60, %v525_v47 }
 0x49d   :  { %v499_v57 = vmul.f32 %v3103_v41, %v497_v55 }
 0x4ff   :  { %v530_v37 = vpop.permute.xlu0 %529 }
 0x500   :  { %v532_v39 = vmul.f32 %v3101_v60, %v530_v37 }
 0x502   :  { %534 = vrot.lane.b32.xlu0 %v532_v39, %s3444_s15 }
 0x503   :  { %v502_v43 = vpop.permute.xlu0 %501 }
 0x504   :  { %v504_v45 = vmul.f32 %v3103_v41, %v502_v43 }
 0x506   :  { %506 = vrot.lane.b32.xlu0 %v504_v45, %s3444_s15 }
 0x574   :  { %v535_v51 = vpop.permute.xlu0 %534 }
 0x575   :  { %v537_v53 = vadd.f32 %v535_v51, %v527_v49 }
 0x577   :  { %3104 = vtanh.f32 %v537_v53 }
 0x578   :  { %v507_v63 = vpop.permute.xlu0 %506 }
 0x579   :  { %v509_v2 = vadd.f32 %v507_v63, %v499_v57 }
 0x57b   :  { %3106 = vtanh.f32 %v509_v2 }
 0x581   :  { %v3105_v4 = vpop.eup %3104 }
 0x582   :  { %540 = vrot.lane.b32.xlu1 %v3105_v4, %s3444_s15 }
 0x585   :  { %v3107_v6 = vpop.eup %3106 }
 0x586   :  { %512 = vrot.lane.b32.xlu0 %v3107_v6, %s3444_s15 }
 0x5f4   :  { %v541_v10 = vpop.permute.xlu1 %540 }
 0x5f5   :  { %v543_v12 = vmul.f32 %v3101_v60, %v541_v10 }
 0x5f7   :  { %550 = vrot.lane.b32.xlu1 %v543_v12, %s3445_s17 }
 0x5f8   :  { %v513_v13 = vpop.permute.xlu0 %512 }
 0x5f9   :  { %v515_v18 = vmul.f32 %v3103_v41, %v513_v13 }
 0x5fb   :  { %545 = vrot.lane.b32.xlu0 %v515_v18, %s3445_s17 }
 0x5ff   :  { %562 = vrot.lane.b32.xlu0 %v537_v53, %s3446_s19 }
 0x603   :  { %556 = vrot.lane.b32.xlu0 %v509_v2, %s3446_s19 }
 0x669   :  { %v551_v22 = vpop.permute.xlu1 %550 }
 0x66a   :  { %v553_v23 = vsel %vm112_vm4, %v551_v22, 0.0  ;;  %v3772_v24 = vsel %vm112_vm4, %v551_v22, %v3713_v0 }
 0x66b   :  { %567 = vst.msk [vmem:[#allocation4 + $0x30] sm:$0xff] %vm164_vm0, %v553_v23  ;;  %569 = vrot.lane.b32.xlu1 %v3772_v24, %s3444_s15 }
 0x66d   :  { %v546_v25 = vpop.permute.xlu0 %545 }
 0x66e   :  { %v548_v27 = vsel %vm97_vm5, %v546_v25, 0.0  ;;  %v3798_v34 = vsel %vm97_vm5, %v546_v25, %v3722_v3 }
 0x66f   :  { %566 = vst.msk [vmem:[#allocation3 + $0x8] sm:$0xff] %vm164_vm0, %v548_v27 }
 0x671   :  { %v563_v30 = vpop.permute.xlu0 %562 }
 0x672   :  { %v3784_v32 = vsel %vm112_vm4, %v563_v30, %v3728_v5 }
 0x673   :  { %658 = vrot.lane.b32.xlu0 %v3784_v32, %s3444_s15 }
 0x675   :  { %v557_v0 = vpop.permute.xlu0 %556 }
 0x676   :  { %v3791_v33 = vsel %vm97_vm5, %v557_v0, %v3734_v7 }
 0x677   :  { %630 = vrot.lane.b32.xlu0 %v3791_v33, %s3444_s15 }
 0x6dd   :  { %v570_v38 = vpop.permute.xlu1 %569 }
 0x6de   :  { %v572_v5 = vsel %vm164_vm0, %v3798_v34, %v570_v38 }
 0x6df   :  { %v573_v35 = vpack.c.bf16 %v572_v5, %v572_v5 }
 0x6e1   :  { %2908 = vmatmul.mubr.msk.bf16.vlgmr.msra.gmra.mrb[0].mxu0 %vm315_vm3, %v573_v35 }
 0x6e2   :  { %846 = vmatpush1.bf16.msra.mxu0 %v3589_v9  ;;  %877 = vmatprep.mubr.bf16.mxu0 %v3442_v1 }
 0x6e3   :  { %847 = vmatprep.subr.bf16.mxu0 %v3591_v11 }
 0x6e5   :  { %v659_v10 = vpop.permute.xlu0 %658 }
 0x6e6   :  { %848 = vmatpush1.bf16.msra.mxu0 %v3604_v14 }
 0x6e7   :  { %849 = vmatprep.subr.bf16.mxu0 %v3606_v15 }
 0x6e9   :  { %v631_v22 = vpop.permute.xlu0 %630 }
 0x6ea   :  { %850 = vmatpush1.bf16.msra.mxu0 %v3611_v16 }
 0x6eb   :  { %851 = vmatprep.subr.bf16.mxu0 %v3614_v17 }
 0x6ee   :  { %852 = vmatpush1.bf16.msra.mxu0 %v3619_v19 }
 0x6ef   :  { %1113 = vmatprep.subr.bf16.mxu0 %v3587_v8 }
 0x7b4   :  { %v611_v3 = vpop.f32.mrb[0].mxu0 }
 0x7b5   :  { %v619_v7 = vadd.f32 %v611_v3, %v3674_v42  ;;  %v613_v60 = vpop.f32.mrb[1].mxu0 }
 0x7b6   :  { %v621_v37 = vadd.f32 %v613_v60, %v3688_v56  ;;  %v615_v39 = vpop.f32.mrb[2].mxu0  ;;  %v3827_v60 = vld [vmem:[#allocation6 + $0x10] sm:$0xff] }
 0x7b7   :  { %v616_v41 = vpop.f32.mrb[3].mxu0  ;;  %v2909_v49 = vmul.f32 -1.442695, %v619_v7  ;;  %vm100_vm7 = vcmp.gt.f32.partialorder %v3827_v60, 0.5  ;;  %v3065_v60 = vld [vmem:[%s4687_s6 + $0x8] sm:$0xff]  }
 0x7b8   :  { %3108 = vtanh.f32 %v621_v37  ;;  %v2910_v47 = vmul.f32 -1.442695, %v621_v37 }
 0x7b9   :  { %3110 = vtanh.f32 %v619_v7  ;;  %v3824_v7 = vld [vmem:[#allocation6 + $0x28] sm:$0xff] }
 0x7ba   :  { %3112 = vpow2.f32 %v2910_v47  ;;  %vm109_vm6 = vcmp.gt.f32.partialorder %v3824_v7, 0.5 }
 0x7bb   :  { %3114 = vpow2.f32 %v2909_v49 }
 0x7c2   :  { %v3109_v43 = vpop.eup %3108 }
 0x7c3   :  { %663 = vrot.lane.b32.xlu1 %v3109_v43, %s3444_s15  ;;  %v3111_v45 = vpop.eup %3110 }
 0x7c4   :  { %v3113_v51 = vpop.eup %3112 }
 0x7c5   :  { %v653_v53 = vadd.f32 1.0, %v3113_v51  ;;  %v3115_v42 = vpop.eup %3114 }
 0x7c6   :  { %v625_v55 = vadd.f32 1.0, %v3115_v42 }
 0x7c7   :  { %635 = vrot.lane.b32.xlu1 %v3111_v45, %s3444_s15  ;;  %3116 = vrcp.f32 %v653_v53 }
 0x7c8   :  { %3118 = vrcp.f32 %v625_v55 }
 0x7d1   :  { %v3117_v56 = vpop.eup %3116 }
 0x7d2   :  { %v3119_v2 = vpop.eup %3118  ;;  %v661_v12 = vmul.f32 %v3117_v56, %v659_v10 }
 0x7d3   :  { %v633_v23 = vmul.f32 %v3119_v2, %v631_v22 }
 0x835   :  { %v664_v57 = vpop.permute.xlu1 %663 }
 0x836   :  { %v666_v63 = vmul.f32 %v3117_v56, %v664_v57 }
 0x838   :  { %668 = vrot.lane.b32.xlu1 %v666_v63, %s3444_s15 }
 0x839   :  { %v636_v4 = vpop.permute.xlu1 %635 }
 0x83a   :  { %v638_v6 = vmul.f32 %v3119_v2, %v636_v4 }
 0x83c   :  { %640 = vrot.lane.b32.xlu1 %v638_v6, %s3444_s15 }
 0x8aa   :  { %v669_v13 = vpop.permute.xlu1 %668 }
 0x8ab   :  { %v671_v18 = vadd.f32 %v669_v13, %v661_v12 }
 0x8ad   :  { %3120 = vtanh.f32 %v671_v18 }
 0x8ae   :  { %v641_v25 = vpop.permute.xlu1 %640 }
 0x8af   :  { %v643_v27 = vadd.f32 %v641_v25, %v633_v23 }
 0x8b1   :  { %3122 = vtanh.f32 %v643_v27 }
 0x8b7   :  { %v3121_v30 = vpop.eup %3120 }
 0x8b8   :  { %674 = vrot.lane.b32.xlu0 %v3121_v30, %s3444_s15 }
 0x8bb   :  { %v3123_v0 = vpop.eup %3122 }
 0x8bc   :  { %646 = vrot.lane.b32.xlu1 %v3123_v0, %s3444_s15 }
 0x92a   :  { %v675_v38 = vpop.permute.xlu0 %674 }
 0x92b   :  { %v677_v5 = vmul.f32 %v3117_v56, %v675_v38 }
 0x92d   :  { %684 = vrot.lane.b32.xlu0 %v677_v5, %s3445_s17 }
 0x92e   :  { %v647_v35 = vpop.permute.xlu1 %646 }
 0x92f   :  { %v649_v3 = vmul.f32 %v3119_v2, %v647_v35 }
 0x931   :  { %679 = vrot.lane.b32.xlu1 %v649_v3, %s3445_s17 }
 0x935   :  { %696 = vrot.lane.b32.xlu1 %v671_v18, %s3446_s19 }
 0x939   :  { %690 = vrot.lane.b32.xlu1 %v643_v27, %s3446_s19 }
 0x99f   :  { %v685_v37 = vpop.permute.xlu0 %684 }
 0x9a0   :  { %v687_v39 = vsel %vm109_vm6, %v685_v37, 0.0  ;;  %v3834_v41 = vsel %vm109_vm6, %v685_v37, %v3772_v24 }
 0x9a1   :  { %701 = vst.msk [vmem:[#allocation4 + $0x28] sm:$0xff] %vm164_vm0, %v687_v39  ;;  %703 = vrot.lane.b32.xlu0 %v3834_v41, %s3444_s15 }
 0x9a3   :  { %v680_v43 = vpop.permute.xlu1 %679 }
 0x9a4   :  { %v682_v45 = vsel %vm100_vm7, %v680_v43, 0.0  ;;  %v3860_v53 = vsel %vm100_vm7, %v680_v43, %v3798_v34 }
 0x9a5   :  { %700 = vst.msk [vmem:[#allocation3 + $0x10] sm:$0xff] %vm164_vm0, %v682_v45 }
 0x9a7   :  { %v697_v47 = vpop.permute.xlu1 %696 }
 0x9a8   :  { %v3846_v49 = vsel %vm109_vm6, %v697_v47, %v3784_v32 }
 0x9a9   :  { %792 = vrot.lane.b32.xlu1 %v3846_v49, %s3444_s15 }
 0x9ab   :  { %v691_v24 = vpop.permute.xlu1 %690 }
 0x9ac   :  { %v3853_v51 = vsel %vm100_vm7, %v691_v24, %v3791_v33 }
 0x9ad   :  { %764 = vrot.lane.b32.xlu1 %v3853_v51, %s3444_s15 }
 0xa13   :  { %v704_v42 = vpop.permute.xlu0 %703 }
 0xa14   :  { %v706_v32 = vsel %vm164_vm0, %v3860_v53, %v704_v42 }
 0xa15   :  { %v707_v55 = vpack.c.bf16 %v706_v32, %v706_v32 }
 0xa17   :  { %2911 = vmatmul.mubr.msk.bf16.vlgmr.msra.gmra.mrb[24].mxu1 %vm315_vm3, %v707_v55 }
 0xa18   :  { %980 = vmatpush1.bf16.msra.mxu1 %v3589_v9  ;;  %1011 = vmatprep.mubr.bf16.mxu1 %v3442_v1 }
 0xa19   :  { %981 = vmatprep.subr.bf16.mxu1 %v3591_v11 }
 0xa1b   :  { %v793_v0 = vpop.permute.xlu1 %792 }
 0xa1c   :  { %982 = vmatpush1.bf16.msra.mxu1 %v3604_v14 }
 0xa1d   :  { %983 = vmatprep.subr.bf16.mxu1 %v3606_v15 }
 0xa1f   :  { %v765_v3 = vpop.permute.xlu1 %764 }
 0xa20   :  { %984 = vmatpush1.bf16.msra.mxu1 %v3611_v16 }
 0xa21   :  { %985 = vmatprep.subr.bf16.mxu1 %v3614_v17 }
 0xa24   :  { %986 = vmatpush1.bf16.msra.mxu1 %v3619_v19 }
 0xa25   :  { %1247 = vmatprep.subr.bf16.mxu1 %v3587_v8 }
 0xaea   :  { %v745_v33 = vpop.f32.mrb[24].mxu1 }
 0xaeb   :  { %v753_v34 = vadd.f32 %v745_v33, %v3678_v46  ;;  %v747_v56 = vpop.f32.mrb[25].mxu1  ;;  %v3886_v33 = vld [vmem:[#allocation6 + $0x20] sm:$0xff] }
 0xaec   :  { %v755_v57 = vadd.f32 %v747_v56, %v3684_v52  ;;  %v749_v63 = vpop.f32.mrb[26].mxu1  ;;  %vm106_vm8 = vcmp.gt.f32.partialorder %v3886_v33, 0.5 }
 0xaed   :  { %v750_v2 = vpop.f32.mrb[27].mxu1  ;;  %v2912_v12 = vmul.f32 -1.442695, %v753_v34 }
 0xaee   :  { %3124 = vtanh.f32 %v755_v57  ;;  %v2913_v10 = vmul.f32 -1.442695, %v755_v57 }
 0xaef   :  { %3126 = vtanh.f32 %v753_v34  ;;  %v3889_v34 = vld [vmem:[#allocation6 + $0x18] sm:$0xff] }
 0xaf0   :  { %3128 = vpow2.f32 %v2913_v10  ;;  %vm103_vm9 = vcmp.gt.f32.partialorder %v3889_v34, 0.5 }
 0xaf1   :  { %3130 = vpow2.f32 %v2912_v12 }
 0xaf8   :  { %v3125_v4 = vpop.eup %3124 }
 0xaf9   :  { %797 = vrot.lane.b32.xlu0 %v3125_v4, %s3444_s15  ;;  %v3127_v6 = vpop.eup %3126 }
 0xafa   :  { %v3129_v8 = vpop.eup %3128 }
 0xafb   :  { %v787_v13 = vadd.f32 1.0, %v3129_v8  ;;  %v3131_v46 = vpop.eup %3130 }
 0xafc   :  { %v759_v18 = vadd.f32 1.0, %v3131_v46 }
 0xafd   :  { %769 = vrot.lane.b32.xlu0 %v3127_v6, %s3444_s15  ;;  %3132 = vrcp.f32 %v787_v13 }
 0xafe   :  { %3134 = vrcp.f32 %v759_v18 }
 0xb07   :  { %v3133_v52 = vpop.eup %3132 }
 0xb08   :  { %v3135_v25 = vpop.eup %3134  ;;  %v795_v38 = vmul.f32 %v3133_v52, %v793_v0 }
 0xb09   :  { %v767_v37 = vmul.f32 %v3135_v25, %v765_v3 }
 0xb6b   :  { %v798_v22 = vpop.permute.xlu0 %797 }
 0xb6c   :  { %v800_v23 = vmul.f32 %v3133_v52, %v798_v22 }
 0xb6e   :  { %802 = vrot.lane.b32.xlu0 %v800_v23, %s3444_s15 }
 0xb6f   :  { %v770_v27 = vpop.permute.xlu0 %769 }
 0xb70   :  { %v772_v30 = vmul.f32 %v3135_v25, %v770_v27 }
 0xb72   :  { %774 = vrot.lane.b32.xlu0 %v772_v30, %s3444_s15 }
 0xbe0   :  { %v803_v5 = vpop.permute.xlu0 %802 }
 0xbe1   :  { %v805_v35 = vadd.f32 %v803_v5, %v795_v38 }
 0xbe3   :  { %3136 = vtanh.f32 %v805_v35 }
 0xbe4   :  { %v775_v39 = vpop.permute.xlu0 %774 }
 0xbe5   :  { %v777_v43 = vadd.f32 %v775_v39, %v767_v37 }
 0xbe7   :  { %3138 = vtanh.f32 %v777_v43 }
 0xbed   :  { %v3137_v45 = vpop.eup %3136 }
 0xbee   :  { %808 = vrot.lane.b32.xlu1 %v3137_v45, %s3444_s15 }
 0xbf1   :  { %v3139_v47 = vpop.eup %3138 }
 0xbf2   :  { %780 = vrot.lane.b32.xlu0 %v3139_v47, %s3444_s15 }
 0xc60   :  { %v809_v24 = vpop.permute.xlu1 %808 }
 0xc61   :  { %v811_v42 = vmul.f32 %v3133_v52, %v809_v24 }
 0xc63   :  { %818 = vrot.lane.b32.xlu1 %v811_v42, %s3445_s17 }
 0xc64   :  { %v781_v32 = vpop.permute.xlu0 %780 }
 0xc65   :  { %v783_v55 = vmul.f32 %v3135_v25, %v781_v32 }
 0xc67   :  { %813 = vrot.lane.b32.xlu0 %v783_v55, %s3445_s17 }
 0xc6b   :  { %830 = vrot.lane.b32.xlu0 %v805_v35, %s3446_s19 }
 0xc6f   :  { %824 = vrot.lane.b32.xlu0 %v777_v43, %s3446_s19 }
 0xcd5   :  { %v819_v56 = vpop.permute.xlu1 %818 }
 0xcd6   :  { %v821_v57 = vsel %vm106_vm8, %v819_v56, 0.0  ;;  %v3896_v63 = vsel %vm106_vm8, %v819_v56, %v3834_v41 }
 0xcd7   :  { %835 = vst.msk [vmem:[#allocation4 + $0x20] sm:$0xff] %vm164_vm0, %v821_v57  ;;  %837 = vrot.lane.b32.xlu1 %v3896_v63, %s3444_s15 }
 0xcd9   :  { %v814_v2 = vpop.permute.xlu0 %813 }
 0xcda   :  { %v816_v4 = vsel %vm103_vm9, %v814_v2, 0.0  ;;  %v3922_v8 = vsel %vm103_vm9, %v814_v2, %v3860_v53 }
 0xcdb   :  { %834 = vst.msk [vmem:[#allocation3 + $0x18] sm:$0xff] %vm164_vm0, %v816_v4 }
 0xcdd   :  { %v831_v6 = vpop.permute.xlu0 %830 }
 0xcde   :  { %v3908_v10 = vsel %vm106_vm8, %v831_v6, %v3846_v49 }
 0xcdf   :  { %926 = vrot.lane.b32.xlu0 %v3908_v10, %s3444_s15 }
 0xce1   :  { %v825_v41 = vpop.permute.xlu0 %824 }
 0xce2   :  { %v3915_v12 = vsel %vm103_vm9, %v825_v41, %v3853_v51 }
 0xce3   :  { %898 = vrot.lane.b32.xlu0 %v3915_v12, %s3444_s15 }
 0xd49   :  { %v838_v13 = vpop.permute.xlu1 %837 }
 0xd4a   :  { %v840_v49 = vsel %vm164_vm0, %v3922_v8, %v838_v13 }
 0xd4b   :  { %v841_v46 = vpack.c.bf16 %v840_v49, %v840_v49 }
 0xd4d   :  { %2914 = vmatmul.mubr.msk.bf16.vlgmr.msra.gmra.mrb[4].mxu0 %vm315_vm3, %v841_v46 }
 0xd4e   :  { %1114 = vmatpush1.bf16.msra.mxu0 %v3589_v9  ;;  %1145 = vmatprep.mubr.bf16.mxu0 %v3442_v1 }
 0xd4f   :  { %1115 = vmatprep.subr.bf16.mxu0 %v3591_v11 }
 0xd51   :  { %v927_v35 = vpop.permute.xlu0 %926 }
 0xd52   :  { %1116 = vmatpush1.bf16.msra.mxu0 %v3604_v14 }
 0xd53   :  { %1117 = vmatprep.subr.bf16.mxu0 %v3606_v15 }
 0xd55   :  { %v899_v43 = vpop.permute.xlu0 %898 }
 0xd56   :  { %1118 = vmatpush1.bf16.msra.mxu0 %v3611_v16 }
 0xd57   :  { %1119 = vmatprep.subr.bf16.mxu0 %v3614_v17 }
 0xd5a   :  { %1120 = vmatpush1.bf16.msra.mxu0 %v3619_v19 }
 0xe20   :  { %v879_v51 = vpop.f32.mrb[4].mxu0 }
 0xe21   :  { %v887_v53 = vadd.f32 %v879_v51, %v3682_v50  ;;  %v881_v18 = vpop.f32.mrb[5].mxu0 }
 0xe22   :  { %v889_v9 = vadd.f32 %v881_v18, %v3680_v48  ;;  %v883_v52 = vpop.f32.mrb[6].mxu0 }
 0xe23   :  { %v884_v22 = vpop.f32.mrb[7].mxu0  ;;  %v2915_v16 = vmul.f32 -1.442695, %v887_v53 }
 0xe24   :  { %3140 = vtanh.f32 %v889_v9  ;;  %v2916_v15 = vmul.f32 -1.442695, %v889_v9  ;;  %v3332_v22 = vld [vmem:[#allocation11] ss:$8 sps:$4 sm:$0xff]  }
 0xe25   :  { %3142 = vtanh.f32 %v887_v53 }
 0xe26   :  { %3144 = vpow2.f32 %v2916_v15  ;;  %v3336_v15 = vld [vmem:[#allocation11 + $0x20] ss:$8 sps:$4 sm:$0xff]  }
 0xe27   :  { %3146 = vpow2.f32 %v2915_v16 }
 0xe2e   :  { %v3141_v11 = vpop.eup %3140 }
 0xe2f   :  { %931 = vrot.lane.b32.xlu1 %v3141_v11, %s3444_s15  ;;  %v3143_v14 = vpop.eup %3142  ;;  %v3334_v11 = vld [vmem:[#allocation11 + $0x10] ss:$8 sps:$4 sm:$0xff]  }
 0xe30   :  { %v3145_v17 = vpop.eup %3144 }
 0xe31   :  { %v921_v23 = vadd.f32 1.0, %v3145_v17  ;;  %v3147_v50 = vpop.eup %3146 }
 0xe32   :  { %v893_v25 = vadd.f32 1.0, %v3147_v50 }
 0xe33   :  { %903 = vrot.lane.b32.xlu1 %v3143_v14, %s3444_s15  ;;  %3148 = vrcp.f32 %v921_v23  ;;  %v3335_v14 = vld [vmem:[#allocation11 + $0x24] ss:$8 sps:$4 sm:$0xff]  }
 0xe34   :  { %3150 = vrcp.f32 %v893_v25 }
 0xe3d   :  { %v3149_v48 = vpop.eup %3148 }
 0xe3e   :  { %v3151_v0 = vpop.eup %3150  ;;  %v929_v3 = vmul.f32 %v3149_v48, %v927_v35 }
 0xe3f   :  { %v901_v45 = vmul.f32 %v3151_v0, %v899_v43 }
 0xea1   :  { %v932_v27 = vpop.permute.xlu1 %931 }
 0xea2   :  { %v934_v30 = vmul.f32 %v3149_v48, %v932_v27 }
 0xea4   :  { %936 = vrot.lane.b32.xlu1 %v934_v30, %s3444_s15 }
 0xea5   :  { %v904_v38 = vpop.permute.xlu1 %903 }
 0xea6   :  { %v906_v5 = vmul.f32 %v3151_v0, %v904_v38 }
 0xea8   :  { %908 = vrot.lane.b32.xlu1 %v906_v5, %s3444_s15 }
 0xf16   :  { %v937_v37 = vpop.permute.xlu1 %936 }
 0xf17   :  { %v939_v39 = vadd.f32 %v937_v37, %v929_v3 }
 0xf19   :  { %3152 = vtanh.f32 %v939_v39 }
 0xf1a   :  { %v909_v47 = vpop.permute.xlu1 %908 }
 0xf1b   :  { %v911_v24 = vadd.f32 %v909_v47, %v901_v45 }
 0xf1d   :  { %3154 = vtanh.f32 %v911_v24 }
 0xf23   :  { %v3153_v42 = vpop.eup %3152 }
 0xf24   :  { %942 = vrot.lane.b32.xlu0 %v3153_v42, %s3444_s15 }
 0xf27   :  { %v3155_v32 = vpop.eup %3154 }
 0xf28   :  { %914 = vrot.lane.b32.xlu1 %v3155_v32, %s3444_s15 }
 0xf96   :  { %v943_v55 = vpop.permute.xlu0 %942 }
 0xf97   :  { %v945_v56 = vmul.f32 %v3149_v48, %v943_v55 }
 0xf99   :  { %952 = vrot.lane.b32.xlu0 %v945_v56, %s3445_s17 }
 0xf9a   :  { %v915_v57 = vpop.permute.xlu1 %914 }
 0xf9b   :  { %v917_v2 = vmul.f32 %v3151_v0, %v915_v57 }
 0xf9d   :  { %947 = vrot.lane.b32.xlu1 %v917_v2, %s3445_s17 }
 0xfa1   :  { %964 = vrot.lane.b32.xlu1 %v939_v39, %s3446_s19 }
 0xfa5   :  { %958 = vrot.lane.b32.xlu1 %v911_v24, %s3446_s19 }
0x100b   :  { %v953_v4 = vpop.permute.xlu0 %952 }
0x100c   :  { %v955_v6 = vsel %vm103_vm9, %v953_v4, 0.0  ;;  %v3952_v41 = vsel %vm103_vm9, %v953_v4, %v3896_v63 }
0x100d   :  { %969 = vst.msk [vmem:[#allocation4 + $0x18] sm:$0xff] %vm164_vm0, %v955_v6  ;;  %971 = vrot.lane.b32.xlu0 %v3952_v41, %s3444_s15 }
0x100f   :  { %v948_v13 = vpop.permute.xlu1 %947 }
0x1010   :  { %v950_v49 = vsel %vm106_vm8, %v948_v13, 0.0  ;;  %v3977_v18 = vsel %vm106_vm8, %v948_v13, %v3922_v8  ;;  %v3337_v8 = vld [vmem:[#allocation11 + $0x34] ss:$8 sps:$4 sm:$0xff]  }
0x1011   :  { %968 = vst.msk [vmem:[#allocation3 + $0x20] sm:$0xff] %vm164_vm0, %v950_v49 }
0x1013   :  { %v965_v46 = vpop.permute.xlu1 %964 }
0x1014   :  { %v3963_v51 = vsel %vm103_vm9, %v965_v46, %v3908_v10 }
0x1015   :  { %1060 = vrot.lane.b32.xlu1 %v3963_v51, %s3444_s15 }
0x1017   :  { %v959_v63 = vpop.permute.xlu1 %958 }
0x1018   :  { %v3970_v53 = vsel %vm106_vm8, %v959_v63, %v3915_v12  ;;  %v3333_v12 = vld [vmem:[#allocation11 + $0x14] ss:$8 sps:$4 sm:$0xff]  }
0x1019   :  { %1032 = vrot.lane.b32.xlu1 %v3970_v53, %s3444_s15 }
0x107f   :  { %v972_v9 = vpop.permute.xlu0 %971 }
0x1080   :  { %v974_v10 = vsel %vm164_vm0, %v3977_v18, %v972_v9 }
0x1081   :  { %v975_v52 = vpack.c.bf16 %v974_v10, %v974_v10 }
0x1083   :  { %2917 = vmatmul.mubr.msk.bf16.vlgmr.msra.gmra.mrb[28].mxu1 %vm315_vm3, %v975_v52 }
0x1084   :  { %1248 = vmatpush1.bf16.msra.mxu1 %v3332_v22  ;;  %1279 = vmatprep.mubr.bf16.mxu1 %v3442_v1 }
0x1085   :  { %1249 = vmatprep.subr.bf16.mxu1 %v3333_v12 }
0x1087   :  { %v1061_v47 = vpop.permute.xlu1 %1060 }
0x1088   :  { %1250 = vmatpush1.bf16.msra.mxu1 %v3334_v11 }
0x1089   :  { %1251 = vmatprep.subr.bf16.mxu1 %v3335_v14 }
0x108b   :  { %v1033_v55 = vpop.permute.xlu1 %1032 }
0x108c   :  { %1252 = vmatpush1.bf16.msra.mxu1 %v3336_v15 }
0x108d   :  { %1253 = vmatprep.subr.bf16.mxu1 %v3337_v8 }
0x1090   :  { %1254 = vmatpush1.bf16.msra.mxu1 %v3619_v19 }
0x1156   :  { %v1013_v16 = vpop.f32.mrb[28].mxu1 }
0x1157   :  { %v1021_v17 = vadd.f32 %v1013_v16, %v3686_v54  ;;  %v1015_v23 = vpop.f32.mrb[29].mxu1 }
0x1158   :  { %v1023_v50 = vadd.f32 %v1015_v23, %v3676_v44  ;;  %v1017_v25 = vpop.f32.mrb[30].mxu1 }
0x1159   :  { %v1018_v48 = vpop.f32.mrb[31].mxu1  ;;  %v2918_v38 = vmul.f32 -1.442695, %v1021_v17 }
0x115a   :  { %3156 = vtanh.f32 %v1023_v50  ;;  %v2919_v0 = vmul.f32 -1.442695, %v1023_v50 }
0x115b   :  { %3158 = vtanh.f32 %v1021_v17 }
0x115c   :  { %3160 = vpow2.f32 %v2919_v0 }
0x115d   :  { %3162 = vpow2.f32 %v2918_v38 }
0x1164   :  { %v3157_v27 = vpop.eup %3156 }
0x1165   :  { %1065 = vrot.lane.b32.xlu0 %v3157_v27, %s3444_s15  ;;  %v3159_v30 = vpop.eup %3158 }
0x1166   :  { %v3161_v19 = vpop.eup %3160 }
0x1167   :  { %v1055_v5 = vadd.f32 1.0, %v3161_v19  ;;  %v3163_v54 = vpop.eup %3162 }
0x1168   :  { %v1027_v35 = vadd.f32 1.0, %v3163_v54 }
0x1169   :  { %1037 = vrot.lane.b32.xlu0 %v3159_v30, %s3444_s15  ;;  %3164 = vrcp.f32 %v1055_v5 }
0x116a   :  { %3166 = vrcp.f32 %v1027_v35 }
0x1173   :  { %v3165_v44 = vpop.eup %3164 }
0x1174   :  { %v3167_v39 = vpop.eup %3166  ;;  %v1063_v24 = vmul.f32 %v3165_v44, %v1061_v47 }
0x1175   :  { %v1035_v56 = vmul.f32 %v3167_v39, %v1033_v55 }
0x11d7   :  { %v1066_v3 = vpop.permute.xlu0 %1065 }
0x11d8   :  { %v1068_v37 = vmul.f32 %v3165_v44, %v1066_v3 }
0x11da   :  { %1070 = vrot.lane.b32.xlu0 %v1068_v37, %s3444_s15 }
0x11db   :  { %v1038_v43 = vpop.permute.xlu0 %1037 }
0x11dc   :  { %v1040_v45 = vmul.f32 %v3167_v39, %v1038_v43 }
0x11de   :  { %1042 = vrot.lane.b32.xlu0 %v1040_v45, %s3444_s15 }
0x124c   :  { %v1071_v42 = vpop.permute.xlu0 %1070 }
0x124d   :  { %v1073_v32 = vadd.f32 %v1071_v42, %v1063_v24 }
0x124f   :  { %3168 = vtanh.f32 %v1073_v32 }
0x1250   :  { %v1043_v57 = vpop.permute.xlu0 %1042 }
0x1251   :  { %v1045_v2 = vadd.f32 %v1043_v57, %v1035_v56 }
0x1253   :  { %3170 = vtanh.f32 %v1045_v2 }
0x1259   :  { %v3169_v4 = vpop.eup %3168 }
0x125a   :  { %1076 = vrot.lane.b32.xlu1 %v3169_v4, %s3444_s15 }
0x125d   :  { %v3171_v6 = vpop.eup %3170 }
0x125e   :  { %1048 = vrot.lane.b32.xlu0 %v3171_v6, %s3444_s15 }
0x12cc   :  { %v1077_v13 = vpop.permute.xlu1 %1076 }
0x12cd   :  { %v1079_v49 = vmul.f32 %v3165_v44, %v1077_v13 }
0x12cf   :  { %1086 = vrot.lane.b32.xlu1 %v1079_v49, %s3445_s17 }
0x12d0   :  { %v1049_v46 = vpop.permute.xlu0 %1048 }
0x12d1   :  { %v1051_v63 = vmul.f32 %v3167_v39, %v1049_v46 }
0x12d3   :  { %1081 = vrot.lane.b32.xlu0 %v1051_v63, %s3445_s17 }
0x12d7   :  { %1098 = vrot.lane.b32.xlu0 %v1073_v32, %s3446_s19 }
0x12db   :  { %1092 = vrot.lane.b32.xlu0 %v1045_v2, %s3446_s19 }
0x1341   :  { %v1087_v9 = vpop.permute.xlu1 %1086 }
0x1342   :  { %v1089_v10 = vsel %vm100_vm7, %v1087_v9, 0.0  ;;  %v4001_v52 = vsel %vm100_vm7, %v1087_v9, %v3952_v41 }
0x1343   :  { %1103 = vst.msk [vmem:[#allocation4 + $0x10] sm:$0xff] %vm164_vm0, %v1089_v10  ;;  %1105 = vrot.lane.b32.xlu1 %v4001_v52, %s3444_s15 }
0x1345   :  { %v1082_v22 = vpop.permute.xlu0 %1081 }
0x1346   :  { %v1084_v12 = vsel %vm109_vm6, %v1082_v22, 0.0  ;;  %v4026_v8 = vsel %vm109_vm6, %v1082_v22, %v3977_v18 }
0x1347   :  { %1102 = vst.msk [vmem:[#allocation3 + $0x28] sm:$0xff] %vm164_vm0, %v1084_v12 }
0x1349   :  { %v1099_v11 = vpop.permute.xlu0 %1098 }
0x134a   :  { %v4012_v14 = vsel %vm100_vm7, %v1099_v11, %v3963_v51 }
0x134b   :  { %1194 = vrot.lane.b32.xlu0 %v4012_v14, %s3444_s15 }
0x134d   :  { %v1093_v41 = vpop.permute.xlu0 %1092 }
0x134e   :  { %v4019_v15 = vsel %vm109_vm6, %v1093_v41, %v3970_v53 }
0x134f   :  { %1166 = vrot.lane.b32.xlu0 %v4019_v15, %s3444_s15 }
0x13b5   :  { %v1106_v16 = vpop.permute.xlu1 %1105 }
0x13b6   :  { %v1108_v51 = vsel %vm164_vm0, %v4026_v8, %v1106_v16 }
0x13b7   :  { %v1109_v17 = vpack.c.bf16 %v1108_v51, %v1108_v51 }
0x13b9   :  { %2920 = vmatmul.mubr.msk.bf16.vlgmr.msra.gmra.mrb[8].mxu0 %vm315_vm3, %v1109_v17 }
0x13ba   :  { %1525 = vmatprep.mubr.bf16.mxu0 %v3442_v1 }
0x13bd   :  { %v1195_v43 = vpop.permute.xlu0 %1194 }
0x13c1   :  { %v1167_v42 = vpop.permute.xlu0 %1166 }
0x148c   :  { %v1147_v23 = vpop.f32.mrb[8].mxu0 }
0x148d   :  { %v1155_v53 = vadd.f32 %v1147_v23, %v3690_v58  ;;  %v1149_v50 = vpop.f32.mrb[9].mxu0 }
0x148e   :  { %v1157_v25 = vadd.f32 %v1149_v50, %v3672_v40  ;;  %v1151_v48 = vpop.f32.mrb[10].mxu0 }
0x148f   :  { %v1152_v27 = vpop.f32.mrb[11].mxu0  ;;  %v2921_v38 = vmul.f32 -1.442695, %v1155_v53 }
0x1490   :  { %3172 = vtanh.f32 %v1157_v25  ;;  %v2922_v0 = vmul.f32 -1.442695, %v1157_v25 }
0x1491   :  { %3174 = vtanh.f32 %v1155_v53 }
0x1492   :  { %3176 = vpow2.f32 %v2922_v0 }
0x1493   :  { %3178 = vpow2.f32 %v2921_v38 }
0x149a   :  { %v3173_v18 = vpop.eup %3172 }
0x149b   :  { %1199 = vrot.lane.b32.xlu1 %v3173_v18, %s3444_s15  ;;  %v3175_v30 = vpop.eup %3174 }
0x149c   :  { %v3177_v19 = vpop.eup %3176 }
0x149d   :  { %v1189_v5 = vadd.f32 1.0, %v3177_v19  ;;  %v3179_v58 = vpop.eup %3178 }
0x149e   :  { %v1161_v54 = vadd.f32 1.0, %v3179_v58 }
0x149f   :  { %1171 = vrot.lane.b32.xlu1 %v3175_v30, %s3444_s15  ;;  %3180 = vrcp.f32 %v1189_v5 }
0x14a0   :  { %3182 = vrcp.f32 %v1161_v54 }
0x14a9   :  { %v3181_v40 = vpop.eup %3180 }
0x14aa   :  { %v3183_v3 = vpop.eup %3182  ;;  %v1197_v45 = vmul.f32 %v3181_v40, %v1195_v43 }
0x14ab   :  { %v1169_v32 = vmul.f32 %v3183_v3, %v1167_v42 }
0x150d   :  { %v1200_v35 = vpop.permute.xlu1 %1199 }
0x150e   :  { %v1202_v44 = vmul.f32 %v3181_v40, %v1200_v35 }
0x1510   :  { %1204 = vrot.lane.b32.xlu1 %v1202_v44, %s3444_s15 }
0x1511   :  { %v1172_v37 = vpop.permute.xlu1 %1171 }
0x1512   :  { %v1174_v39 = vmul.f32 %v3183_v3, %v1172_v37 }
0x1514   :  { %1176 = vrot.lane.b32.xlu1 %v1174_v39, %s3444_s15 }
0x1582   :  { %v1205_v47 = vpop.permute.xlu1 %1204 }
0x1583   :  { %v1207_v24 = vadd.f32 %v1205_v47, %v1197_v45 }
0x1585   :  { %3184 = vtanh.f32 %v1207_v24 }
0x1586   :  { %v1177_v55 = vpop.permute.xlu1 %1176 }
0x1587   :  { %v1179_v56 = vadd.f32 %v1177_v55, %v1169_v32 }
0x1589   :  { %3186 = vtanh.f32 %v1179_v56 }
0x158f   :  { %v3185_v57 = vpop.eup %3184 }
0x1590   :  { %1210 = vrot.lane.b32.xlu0 %v3185_v57, %s3444_s15  ;;  %v3042_v57 = vld [vmem:[#allocation10 + $0x4] ss:$8 sps:$4 sm:$0xff]  }
0x1591   :  { %1493 = vmatprep.subr.bf16.mxu0 %v3042_v57 }
0x1593   :  { %v3187_v2 = vpop.eup %3186 }
0x1594   :  { %1182 = vrot.lane.b32.xlu1 %v3187_v2, %s3444_s15  ;;  %v4080_v2 = vld [vmem:[#allocation11 + $0x44] ss:$8 sps:$4 sm:$0xff]  }
0x1595   :  { %1631 = vmatprep.subr.bf16.mxu1 %v4080_v2 }
0x1602   :  { %v1211_v4 = vpop.permute.xlu0 %1210 }
0x1603   :  { %v1213_v6 = vmul.f32 %v3181_v40, %v1211_v4  ;;  %v4082_v4 = vld [vmem:[#allocation11 + $0x40] ss:$8 sps:$4 sm:$0xff]  }
0x1605   :  { %1220 = vrot.lane.b32.xlu0 %v1213_v6, %s3445_s17  ;;  %v3048_v6 = vld [vmem:[#allocation10 + $0x14] ss:$8 sps:$4 sm:$0xff]  }
0x1606   :  { %v1183_v13 = vpop.permute.xlu1 %1182 }
0x1607   :  { %v1185_v49 = vmul.f32 %v3183_v3, %v1183_v13 }
0x1609   :  { %1215 = vrot.lane.b32.xlu1 %v1185_v49, %s3445_s17  ;;  %v1370_v49 = vld [vmem:[#allocation4 + $0x10] sm:$0xff] }
0x160d   :  { %1232 = vrot.lane.b32.xlu1 %v1207_v24, %s3446_s19 }
0x1677   :  { %v1221_v46 = vpop.permute.xlu0 %1220 }
0x1678   :  { %v1223_v63 = vsel %vm97_vm5, %v1221_v46, 0.0  ;;  %v1230_v9 = vsel %vm97_vm5, %v1221_v46, %v4001_v52  ;;  %v4085_v46 = vld [vmem:[#allocation11 + $0x54] ss:$8 sps:$4 sm:$0xff]  }
0x1679   :  { %1237 = vst.msk [vmem:[#allocation4 + $0x8] sm:$0xff] %vm164_vm0, %v1223_v63  ;;  %1239 = vrot.lane.b32.xlu0 %v1230_v9, %s3444_s15  ;;  %v3046_v63 = vld [vmem:[#allocation10 + $0x10] ss:$8 sps:$4 sm:$0xff]  }
0x167a   :  { %v1371_v9 = vld [vmem:[#allocation4 + $0x18] sm:$0xff] }
0x167b   :  { %v1216_v10 = vpop.permute.xlu1 %1215 }
0x167c   :  { %v1218_v22 = vsel %vm112_vm4, %v1216_v10, 0.0  ;;  %v1224_v52 = vsel %vm112_vm4, %v1216_v10, %v4026_v8  ;;  %v4089_v10 = vld [vmem:[#allocation11 + $0x50] ss:$8 sps:$4 sm:$0xff]  }
0x167d   :  { %1236 = vst.msk [vmem:[#allocation3 + $0x30] sm:$0xff] %vm164_vm0, %v1218_v22  ;;  %v3054_v22 = vld [vmem:[#allocation10 + $0x24] ss:$8 sps:$4 sm:$0xff]  }
0x167f   :  { %v1233_v12 = vpop.permute.xlu1 %1232 }
0x1680   :  { %v1235_v11 = vsel %vm97_vm5, %v1233_v12, %v4012_v14  ;;  %v3002_v12 = vpack.i.bf16 %v1371_v9, %v1370_v49 }
0x1681   :  { %1328 = vrot.lane.b32.xlu1 %v1235_v11, %s3444_s15  ;;  %v4092_v11 = vld [vmem:[#allocation11 + $0x64] ss:$8 sps:$4 sm:$0xff]  }
0x1685   :  { %1226 = vrot.lane.b32.xlu1 %v1179_v56, %s3446_s19  ;;  %v3040_v56 = vld [vmem:[#allocation10] ss:$8 sps:$4 sm:$0xff]  }
0x1686   :  { %1494 = vmatpush1.bf16.msra.mxu0 %v3040_v56 }
0x1687   :  { %1495 = vmatprep.subr.bf16.mxu0 %v3048_v6  ;;  %v1364_v6 = vld [vmem:[#allocation3 + $0x20] sm:$0xff] }
0x168a   :  { %1496 = vmatpush1.bf16.msra.mxu0 %v3046_v63 }
0x168b   :  { %1497 = vmatprep.subr.bf16.mxu0 %v3054_v22 }
0x16eb   :  { %v1240_v41 = vpop.permute.xlu0 %1239 }
0x16ec   :  { %v1242_v16 = vsel %vm164_vm0, %v1224_v52, %v1240_v41  ;;  %v1372_v52 = vld [vmem:[#allocation4 + $0x20] sm:$0xff] }
0x16ed   :  { %v1243_v51 = vpack.c.bf16 %v1242_v16, %v1242_v16  ;;  %v3052_v41 = vld [vmem:[#allocation10 + $0x20] ss:$8 sps:$4 sm:$0xff]  }
0x16ee   :  { %v1373_v16 = vld [vmem:[#allocation4 + $0x28] sm:$0xff]  ;;  %1498 = vmatpush1.bf16.msra.mxu0 %v3052_v41 }
0x16ef   :  { %2923 = vmatmul.mubr.msk.bf16.vlgmr.msra.gmra.mrb[32].mxu1 %vm315_vm3, %v1243_v51  ;;  %v3007_v51 = vpack.i.bf16 %v1373_v16, %v1372_v52 }
0x16f0   :  { %1663 = vmatprep.mubr.bf16.mxu1 %v3442_v1  ;;  %1632 = vmatpush1.bf16.msra.mxu1 %v4082_v4 }
0x16f1   :  { %1633 = vmatprep.subr.bf16.mxu1 %v4085_v46 }
0x16f3   :  { %v1329_v38 = vpop.permute.xlu1 %1328 }
0x16f4   :  { %1634 = vmatpush1.bf16.msra.mxu1 %v4089_v10 }
0x16f5   :  { %1635 = vmatprep.subr.bf16.mxu1 %v4092_v11 }
0x17c2   :  { %v1281_v17 = vpop.f32.mrb[32].mxu1 }
0x17c3   :  { %v1289_v23 = vadd.f32 %v1281_v17, %v3694_v62  ;;  %v1283_v14 = vpop.f32.mrb[33].mxu1  ;;  %v4098_v17 = vld [vmem:[#allocation11 + $0x60] ss:$8 sps:$4 sm:$0xff]  }
0x17c4   :  { %v1291_v53 = vadd.f32 %v1283_v14, %v3668_v36  ;;  %v1285_v50 = vpop.f32.mrb[34].mxu1  ;;  %v1227_v36 = vpop.permute.xlu1 %1226  ;;  %1636 = vmatpush1.bf16.msra.mxu1 %v4098_v17  ;;  %v3058_v14 = vld [vmem:[#allocation10 + $0x30] ss:$8 sps:$4 sm:$0xff]  }
0x17c5   :  { %v1286_v25 = vpop.f32.mrb[35].mxu1  ;;  %v1229_v5 = vsel %vm112_vm4, %v1227_v36, %v4019_v15  ;;  %v2924_v58 = vmul.f32 -1.442695, %v1289_v23  ;;  %v4101_v50 = vld [vmem:[#allocation11 + $0x74] ss:$8 sps:$4 sm:$0xff]  }
0x17c6   :  { %3188 = vtanh.f32 %v1291_v53  ;;  %v2925_v8 = vmul.f32 -1.442695, %v1291_v53  ;;  %1637 = vmatprep.subr.bf16.mxu1 %v4101_v50 }
0x17c8   :  { %3190 = vpow2.f32 %v2925_v8 }
0x17d0   :  { %v3189_v48 = vpop.eup %3188 }
0x17d1   :  { %1333 = vrot.lane.b32.xlu0 %v3189_v48, %s3444_s15  ;;  %v4105_v48 = vld [vmem:[#allocation11 + $0x70] ss:$8 sps:$4 sm:$0xff]  }
0x17d2   :  { %v3191_v27 = vpop.eup %3190  ;;  %1638 = vmatpush1.bf16.msra.mxu1 %v4105_v48 }
0x17d3   :  { %v1323_v18 = vadd.f32 1.0, %v3191_v27  ;;  %1755 = vmatprep.subr.bf16.mxu1 %v4080_v2  ;;  %v1369_v27 = vld [vmem:[#allocation4 + $0x8] sm:$0xff] }
0x17d5   :  { %3192 = vrcp.f32 %v1323_v18  ;;  %1664 = vmatmul.mubr.bf16.vlgmr.msra.gmra.mrb[36].mxu1 %v3443_v26 }
0x17d6   :  { %3194 = vtanh.f32 %v1289_v23  ;;  %v3060_v23 = vld [vmem:[#allocation10 + $0x34] ss:$8 sps:$4 sm:$0xff]   ;;  %1756 = vmatpush1.bf16.msra.mxu1 %v4082_v4  ;;  %1787 = vmatprep.mubr.bf16.mxu1 %v3442_v1 }
0x17d7   :  { %3196 = vpow2.f32 %v2924_v58  ;;  %1499 = vmatprep.subr.bf16.mxu0 %v3060_v23  ;;  %1757 = vmatprep.subr.bf16.mxu1 %v4085_v46 }
0x17d8   :  { %1500 = vmatpush1.bf16.msra.mxu0 %v3058_v14 }
0x17d9   :  { %1891 = vmatprep.subr.bf16.mxu0 %v4080_v2 }
0x17da   :  { %1758 = vmatpush1.bf16.msra.mxu1 %v4089_v10 }
0x17db   :  { %1759 = vmatprep.subr.bf16.mxu1 %v4092_v11 }
0x17de   :  { %1760 = vmatpush1.bf16.msra.mxu1 %v4098_v17 }
0x17df   :  { %v3193_v30 = vpop.eup %3192  ;;  %1761 = vmatprep.subr.bf16.mxu1 %v4101_v50 }
0x17e0   :  { %v3195_v62 = vpop.eup %3194  ;;  %v1331_v40 = vmul.f32 %v3193_v30, %v1329_v38  ;;  %v1375_v38 = vld [vmem:[#allocation4 + $0x38] sm:$0xff] }
0x17e1   :  { %v3197_v54 = vpop.eup %3196 }
0x17e2   :  { %v1295_v44 = vadd.f32 1.0, %v3197_v54  ;;  %1762 = vmatpush1.bf16.msra.mxu1 %v4105_v48  ;;  %v1361_v54 = vld [vmem:[#allocation3 + $0x8] sm:$0xff] }
0x17e3   :  { %2027 = vmatprep.subr.bf16.mxu1 %v4080_v2 }
0x1843   :  { %v1334_v0 = vpop.permute.xlu0 %1333 }
0x1844   :  { %v1336_v19 = vmul.f32 %v3193_v30, %v1334_v0  ;;  %v1374_v0 = vld [vmem:[#allocation4 + $0x30] sm:$0xff] }
0x1846   :  { %1338 = vrot.lane.b32.xlu0 %v1336_v19, %s3444_s15  ;;  %v3012_v19 = vpack.i.bf16 %v1375_v38, %v1374_v0 }
0x184a   :  { %1305 = vrot.lane.b32.xlu0 %v3195_v62, %s3444_s15 }
0x184e   :  { %1300 = vrot.lane.b32.xlu0 %v1229_v5, %s3444_s15 }
0x18b8   :  { %v1339_v35 = vpop.permute.xlu0 %1338 }
0x18b9   :  { %v1341_v3 = vadd.f32 %v1339_v35, %v1331_v40  ;;  %v1360_v40 = vld [vmem:[#allocation3] sm:$0xff] }
0x18bb   :  { %3198 = vtanh.f32 %v1341_v3 }
0x18bc   :  { %3200 = vrcp.f32 %v1295_v44  ;;  %v1306_v39 = vpop.permute.xlu0 %1305 }
0x18c0   :  { %v1301_v15 = vpop.permute.xlu0 %1300 }
0x18c5   :  { %v3199_v37 = vpop.eup %3198 }
0x18c6   :  { %1344 = vrot.lane.b32.xlu1 %v3199_v37, %s3444_s15  ;;  %v4074_v43 = vpop.eup %3200 }
0x18c7   :  { %v1308_v45 = vmul.f32 %v4074_v43, %v1306_v39  ;;  %v1303_v42 = vmul.f32 %v4074_v43, %v1301_v15  ;;  %v1362_v15 = vld [vmem:[#allocation3 + $0x10] sm:$0xff] }
0x18ca   :  { %1310 = vrot.lane.b32.xlu1 %v1308_v45, %s3444_s15 }
0x1938   :  { %v1345_v47 = vpop.permute.xlu1 %1344 }
0x1939   :  { %v1347_v24 = vmul.f32 %v3193_v30, %v1345_v47  ;;  %v1363_v47 = vld [vmem:[#allocation3 + $0x18] sm:$0xff] }
0x193b   :  { %1354 = vrot.lane.b32.xlu0 %v1347_v24, %s3445_s17 }
0x193c   :  { %v1311_v32 = vpop.permute.xlu1 %1310 }
0x193d   :  { %v1313_v55 = vadd.f32 %v1311_v32, %v1303_v42 }
0x193f   :  { %3202 = vtanh.f32 %v1313_v55 }
0x1949   :  { %v3203_v13 = vpop.eup %3202 }
0x194a   :  { %1316 = vrot.lane.b32.xlu1 %v3203_v13, %s3444_s15  ;;  %v1365_v13 = vld [vmem:[#allocation3 + $0x28] sm:$0xff] }
0x194e   :  { %3003 = vrot.lane.b32.xlu1 %v3002_v12, %s3444_s15 }
0x1952   :  { %3008 = vrot.lane.b32.xlu1 %v3007_v51, %s3444_s15  ;;  %v1366_v51 = vld [vmem:[#allocation3 + $0x30] sm:$0xff] }
0x19ad   :  { %v1355_v53 = vpop.permute.xlu0 %1354 }
0x19ae   :  { %v1357_v25 = vsel %vm94_vm2, %v1355_v53, 0.0  ;;  %v1665_v53 = vpop.f32.mrb[36].mxu1 }
0x19af   :  { %1359 = vst.msk [vmem:[#allocation4] sm:$0xff] %vm164_vm0, %v1357_v25  ;;  %v1667_v25 = vpop.f32.mrb[37].mxu1 }
0x19b6   :  { %v1368_v8 = vld [vmem:[#allocation4] sm:$0xff] }
0x19b7   :  { %v2997_v18 = vpack.i.bf16 %v1369_v27, %v1368_v8  ;;  %v1669_v8 = vpop.f32.mrb[38].mxu1 }
0x19b8   :  { %v1670_v27 = vpop.f32.mrb[39].mxu1 }
0x19b9   :  { %2998 = vrot.lane.b32.xlu0 %v2997_v18, %s3444_s15  ;;  %v2926_v18 = vld [vmem:[%s4686_s5 + $0x2] sm:$0x3] }
0x19bc   :  { %v1317_v30 = vpop.permute.xlu1 %1316 }
0x19bd   :  { %v1319_v26 = vmul.f32 %v4074_v43, %v1317_v30  ;;  %v1434_v30 = vrot.slane %v2926_v18, %v136_v31 }
0x19bf   :  { %1349 = vrot.lane.b32.xlu0 %v1319_v26, %s3445_s17  ;;  %v1438_v26 = vrot.slane %v2926_v18, %v140_v29 }
0x19c0   :  { %v3004_v58 = vpop.permute.xlu1 %3003 }
0x19c1   :  { %v3006_v37 = vunpack.i.h.bf16 %v3004_v58  ;;  %v3005_v39 = vunpack.i.l.bf16 %v3004_v58 }
0x19c3   :  { %3013 = vrot.lane.b32.xlu0 %v3012_v19, %s3444_s15  ;;  %v1411_v24 = vsel %vm164_vm0, %v1363_v47, %v3006_v37  ;;  %v1410_v42 = vsel %vm164_vm0, %v1362_v15, %v3005_v39 }
0x19c4   :  { %v3009_v32 = vpop.permute.xlu1 %3008  ;;  %v1417_v55 = vpack.c.bf16 %v1411_v24, %v1410_v42 }
0x19c5   :  { %v3011_v56 = vunpack.i.h.bf16 %v3009_v32  ;;  %v3010_v57 = vunpack.i.l.bf16 %v3009_v32 }
0x19c7   :  { %v1413_v49 = vsel %vm164_vm0, %v1365_v13, %v3011_v56  ;;  %v1412_v63 = vsel %vm164_vm0, %v1364_v6, %v3010_v57 }
0x19c8   :  { %v1418_v22 = vpack.c.bf16 %v1413_v49, %v1412_v63 }
0x1a2b   :  { %v2999_v62 = vpop.permute.xlu0 %2998 }
0x1a2c   :  { %v3001_v36 = vunpack.i.h.bf16 %v2999_v62  ;;  %v3000_v5 = vunpack.i.l.bf16 %v2999_v62 }
0x1a2e   :  { %v1409_v35 = vsel %vm164_vm0, %v1361_v54, %v3001_v36  ;;  %v1408_v44 = vsel %vm164_vm0, %v1360_v40, %v3000_v5 }
0x1a2f   :  { %v1416_v3 = vpack.c.bf16 %v1409_v35, %v1408_v44 }
0x1a31   :  { %v1350_v43 = vpop.permute.xlu0 %1349  ;;  %2935 = vmatmul.mubr.msk.bf16.vlgmr.msra.gmra.mrb[12].mxu0 %vm315_vm3, %v1416_v3 }
0x1a32   :  { %v1352_v45 = vsel %vm115_vm1, %v1350_v43, 0.0  ;;  %1535 = vmatprep.mubr.bf16.mxu0 %v3442_v1  ;;  %1892 = vmatpush1.bf16.msra.mxu0 %v4082_v4 }
0x1a33   :  { %1358 = vst.msk [vmem:[#allocation3 + $0x38] sm:$0xff] %vm164_vm0, %v1352_v45  ;;  %1893 = vmatprep.subr.bf16.mxu0 %v4085_v46 }
0x1a35   :  { %v3014_v9 = vpop.permute.xlu0 %3013 }
0x1a36   :  { %1894 = vmatpush1.bf16.msra.mxu0 %v4089_v10  ;;  %v3016_v52 = vunpack.i.h.bf16 %v3014_v9  ;;  %v3015_v41 = vunpack.i.l.bf16 %v3014_v9 }
0x1a37   :  { %1895 = vmatprep.subr.bf16.mxu0 %v4092_v11 }
0x1a38   :  { %v1414_v23 = vsel %vm164_vm0, %v1366_v51, %v3015_v41 }
0x1a39   :  { %2936 = vmatmul.mubr.msk.bf16.gmra.mrb[16].mxu0 %vm315_vm3, %v1417_v55 }
0x1a3a   :  { %1545 = vmatprep.mubr.bf16.mxu0 %v3442_v1  ;;  %1896 = vmatpush1.bf16.msra.mxu0 %v4098_v17  ;;  %v1367_v12 = vld [vmem:[#allocation3 + $0x38] sm:$0xff] }
0x1a3b   :  { %1897 = vmatprep.subr.bf16.mxu0 %v4101_v50  ;;  %v1415_v16 = vsel %vm164_vm0, %v1367_v12, %v3016_v52 }
0x1a3c   :  { %v1419_v14 = vpack.c.bf16 %v1415_v16, %v1414_v23 }
0x1a3e   :  { %1898 = vmatpush1.bf16.msra.mxu0 %v4105_v48 }
0x1a3f   :  { %2163 = vmatprep.subr.bf16.mxu0 %v4080_v2 }
0x1a41   :  { %2937 = vmatmul.mubr.msk.bf16.gmra.mrb[20].mxu0 %vm315_vm3, %v1418_v22 }
0x1a42   :  { %1555 = vmatprep.mubr.bf16.mxu0 %v3442_v1 }
0x1a49   :  { %2938 = vmatmul.mubr.msk.bf16.gmra.mrb[24].mxu0 %vm315_vm3, %v1419_v14 }
0x1a4a   :  { %1923 = vmatprep.mubr.bf16.mxu0 %v3442_v1 }
0x1b04   :  { %v1527_v0 = vpop.f32.mrb[12].mxu0 }
0x1b05   :  { %v1528_v38 = vadd.f32 %v1527_v0, %v1434_v30  ;;  %v1529_v19 = vpop.f32.mrb[13].mxu0 }
0x1b06   :  { %v4160_v62 = vadd.f32 %v1529_v19, %v1438_v26  ;;  %v1531_v36 = vpop.f32.mrb[14].mxu0 }
0x1b07   :  { %v4162_v5 = vadd.f32 %v1531_v36, %v1434_v30  ;;  %v1673_v58 = vadd.f32 %v1665_v53, %v1528_v38  ;;  %v1533_v54 = vpop.f32.mrb[15].mxu0 }
0x1b08   :  { %v4164_v40 = vadd.f32 %v1533_v54, %v1438_v26 }
0x1b09   :  { %3204 = vtanh.f32 %v1673_v58  ;;  %v2947_v16 = vmul.f32 -1.442695, %v1673_v58 }
0x1b0c   :  { %v1537_v35 = vpop.f32.mrb[16].mxu0 }
0x1b0d   :  { %v4166_v44 = vadd.f32 %v1537_v35, %v1434_v30  ;;  %v1539_v31 = vpop.f32.mrb[17].mxu0 }
0x1b0e   :  { %v4168_v3 = vadd.f32 %v1539_v31, %v1438_v26  ;;  %v1541_v28 = vpop.f32.mrb[18].mxu0 }
0x1b0f   :  { %v4170_v29 = vadd.f32 %v1541_v28, %v1434_v30  ;;  %v1543_v37 = vpop.f32.mrb[19].mxu0 }
0x1b10   :  { %v4172_v39 = vadd.f32 %v1543_v37, %v1438_v26 }
0x1b13   :  { %v3205_v43 = vpop.eup %3204 }
0x1b14   :  { %v1547_v45 = vpop.f32.mrb[20].mxu0  ;;  %1685 = vrot.lane.b32.xlu0 %v3205_v43, %s3444_s15 }
0x1b15   :  { %v4175_v15 = vadd.f32 %v1547_v45, %v1434_v30  ;;  %v1549_v47 = vpop.f32.mrb[21].mxu0 }
0x1b16   :  { %v4177_v24 = vadd.f32 %v1549_v47, %v1438_v26  ;;  %v1551_v42 = vpop.f32.mrb[22].mxu0 }
0x1b17   :  { %v4179_v32 = vadd.f32 %v1551_v42, %v1434_v30  ;;  %v1553_v55 = vpop.f32.mrb[23].mxu0 }
0x1b18   :  { %v4181_v56 = vadd.f32 %v1553_v55, %v1438_v26 }
0x1b1c   :  { %v1557_v57 = vpop.f32.mrb[24].mxu0 }
0x1b1d   :  { %v4183_v6 = vadd.f32 %v1557_v57, %v1434_v30  ;;  %v1559_v13 = vpop.f32.mrb[25].mxu0 }
0x1b1e   :  { %v4185_v49 = vadd.f32 %v1559_v13, %v1438_v26  ;;  %v1561_v63 = vpop.f32.mrb[26].mxu0 }
0x1b1f   :  { %v4187_v9 = vadd.f32 %v1561_v63, %v1434_v30  ;;  %v1563_v22 = vpop.f32.mrb[27].mxu0 }
0x1b20   :  { %v1564_v12 = vadd.f32 %v1563_v22, %v1438_v26 }
0x1b22   :  { %v1675_v52 = vadd.f32 %v1667_v25, %v1564_v12 }
0x1b24   :  { %3206 = vtanh.f32 %v1675_v52  ;;  %v2948_v14 = vmul.f32 -1.442695, %v1675_v52 }
0x1b25   :  { %3208 = vpow2.f32 %v2947_v16 }
0x1b2e   :  { %v3207_v41 = vpop.eup %3206 }
0x1b2f   :  { %1709 = vrot.lane.b32.xlu1 %v3207_v41, %s3444_s15  ;;  %v3209_v51 = vpop.eup %3208 }
0x1b30   :  { %v1679_v23 = vadd.f32 1.0, %v3209_v51 }
0x1b32   :  { %3210 = vrcp.f32 %v1679_v23 }
0x1b33   :  { %3212 = vpow2.f32 %v2948_v14 }
0x1b3c   :  { %v3211_v53 = vpop.eup %3210 }
0x1b3d   :  { %v3213_v18 = vpop.eup %3212  ;;  %v1683_v38 = vmul.f32 0.0, %v3211_v53 }
0x1b3e   :  { %v1703_v30 = vadd.f32 1.0, %v3213_v18 }
0x1b40   :  { %3214 = vrcp.f32 %v1703_v30 }
0x1b4a   :  { %v3215_v25 = vpop.eup %3214 }
0x1b4b   :  { %v1707_v54 = vmul.f32 0.0, %v3215_v25 }
0x1b86   :  { %v1686_v8 = vpop.permute.xlu0 %1685 }
0x1b87   :  { %v1688_v27 = vmul.f32 %v3211_v53, %v1686_v8 }
0x1b89   :  { %1690 = vrot.lane.b32.xlu0 %v1688_v27, %s3444_s15 }
0x1ba1   :  { %v1710_v26 = vpop.permute.xlu1 %1709 }
0x1ba2   :  { %v1712_v0 = vmul.f32 %v3215_v25, %v1710_v26 }
0x1ba4   :  { %1714 = vrot.lane.b32.xlu1 %v1712_v0, %s3444_s15 }
0x1bfb   :  { %v1691_v19 = vpop.permute.xlu0 %1690 }
0x1bfc   :  { %v1693_v36 = vadd.f32 %v1691_v19, %v1683_v38 }
0x1bfe   :  { %3216 = vtanh.f32 %v1693_v36 }
0x1c08   :  { %v3217_v58 = vpop.eup %3216 }
0x1c09   :  { %1696 = vrot.lane.b32.xlu0 %v3217_v58, %s3444_s15 }
0x1c16   :  { %v1715_v35 = vpop.permute.xlu1 %1714 }
0x1c17   :  { %v1717_v31 = vadd.f32 %v1715_v35, %v1707_v54 }
0x1c19   :  { %3218 = vtanh.f32 %v1717_v31 }
0x1c23   :  { %v3219_v28 = vpop.eup %3218 }
0x1c24   :  { %1720 = vrot.lane.b32.xlu1 %v3219_v28, %s3444_s15 }
0x1c7b   :  { %v1697_v37 = vpop.permute.xlu0 %1696 }
0x1c7c   :  { %v1699_v43 = vmul.f32 %v3211_v53, %v1697_v37 }
0x1c7e   :  { %1725 = vrot.lane.b32.xlu0 %v1699_v43, %s3445_s17 }
0x1c82   :  { %1740 = vrot.lane.b32.xlu0 %v1717_v31, %s3446_s19 }
0x1c86   :  { %1735 = vrot.lane.b32.xlu0 %v1693_v36, %s3446_s19 }
0x1c96   :  { %v1721_v45 = vpop.permute.xlu1 %1720 }
0x1c97   :  { %v1723_v47 = vmul.f32 %v3215_v25, %v1721_v45 }
0x1c99   :  { %1730 = vrot.lane.b32.xlu1 %v1723_v47, %s3445_s17 }
0x1cf0   :  { %v1726_v42 = vpop.permute.xlu0 %1725 }
0x1cf1   :  { %v4218_v52 = vsel %vm94_vm2, %v1726_v42, 0.0 }
0x1cf4   :  { %v1741_v55 = vpop.permute.xlu0 %1740 }
0x1cf5   :  { %v4200_v57 = vsel %vm115_vm1, %v1741_v55, 0.0 }
0x1cf6   :  { %1836 = vrot.lane.b32.xlu0 %v4200_v57, %s3444_s15 }
0x1cf8   :  { %v1736_v13 = vpop.permute.xlu0 %1735 }
0x1cf9   :  { %v4206_v63 = vsel %vm94_vm2, %v1736_v13, 0.0 }
0x1cfa   :  { %1808 = vrot.lane.b32.xlu0 %v4206_v63, %s3444_s15 }
0x1d0b   :  { %v1731_v22 = vpop.permute.xlu1 %1730 }
0x1d0c   :  { %v4212_v12 = vsel %vm115_vm1, %v1731_v22, 0.0 }
0x1d0d   :  { %1747 = vrot.lane.b32.xlu1 %v4212_v12, %s3444_s15 }
0x1d68   :  { %v1837_v37 = vpop.permute.xlu0 %1836 }
0x1d6c   :  { %v1809_v42 = vpop.permute.xlu0 %1808 }
0x1d7f   :  { %v1748_v41 = vpop.permute.xlu1 %1747 }
0x1d80   :  { %v1750_v16 = vsel %vm164_vm0, %v4218_v52, %v1748_v41 }
0x1d81   :  { %v1751_v51 = vpack.c.bf16 %v1750_v16, %v1750_v16 }
0x1d83   :  { %2949 = vmatmul.mubr.msk.bf16.vlgmr.msra.gmra.mrb[40].mxu1 %vm315_vm3, %v1751_v51 }
0x1d84   :  { %2028 = vmatpush1.bf16.msra.mxu1 %v4082_v4  ;;  %2059 = vmatprep.mubr.bf16.mxu1 %v3442_v1 }
0x1d85   :  { %2029 = vmatprep.subr.bf16.mxu1 %v4085_v46 }
0x1d88   :  { %2030 = vmatpush1.bf16.msra.mxu1 %v4089_v10 }
0x1d89   :  { %2031 = vmatprep.subr.bf16.mxu1 %v4092_v11 }
0x1d8c   :  { %2032 = vmatpush1.bf16.msra.mxu1 %v4098_v17 }
0x1d8d   :  { %2033 = vmatprep.subr.bf16.mxu1 %v4101_v50 }
0x1d90   :  { %2034 = vmatpush1.bf16.msra.mxu1 %v4105_v48 }
0x1d91   :  { %2299 = vmatprep.subr.bf16.mxu1 %v4080_v2 }
0x1e56   :  { %v1789_v23 = vpop.f32.mrb[40].mxu1 }
0x1e57   :  { %v1797_v14 = vadd.f32 %v1789_v23, %v4162_v5  ;;  %v1791_v53 = vpop.f32.mrb[41].mxu1 }
0x1e58   :  { %v1799_v8 = vadd.f32 %v1791_v53, %v4185_v49  ;;  %v1793_v27 = vpop.f32.mrb[42].mxu1 }
0x1e59   :  { %v1794_v18 = vpop.f32.mrb[43].mxu1  ;;  %v2950_v0 = vmul.f32 -1.442695, %v1797_v14 }
0x1e5a   :  { %3220 = vtanh.f32 %v1799_v8  ;;  %v2951_v26 = vmul.f32 -1.442695, %v1799_v8 }
0x1e5b   :  { %3222 = vtanh.f32 %v1797_v14 }
0x1e5c   :  { %3224 = vpow2.f32 %v2951_v26 }
0x1e5d   :  { %3226 = vpow2.f32 %v2950_v0 }
0x1e64   :  { %v3221_v30 = vpop.eup %3220 }
0x1e65   :  { %1841 = vrot.lane.b32.xlu1 %v3221_v30, %s3444_s15  ;;  %v3223_v25 = vpop.eup %3222 }
0x1e66   :  { %v3225_v38 = vpop.eup %3224 }
0x1e67   :  { %v1831_v19 = vadd.f32 1.0, %v3225_v38  ;;  %v3227_v5 = vpop.eup %3226 }
0x1e68   :  { %v1803_v36 = vadd.f32 1.0, %v3227_v5 }
0x1e69   :  { %1813 = vrot.lane.b32.xlu1 %v3223_v25, %s3444_s15  ;;  %3228 = vrcp.f32 %v1831_v19 }
0x1e6a   :  { %3230 = vrcp.f32 %v1803_v36 }
0x1e73   :  { %v3229_v49 = vpop.eup %3228 }
0x1e74   :  { %v3231_v35 = vpop.eup %3230  ;;  %v1839_v43 = vmul.f32 %v3229_v49, %v1837_v37 }
0x1e75   :  { %v1811_v55 = vmul.f32 %v3231_v35, %v1809_v42 }
0x1ed7   :  { %v1842_v58 = vpop.permute.xlu1 %1841 }
0x1ed8   :  { %v1844_v54 = vmul.f32 %v3229_v49, %v1842_v58 }
0x1eda   :  { %1846 = vrot.lane.b32.xlu1 %v1844_v54, %s3444_s15 }
0x1edb   :  { %v1814_v31 = vpop.permute.xlu1 %1813 }
0x1edc   :  { %v1816_v28 = vmul.f32 %v3231_v35, %v1814_v31 }
0x1ede   :  { %1818 = vrot.lane.b32.xlu1 %v1816_v28, %s3444_s15 }
0x1f4c   :  { %v1847_v45 = vpop.permute.xlu1 %1846 }
0x1f4d   :  { %v1849_v47 = vadd.f32 %v1847_v45, %v1839_v43 }
0x1f4f   :  { %3232 = vtanh.f32 %v1849_v47 }
0x1f50   :  { %v1819_v13 = vpop.permute.xlu1 %1818 }
0x1f51   :  { %v1821_v22 = vadd.f32 %v1819_v13, %v1811_v55 }
0x1f53   :  { %3234 = vtanh.f32 %v1821_v22 }
0x1f59   :  { %v3233_v41 = vpop.eup %3232 }
0x1f5a   :  { %1852 = vrot.lane.b32.xlu0 %v3233_v41, %s3444_s15 }
0x1f5d   :  { %v3235_v16 = vpop.eup %3234 }
0x1f5e   :  { %1824 = vrot.lane.b32.xlu1 %v3235_v16, %s3444_s15 }
0x1fcc   :  { %v1853_v51 = vpop.permute.xlu0 %1852 }
0x1fcd   :  { %v1855_v23 = vmul.f32 %v3229_v49, %v1853_v51 }
0x1fcf   :  { %1862 = vrot.lane.b32.xlu0 %v1855_v23, %s3445_s17 }
0x1fd0   :  { %v1825_v14 = vpop.permute.xlu1 %1824 }
0x1fd1   :  { %v1827_v53 = vmul.f32 %v3231_v35, %v1825_v14 }
0x1fd3   :  { %1857 = vrot.lane.b32.xlu1 %v1827_v53, %s3445_s17 }
0x1fd7   :  { %1874 = vrot.lane.b32.xlu1 %v1849_v47, %s3446_s19 }
0x1fdb   :  { %1868 = vrot.lane.b32.xlu1 %v1821_v22, %s3446_s19 }
0x2041   :  { %v4244_v8 = vpop.permute.xlu0 %1862 }
0x2042   :  { %v4250_v27 = vsel %vm112_vm4, %v4244_v8, %v4212_v12 }
0x2043   :  { %1883 = vrot.lane.b32.xlu0 %v4250_v27, %s3444_s15 }
0x2045   :  { %v4254_v18 = vpop.permute.xlu1 %1857 }
0x2046   :  { %v4274_v38 = vsel %vm97_vm5, %v4254_v18, %v4218_v52 }
0x2049   :  { %v1875_v30 = vpop.permute.xlu1 %1874 }
0x204a   :  { %v4259_v25 = vsel %vm112_vm4, %v1875_v30, %v4200_v57 }
0x204b   :  { %1972 = vrot.lane.b32.xlu1 %v4259_v25, %s3444_s15 }
0x204d   :  { %v1869_v26 = vpop.permute.xlu1 %1868 }
0x204e   :  { %v4266_v0 = vsel %vm97_vm5, %v1869_v26, %v4206_v63 }
0x204f   :  { %1944 = vrot.lane.b32.xlu1 %v4266_v0, %s3444_s15 }
0x20b5   :  { %v1884_v57 = vpop.permute.xlu0 %1883 }
0x20b6   :  { %v1886_v19 = vsel %vm164_vm0, %v4274_v38, %v1884_v57 }
0x20b7   :  { %v1887_v5 = vpack.c.bf16 %v1886_v19, %v1886_v19 }
0x20b9   :  { %2952 = vmatmul.mubr.msk.bf16.vlgmr.msra.gmra.mrb[28].mxu0 %vm315_vm3, %v1887_v5 }
0x20ba   :  { %2164 = vmatpush1.bf16.msra.mxu0 %v4082_v4  ;;  %2195 = vmatprep.mubr.bf16.mxu0 %v3442_v1 }
0x20bb   :  { %2165 = vmatprep.subr.bf16.mxu0 %v4085_v46 }
0x20bd   :  { %v1973_v51 = vpop.permute.xlu1 %1972 }
0x20be   :  { %2166 = vmatpush1.bf16.msra.mxu0 %v4089_v10 }
0x20bf   :  { %2167 = vmatprep.subr.bf16.mxu0 %v4092_v11 }
0x20c1   :  { %v1945_v30 = vpop.permute.xlu1 %1944 }
0x20c2   :  { %2168 = vmatpush1.bf16.msra.mxu0 %v4098_v17 }
0x20c3   :  { %2169 = vmatprep.subr.bf16.mxu0 %v4101_v50 }
0x20c6   :  { %2170 = vmatpush1.bf16.msra.mxu0 %v4105_v48 }
0x20c7   :  { %2435 = vmatprep.subr.bf16.mxu0 %v4080_v2 }
0x218c   :  { %v1925_v63 = vpop.f32.mrb[28].mxu0 }
0x218d   :  { %v1933_v36 = vadd.f32 %v1925_v63, %v4166_v44  ;;  %v1927_v49 = vpop.f32.mrb[29].mxu0 }
0x218e   :  { %v1935_v58 = vadd.f32 %v1927_v49, %v4181_v56  ;;  %v1929_v54 = vpop.f32.mrb[30].mxu0 }
0x218f   :  { %v1930_v35 = vpop.f32.mrb[31].mxu0  ;;  %v2953_v43 = vmul.f32 -1.442695, %v1933_v36 }
0x2190   :  { %3236 = vtanh.f32 %v1935_v58  ;;  %v2954_v37 = vmul.f32 -1.442695, %v1935_v58 }
0x2191   :  { %3238 = vtanh.f32 %v1933_v36 }
0x2192   :  { %3240 = vpow2.f32 %v2954_v37 }
0x2193   :  { %3242 = vpow2.f32 %v2953_v43 }
0x219a   :  { %v3237_v31 = vpop.eup %3236 }
0x219b   :  { %1977 = vrot.lane.b32.xlu0 %v3237_v31, %s3444_s15  ;;  %v3239_v28 = vpop.eup %3238  ;;  %v1860_v31 = vsel %vm97_vm5, %v4254_v18, 0.0 }
0x219c   :  { %v3241_v45 = vpop.eup %3240  ;;  %v1878_v37 = vadd.f32 %v1860_v31, %v4218_v52  ;;  %v1880_v43 = vmax.f32 %v4218_v52, %v1860_v31 }
0x219d   :  { %v1967_v47 = vadd.f32 1.0, %v3241_v45  ;;  %v3243_v44 = vpop.eup %3242 }
0x219e   :  { %v1939_v42 = vadd.f32 1.0, %v3243_v44 }
0x219f   :  { %1949 = vrot.lane.b32.xlu0 %v3239_v28, %s3444_s15  ;;  %3244 = vrcp.f32 %v1967_v47 }
0x21a0   :  { %3246 = vrcp.f32 %v1939_v42 }
0x21a9   :  { %v3245_v56 = vpop.eup %3244 }
0x21aa   :  { %v3247_v22 = vpop.eup %3246  ;;  %v1975_v23 = vmul.f32 %v3245_v56, %v1973_v51 }
0x21ab   :  { %v1947_v26 = vmul.f32 %v3247_v22, %v1945_v30 }
0x220d   :  { %v1978_v55 = vpop.permute.xlu0 %1977 }
0x220e   :  { %v1980_v13 = vmul.f32 %v3245_v56, %v1978_v55 }
0x2210   :  { %1982 = vrot.lane.b32.xlu0 %v1980_v13, %s3444_s15 }
0x2211   :  { %v1950_v41 = vpop.permute.xlu0 %1949 }
0x2212   :  { %v1952_v16 = vmul.f32 %v3247_v22, %v1950_v41 }
0x2214   :  { %1954 = vrot.lane.b32.xlu0 %v1952_v16, %s3444_s15 }
0x2282   :  { %v1983_v14 = vpop.permute.xlu0 %1982 }
0x2283   :  { %v1985_v53 = vadd.f32 %v1983_v14, %v1975_v23 }
0x2285   :  { %3248 = vtanh.f32 %v1985_v53 }
0x2286   :  { %v1955_v57 = vpop.permute.xlu0 %1954 }
0x2287   :  { %v1957_v19 = vadd.f32 %v1955_v57, %v1947_v26 }
0x2289   :  { %3250 = vtanh.f32 %v1957_v19 }
0x228f   :  { %v3249_v5 = vpop.eup %3248 }
0x2290   :  { %1988 = vrot.lane.b32.xlu1 %v3249_v5, %s3444_s15 }
0x2293   :  { %v3251_v63 = vpop.eup %3250 }
0x2294   :  { %1960 = vrot.lane.b32.xlu0 %v3251_v63, %s3444_s15 }
0x2302   :  { %v1989_v36 = vpop.permute.xlu1 %1988 }
0x2303   :  { %v1991_v49 = vmul.f32 %v3245_v56, %v1989_v36 }
0x2305   :  { %1998 = vrot.lane.b32.xlu1 %v1991_v49, %s3445_s17 }
0x2306   :  { %v1961_v58 = vpop.permute.xlu0 %1960 }
0x2307   :  { %v1963_v54 = vmul.f32 %v3247_v22, %v1961_v58 }
0x2309   :  { %1993 = vrot.lane.b32.xlu0 %v1963_v54, %s3445_s17 }
0x230d   :  { %2010 = vrot.lane.b32.xlu0 %v1985_v53, %s3446_s19 }
0x2311   :  { %2004 = vrot.lane.b32.xlu0 %v1957_v19, %s3446_s19 }
0x2377   :  { %v4300_v35 = vpop.permute.xlu1 %1998 }
0x2378   :  { %v4309_v28 = vsel %vm109_vm6, %v4300_v35, %v4250_v27 }
0x2379   :  { %2019 = vrot.lane.b32.xlu1 %v4309_v28, %s3444_s15 }
0x237b   :  { %v1994_v45 = vpop.permute.xlu0 %1993 }
0x237c   :  { %v1996_v47 = vsel %vm100_vm7, %v1994_v45, 0.0  ;;  %v4338_v55 = vsel %vm100_vm7, %v1994_v45, %v4274_v38 }
0x237d   :  { %v4317_v44 = vadd.f32 %v1996_v47, %v1878_v37  ;;  %v4319_v18 = vmax.f32 %v1880_v43, %v1996_v47 }
0x237f   :  { %v2011_v42 = vpop.permute.xlu0 %2010 }
0x2380   :  { %v4324_v27 = vsel %vm109_vm6, %v2011_v42, %v4259_v25 }
0x2381   :  { %2108 = vrot.lane.b32.xlu0 %v4324_v27, %s3444_s15 }
0x2383   :  { %v2005_v56 = vpop.permute.xlu0 %2004 }
0x2384   :  { %v4331_v52 = vsel %vm100_vm7, %v2005_v56, %v4266_v0 }
0x2385   :  { %2080 = vrot.lane.b32.xlu0 %v4331_v52, %s3444_s15 }
0x23eb   :  { %v2020_v13 = vpop.permute.xlu1 %2019 }
0x23ec   :  { %v2022_v25 = vsel %vm164_vm0, %v4338_v55, %v2020_v13 }
0x23ed   :  { %v2023_v22 = vpack.c.bf16 %v2022_v25, %v2022_v25 }
0x23ef   :  { %2955 = vmatmul.mubr.msk.bf16.vlgmr.msra.gmra.mrb[44].mxu1 %vm315_vm3, %v2023_v22 }
0x23f0   :  { %2300 = vmatpush1.bf16.msra.mxu1 %v4082_v4  ;;  %2331 = vmatprep.mubr.bf16.mxu1 %v3442_v1 }
0x23f1   :  { %2301 = vmatprep.subr.bf16.mxu1 %v4085_v46 }
0x23f3   :  { %v2109_v54 = vpop.permute.xlu0 %2108 }
0x23f4   :  { %2302 = vmatpush1.bf16.msra.mxu1 %v4089_v10 }
0x23f5   :  { %2303 = vmatprep.subr.bf16.mxu1 %v4092_v11 }
0x23f7   :  { %v2081_v45 = vpop.permute.xlu0 %2080 }
0x23f8   :  { %2304 = vmatpush1.bf16.msra.mxu1 %v4098_v17 }
0x23f9   :  { %2305 = vmatprep.subr.bf16.mxu1 %v4101_v50 }
0x23fc   :  { %2306 = vmatpush1.bf16.msra.mxu1 %v4105_v48 }
0x23fd   :  { %2571 = vmatprep.subr.bf16.mxu1 %v4080_v2 }
0x24c2   :  { %v2061_v0 = vpop.f32.mrb[44].mxu1 }
0x24c3   :  { %v2069_v38 = vadd.f32 %v2061_v0, %v4170_v29  ;;  %v2063_v41 = vpop.f32.mrb[45].mxu1 }
0x24c4   :  { %v2071_v16 = vadd.f32 %v2063_v41, %v4177_v24  ;;  %v2065_v51 = vpop.f32.mrb[46].mxu1 }
0x24c5   :  { %v2066_v23 = vpop.f32.mrb[47].mxu1  ;;  %v2956_v26 = vmul.f32 -1.442695, %v2069_v38 }
0x24c6   :  { %3252 = vtanh.f32 %v2071_v16  ;;  %v2957_v30 = vmul.f32 -1.442695, %v2071_v16 }
0x24c7   :  { %3254 = vtanh.f32 %v2069_v38 }
0x24c8   :  { %3256 = vpow2.f32 %v2957_v30 }
0x24c9   :  { %3258 = vpow2.f32 %v2956_v26 }
0x24d0   :  { %v3253_v14 = vpop.eup %3252 }
0x24d1   :  { %2113 = vrot.lane.b32.xlu1 %v3253_v14, %s3444_s15  ;;  %v3255_v53 = vpop.eup %3254 }
0x24d2   :  { %v3257_v2 = vpop.eup %3256 }
0x24d3   :  { %v2103_v57 = vadd.f32 1.0, %v3257_v2  ;;  %v3259_v29 = vpop.eup %3258 }
0x24d4   :  { %v2075_v19 = vadd.f32 1.0, %v3259_v29 }
0x24d5   :  { %2085 = vrot.lane.b32.xlu1 %v3255_v53, %s3444_s15  ;;  %3260 = vrcp.f32 %v2103_v57 }
0x24d6   :  { %3262 = vrcp.f32 %v2075_v19 }
0x24df   :  { %v3261_v24 = vpop.eup %3260 }
0x24e0   :  { %v3263_v36 = vpop.eup %3262  ;;  %v2111_v31 = vmul.f32 %v3261_v24, %v2109_v54 }
0x24e1   :  { %v2083_v47 = vmul.f32 %v3263_v36, %v2081_v45 }
0x2543   :  { %v2114_v5 = vpop.permute.xlu1 %2113 }
0x2544   :  { %v2116_v63 = vmul.f32 %v3261_v24, %v2114_v5 }
0x2546   :  { %2118 = vrot.lane.b32.xlu1 %v2116_v63, %s3444_s15 }
0x2547   :  { %v2086_v49 = vpop.permute.xlu1 %2085 }
0x2548   :  { %v2088_v58 = vmul.f32 %v3263_v36, %v2086_v49 }
0x254a   :  { %2090 = vrot.lane.b32.xlu1 %v2088_v58, %s3444_s15 }
0x25b8   :  { %v2119_v37 = vpop.permute.xlu1 %2118 }
0x25b9   :  { %v2121_v43 = vadd.f32 %v2119_v37, %v2111_v31 }
0x25bb   :  { %3264 = vtanh.f32 %v2121_v43 }
0x25bc   :  { %v2091_v42 = vpop.permute.xlu1 %2090 }
0x25bd   :  { %v2093_v56 = vadd.f32 %v2091_v42, %v2083_v47 }
0x25bf   :  { %3266 = vtanh.f32 %v2093_v56 }
0x25c5   :  { %v3265_v13 = vpop.eup %3264 }
0x25c6   :  { %2124 = vrot.lane.b32.xlu0 %v3265_v13, %s3444_s15 }
0x25c9   :  { %v3267_v25 = vpop.eup %3266 }
0x25ca   :  { %2096 = vrot.lane.b32.xlu1 %v3267_v25, %s3444_s15 }
0x2638   :  { %v2125_v22 = vpop.permute.xlu0 %2124 }
0x2639   :  { %v2127_v0 = vmul.f32 %v3261_v24, %v2125_v22 }
0x263b   :  { %2134 = vrot.lane.b32.xlu0 %v2127_v0, %s3445_s17 }
0x263c   :  { %v2097_v38 = vpop.permute.xlu1 %2096 }
0x263d   :  { %v2099_v41 = vmul.f32 %v3263_v36, %v2097_v38 }
0x263f   :  { %2129 = vrot.lane.b32.xlu1 %v2099_v41, %s3445_s17 }
0x2643   :  { %2146 = vrot.lane.b32.xlu1 %v2121_v43, %s3446_s19 }
0x2647   :  { %2140 = vrot.lane.b32.xlu1 %v2093_v56, %s3446_s19 }
0x26ad   :  { %v4364_v16 = vpop.permute.xlu0 %2134 }
0x26ae   :  { %v4370_v51 = vsel %vm106_vm8, %v4364_v16, %v4309_v28 }
0x26af   :  { %2155 = vrot.lane.b32.xlu0 %v4370_v51, %s3444_s15 }
0x26b1   :  { %v2130_v23 = vpop.permute.xlu1 %2129 }
0x26b2   :  { %v4376_v14 = vsel %vm103_vm9, %v2130_v23, 0.0 }
0x26b3   :  { %v4380_v53 = vadd.f32 %v4376_v14, %v4317_v44  ;;  %v2152_v30 = vmax.f32 %v4319_v18, %v4376_v14  ;;  %v4401_v44 = vsel %vm103_vm9, %v2130_v23, %v4338_v55 }
0x26b5   :  { %v2147_v26 = vpop.permute.xlu1 %2146 }
0x26b6   :  { %v4387_v28 = vsel %vm106_vm8, %v2147_v26, %v4324_v27 }
0x26b7   :  { %2244 = vrot.lane.b32.xlu1 %v4387_v28, %s3444_s15 }
0x26b9   :  { %v2141_v2 = vpop.permute.xlu1 %2140 }
0x26ba   :  { %v4394_v57 = vsel %vm103_vm9, %v2141_v2, %v4331_v52 }
0x26bb   :  { %2216 = vrot.lane.b32.xlu1 %v4394_v57, %s3444_s15 }
0x2721   :  { %v2156_v29 = vpop.permute.xlu0 %2155 }
0x2722   :  { %v2158_v27 = vsel %vm164_vm0, %v4401_v44, %v2156_v29 }
0x2723   :  { %v2159_v19 = vpack.c.bf16 %v2158_v27, %v2158_v27 }
0x2725   :  { %2958 = vmatmul.mubr.msk.bf16.vlgmr.msra.gmra.mrb[32].mxu0 %vm315_vm3, %v2159_v19 }
0x2726   :  { %2436 = vmatpush1.bf16.msra.mxu0 %v4082_v4  ;;  %2467 = vmatprep.mubr.bf16.mxu0 %v3442_v1 }
0x2727   :  { %2437 = vmatprep.subr.bf16.mxu0 %v4085_v46 }
0x2729   :  { %v2245_v42 = vpop.permute.xlu1 %2244 }
0x272a   :  { %2438 = vmatpush1.bf16.msra.mxu0 %v4089_v10 }
0x272b   :  { %2439 = vmatprep.subr.bf16.mxu0 %v4092_v11 }
0x272d   :  { %v2217_v22 = vpop.permute.xlu1 %2216 }
0x272e   :  { %2440 = vmatpush1.bf16.msra.mxu0 %v4098_v17 }
0x272f   :  { %2441 = vmatprep.subr.bf16.mxu0 %v4101_v50 }
0x2732   :  { %2442 = vmatpush1.bf16.msra.mxu0 %v4105_v48 }
0x2733   :  { %2817 = vmatprep.subr.bf16.mxu0 %v3442_v1 }
0x27f8   :  { %v2197_v52 = vpop.f32.mrb[32].mxu0 }
0x27f9   :  { %v2205_v55 = vadd.f32 %v2197_v52, %v4175_v15  ;;  %v2199_v4 = vpop.f32.mrb[33].mxu0 }
0x27fa   :  { %v2207_v24 = vadd.f32 %v2199_v4, %v4172_v39  ;;  %v2201_v5 = vpop.f32.mrb[34].mxu0 }
0x27fb   :  { %v2202_v46 = vpop.f32.mrb[35].mxu0  ;;  %v2959_v36 = vmul.f32 -1.442695, %v2205_v55 }
0x27fc   :  { %3268 = vtanh.f32 %v2207_v24  ;;  %v2960_v63 = vmul.f32 -1.442695, %v2207_v24 }
0x27fd   :  { %3270 = vtanh.f32 %v2205_v55 }
0x27fe   :  { %3272 = vpow2.f32 %v2960_v63  ;;  %v3338_v63 = vld [vmem:[#allocation11 + $0x40] ss:$8 sps:$4 sm:$0xff]  }
0x27ff   :  { %3274 = vpow2.f32 %v2959_v36  ;;  %v3340_v36 = vld [vmem:[#allocation11 + $0x50] ss:$8 sps:$4 sm:$0xff]  }
0x2806   :  { %v3269_v10 = vpop.eup %3268 }
0x2807   :  { %2249 = vrot.lane.b32.xlu0 %v3269_v10, %s3444_s15  ;;  %v3271_v11 = vpop.eup %3270 }
0x2808   :  { %v3273_v49 = vpop.eup %3272 }
0x2809   :  { %v2239_v58 = vadd.f32 1.0, %v3273_v49  ;;  %v3275_v15 = vpop.eup %3274  ;;  %v3341_v49 = vld [vmem:[#allocation11 + $0x64] ss:$8 sps:$4 sm:$0xff]  }
0x280a   :  { %v2211_v54 = vadd.f32 1.0, %v3275_v15 }
0x280b   :  { %2221 = vrot.lane.b32.xlu0 %v3271_v11, %s3444_s15  ;;  %3276 = vrcp.f32 %v2239_v58 }
0x280c   :  { %3278 = vrcp.f32 %v2211_v54 }
0x2815   :  { %v3277_v39 = vpop.eup %3276 }
0x2816   :  { %v3279_v43 = vpop.eup %3278  ;;  %v2247_v56 = vmul.f32 %v3277_v39, %v2245_v42 }
0x2817   :  { %v2219_v0 = vmul.f32 %v3279_v43, %v2217_v22 }
0x2879   :  { %v2250_v31 = vpop.permute.xlu0 %2249 }
0x287a   :  { %v2252_v37 = vmul.f32 %v3277_v39, %v2250_v31 }
0x287c   :  { %2254 = vrot.lane.b32.xlu0 %v2252_v37, %s3444_s15 }
0x287d   :  { %v2222_v45 = vpop.permute.xlu0 %2221 }
0x287e   :  { %v2224_v47 = vmul.f32 %v3279_v43, %v2222_v45 }
0x2880   :  { %2226 = vrot.lane.b32.xlu0 %v2224_v47, %s3444_s15 }
0x28ee   :  { %v2255_v13 = vpop.permute.xlu0 %2254 }
0x28ef   :  { %v2257_v25 = vadd.f32 %v2255_v13, %v2247_v56 }
0x28f1   :  { %3280 = vtanh.f32 %v2257_v25 }
0x28f2   :  { %v2227_v38 = vpop.permute.xlu0 %2226 }
0x28f3   :  { %v2229_v41 = vadd.f32 %v2227_v38, %v2219_v0 }
0x28f5   :  { %3282 = vtanh.f32 %v2229_v41 }
0x28fb   :  { %v3281_v23 = vpop.eup %3280 }
0x28fc   :  { %2260 = vrot.lane.b32.xlu1 %v3281_v23, %s3444_s15 }
0x28ff   :  { %v3283_v26 = vpop.eup %3282 }
0x2900   :  { %2232 = vrot.lane.b32.xlu0 %v3283_v26, %s3444_s15 }
0x296e   :  { %v2261_v2 = vpop.permute.xlu1 %2260 }
0x296f   :  { %v2263_v29 = vmul.f32 %v3277_v39, %v2261_v2 }
0x2971   :  { %2270 = vrot.lane.b32.xlu1 %v2263_v29, %s3445_s17 }
0x2972   :  { %v2233_v27 = vpop.permute.xlu0 %2232 }
0x2973   :  { %v2235_v19 = vmul.f32 %v3279_v43, %v2233_v27 }
0x2975   :  { %2265 = vrot.lane.b32.xlu0 %v2235_v19, %s3445_s17 }
0x2979   :  { %2282 = vrot.lane.b32.xlu0 %v2257_v25, %s3446_s19 }
0x297d   :  { %2276 = vrot.lane.b32.xlu0 %v2229_v41, %s3446_s19 }
0x29e3   :  { %v4427_v52 = vpop.permute.xlu1 %2270 }
0x29e4   :  { %v4433_v55 = vsel %vm103_vm9, %v4427_v52, %v4370_v51 }
0x29e5   :  { %2291 = vrot.lane.b32.xlu1 %v4433_v55, %s3444_s15 }
0x29e7   :  { %v2266_v4 = vpop.permute.xlu0 %2265 }
0x29e8   :  { %v2268_v24 = vsel %vm106_vm8, %v2266_v4, 0.0  ;;  %v4464_v18 = vsel %vm106_vm8, %v2266_v4, %v4401_v44 }
0x29e9   :  { %v4440_v5 = vadd.f32 %v2268_v24, %v4380_v53  ;;  %v4445_v46 = vmax.f32 %v2152_v30, %v2268_v24 }
0x29eb   :  { %v2283_v10 = vpop.permute.xlu0 %2282 }
0x29ec   :  { %v4450_v51 = vsel %vm103_vm9, %v2283_v10, %v4387_v28 }
0x29ed   :  { %2380 = vrot.lane.b32.xlu0 %v4450_v51, %s3444_s15 }
0x29ef   :  { %v2277_v11 = vpop.permute.xlu0 %2276 }
0x29f0   :  { %v4457_v53 = vsel %vm106_vm8, %v2277_v11, %v4394_v57  ;;  %v3339_v57 = vld [vmem:[#allocation11 + $0x54] ss:$8 sps:$4 sm:$0xff]  }
0x29f1   :  { %2352 = vrot.lane.b32.xlu0 %v4457_v53, %s3444_s15 }
0x2a57   :  { %v2292_v14 = vpop.permute.xlu1 %2291 }
0x2a58   :  { %v2294_v30 = vsel %vm164_vm0, %v4464_v18, %v2292_v14 }
0x2a59   :  { %v2295_v28 = vpack.c.bf16 %v2294_v30, %v2294_v30 }
0x2a5b   :  { %2961 = vmatmul.mubr.msk.bf16.vlgmr.msra.gmra.mrb[48].mxu1 %vm315_vm3, %v2295_v28 }
0x2a5c   :  { %2572 = vmatpush1.bf16.msra.mxu1 %v3338_v63  ;;  %2603 = vmatprep.mubr.bf16.mxu1 %v3442_v1 }
0x2a5d   :  { %2573 = vmatprep.subr.bf16.mxu1 %v3339_v57 }
0x2a5f   :  { %v2381_v0 = vpop.permute.xlu0 %2380 }
0x2a60   :  { %2574 = vmatpush1.bf16.msra.mxu1 %v3340_v36 }
0x2a61   :  { %2575 = vmatprep.subr.bf16.mxu1 %v3341_v49 }
0x2a63   :  { %v2353_v26 = vpop.permute.xlu0 %2352 }
0x2a64   :  { %2576 = vmatpush1.bf16.msra.mxu1 %v4098_v17 }
0x2a65   :  { %2577 = vmatprep.subr.bf16.mxu1 %v4101_v50 }
0x2a68   :  { %2578 = vmatpush1.bf16.msra.mxu1 %v4105_v48 }
0x2b2e   :  { %v2333_v44 = vpop.f32.mrb[48].mxu1 }
0x2b2f   :  { %v2341_v58 = vadd.f32 %v2333_v44, %v4179_v32  ;;  %v2335_v15 = vpop.f32.mrb[49].mxu1 }
0x2b30   :  { %v2343_v54 = vadd.f32 %v2335_v15, %v4168_v3  ;;  %v2337_v39 = vpop.f32.mrb[50].mxu1 }
0x2b31   :  { %v2338_v31 = vpop.f32.mrb[51].mxu1  ;;  %v2962_v50 = vmul.f32 -1.442695, %v2341_v58 }
0x2b32   :  { %3284 = vtanh.f32 %v2343_v54  ;;  %v2963_v17 = vmul.f32 -1.442695, %v2343_v54 }
0x2b33   :  { %3286 = vtanh.f32 %v2341_v58 }
0x2b34   :  { %3288 = vpow2.f32 %v2963_v17 }
0x2b35   :  { %3290 = vpow2.f32 %v2962_v50 }
0x2b3c   :  { %v3285_v37 = vpop.eup %3284 }
0x2b3d   :  { %2385 = vrot.lane.b32.xlu1 %v3285_v37, %s3444_s15  ;;  %v3287_v43 = vpop.eup %3286 }
0x2b3e   :  { %v3289_v48 = vpop.eup %3288 }
0x2b3f   :  { %v2375_v45 = vadd.f32 1.0, %v3289_v48  ;;  %v3291_v32 = vpop.eup %3290 }
0x2b40   :  { %v2347_v47 = vadd.f32 1.0, %v3291_v32 }
0x2b41   :  { %2357 = vrot.lane.b32.xlu1 %v3287_v43, %s3444_s15  ;;  %3292 = vrcp.f32 %v2375_v45 }
0x2b42   :  { %3294 = vrcp.f32 %v2347_v47 }
0x2b4b   :  { %v3293_v3 = vpop.eup %3292 }
0x2b4c   :  { %v3295_v13 = vpop.eup %3294  ;;  %v2383_v38 = vmul.f32 %v3293_v3, %v2381_v0 }
0x2b4d   :  { %v2355_v2 = vmul.f32 %v3295_v13, %v2353_v26 }
0x2baf   :  { %v2386_v42 = vpop.permute.xlu1 %2385 }
0x2bb0   :  { %v2388_v56 = vmul.f32 %v3293_v3, %v2386_v42 }
0x2bb2   :  { %2390 = vrot.lane.b32.xlu1 %v2388_v56, %s3444_s15 }
0x2bb3   :  { %v2358_v25 = vpop.permute.xlu1 %2357 }
0x2bb4   :  { %v2360_v22 = vmul.f32 %v3295_v13, %v2358_v25 }
0x2bb6   :  { %2362 = vrot.lane.b32.xlu1 %v2360_v22, %s3444_s15 }
0x2c24   :  { %v2391_v41 = vpop.permute.xlu1 %2390 }
0x2c25   :  { %v2393_v23 = vadd.f32 %v2391_v41, %v2383_v38 }
0x2c27   :  { %3296 = vtanh.f32 %v2393_v23 }
0x2c28   :  { %v2363_v29 = vpop.permute.xlu1 %2362 }
0x2c29   :  { %v2365_v27 = vadd.f32 %v2363_v29, %v2355_v2 }
0x2c2b   :  { %3298 = vtanh.f32 %v2365_v27 }
0x2c31   :  { %v3297_v19 = vpop.eup %3296 }
0x2c32   :  { %2396 = vrot.lane.b32.xlu0 %v3297_v19, %s3444_s15 }
0x2c35   :  { %v3299_v4 = vpop.eup %3298 }
0x2c36   :  { %2368 = vrot.lane.b32.xlu1 %v3299_v4, %s3444_s15 }
0x2ca4   :  { %v2397_v24 = vpop.permute.xlu0 %2396 }
0x2ca5   :  { %v2399_v10 = vmul.f32 %v3293_v3, %v2397_v24 }
0x2ca7   :  { %2406 = vrot.lane.b32.xlu0 %v2399_v10, %s3445_s17 }
0x2ca8   :  { %v2369_v11 = vpop.permute.xlu1 %2368 }
0x2ca9   :  { %v2371_v14 = vmul.f32 %v3295_v13, %v2369_v11 }
0x2cab   :  { %2401 = vrot.lane.b32.xlu1 %v2371_v14, %s3445_s17 }
0x2caf   :  { %2418 = vrot.lane.b32.xlu1 %v2393_v23, %s3446_s19 }
0x2cb3   :  { %2412 = vrot.lane.b32.xlu1 %v2365_v27, %s3446_s19 }
0x2d19   :  { %v4485_v30 = vpop.permute.xlu0 %2406 }
0x2d1a   :  { %v4491_v28 = vsel %vm100_vm7, %v4485_v30, %v4433_v55  ;;  %v2409_v7 = vsel %vm100_vm7, %v4485_v30, 0.0 }
0x2d1b   :  { %2427 = vrot.lane.b32.xlu0 %v4491_v28, %s3444_s15 }
0x2d1d   :  { %v2402_v63 = vpop.permute.xlu1 %2401 }
0x2d1e   :  { %v4497_v57 = vsel %vm109_vm6, %v2402_v63, 0.0 }
0x2d1f   :  { %v4501_v36 = vadd.f32 %v4497_v57, %v4440_v5  ;;  %v2424_v49 = vmax.f32 %v4445_v46, %v4497_v57  ;;  %v4522_v5 = vsel %vm109_vm6, %v2402_v63, %v4464_v18 }
0x2d21   :  { %v2419_v44 = vpop.permute.xlu1 %2418 }
0x2d22   :  { %v4508_v55 = vsel %vm100_vm7, %v2419_v44, %v4450_v51 }
0x2d23   :  { %2516 = vrot.lane.b32.xlu1 %v4508_v55, %s3444_s15 }
0x2d25   :  { %v2413_v58 = vpop.permute.xlu1 %2412 }
0x2d26   :  { %v4515_v15 = vsel %vm109_vm6, %v2413_v58, %v4457_v53 }
0x2d27   :  { %2488 = vrot.lane.b32.xlu1 %v4515_v15, %s3444_s15 }
0x2d8d   :  { %v2428_v54 = vpop.permute.xlu0 %2427 }
0x2d8e   :  { %v2430_v51 = vsel %vm164_vm0, %v4522_v5, %v2428_v54 }
0x2d8f   :  { %v2431_v39 = vpack.c.bf16 %v2430_v51, %v2430_v51 }
0x2d91   :  { %2964 = vmatmul.mubr.msk.bf16.vlgmr.msra.gmra.mrb[36].mxu0 %vm315_vm3, %v2431_v39 }
0x2d95   :  { %v2517_v38 = vpop.permute.xlu1 %2516 }
0x2d99   :  { %v2489_v2 = vpop.permute.xlu1 %2488 }
0x2e64   :  { %v2469_v31 = vpop.f32.mrb[36].mxu0 }
0x2e65   :  { %v2477_v37 = vadd.f32 %v2469_v31, %v4183_v6  ;;  %v2471_v53 = vpop.f32.mrb[37].mxu0 }
0x2e66   :  { %v2479_v43 = vadd.f32 %v2471_v53, %v4164_v40  ;;  %v2473_v17 = vpop.f32.mrb[38].mxu0 }
0x2e67   :  { %v2474_v50 = vpop.f32.mrb[39].mxu0  ;;  %v2965_v32 = vmul.f32 -1.442695, %v2477_v37 }
0x2e68   :  { %3300 = vtanh.f32 %v2479_v43  ;;  %v2966_v45 = vmul.f32 -1.442695, %v2479_v43 }
0x2e69   :  { %3302 = vtanh.f32 %v2477_v37 }
0x2e6a   :  { %3304 = vpow2.f32 %v2966_v45 }
0x2e6b   :  { %3306 = vpow2.f32 %v2965_v32 }
0x2e72   :  { %v3301_v48 = vpop.eup %3300 }
0x2e73   :  { %2521 = vrot.lane.b32.xlu0 %v3301_v48, %s3444_s15  ;;  %v3303_v18 = vpop.eup %3302 }
0x2e74   :  { %v3305_v47 = vpop.eup %3304 }
0x2e75   :  { %v2511_v3 = vadd.f32 1.0, %v3305_v47  ;;  %v3307_v6 = vpop.eup %3306 }
0x2e76   :  { %v2483_v42 = vadd.f32 1.0, %v3307_v6 }
0x2e77   :  { %2493 = vrot.lane.b32.xlu0 %v3303_v18, %s3444_s15  ;;  %3308 = vrcp.f32 %v2511_v3 }
0x2e78   :  { %3310 = vrcp.f32 %v2483_v42 }
0x2e81   :  { %v3309_v40 = vpop.eup %3308 }
0x2e82   :  { %v3311_v25 = vpop.eup %3310  ;;  %v2519_v41 = vmul.f32 %v3309_v40, %v2517_v38 }
0x2e83   :  { %v2491_v29 = vmul.f32 %v3311_v25, %v2489_v2 }
0x2ee5   :  { %v2522_v56 = vpop.permute.xlu0 %2521 }
0x2ee6   :  { %v2524_v13 = vmul.f32 %v3309_v40, %v2522_v56 }
0x2ee8   :  { %2526 = vrot.lane.b32.xlu0 %v2524_v13, %s3444_s15 }
0x2ee9   :  { %v2494_v22 = vpop.permute.xlu0 %2493 }
0x2eea   :  { %v2496_v0 = vmul.f32 %v3311_v25, %v2494_v22 }
0x2eec   :  { %2498 = vrot.lane.b32.xlu0 %v2496_v0, %s3444_s15 }
0x2f5a   :  { %v2527_v23 = vpop.permute.xlu0 %2526 }
0x2f5b   :  { %v2529_v26 = vadd.f32 %v2527_v23, %v2519_v41 }
0x2f5d   :  { %3312 = vtanh.f32 %v2529_v26 }
0x2f5e   :  { %v2499_v27 = vpop.permute.xlu0 %2498 }
0x2f5f   :  { %v2501_v19 = vadd.f32 %v2499_v27, %v2491_v29 }
0x2f61   :  { %3314 = vtanh.f32 %v2501_v19 }
0x2f67   :  { %v3313_v4 = vpop.eup %3312 }
0x2f68   :  { %2532 = vrot.lane.b32.xlu1 %v3313_v4, %s3444_s15 }
0x2f6b   :  { %v3315_v24 = vpop.eup %3314 }
0x2f6c   :  { %2504 = vrot.lane.b32.xlu0 %v3315_v24, %s3444_s15 }
0x2fda   :  { %v2533_v10 = vpop.permute.xlu1 %2532 }
0x2fdb   :  { %v2535_v11 = vmul.f32 %v3309_v40, %v2533_v10 }
0x2fdd   :  { %2542 = vrot.lane.b32.xlu1 %v2535_v11, %s3445_s17 }
0x2fde   :  { %v2505_v14 = vpop.permute.xlu0 %2504 }
0x2fdf   :  { %v2507_v63 = vmul.f32 %v3311_v25, %v2505_v14 }
0x2fe1   :  { %2537 = vrot.lane.b32.xlu0 %v2507_v63, %s3445_s17  ;;  %v1865_v63 = vsel %vm112_vm4, %v4244_v8, 0.0 }
0x2fe5   :  { %2554 = vrot.lane.b32.xlu0 %v2529_v26, %s3446_s19 }
0x2fe9   :  { %2548 = vrot.lane.b32.xlu0 %v2501_v19, %s3446_s19 }
0x304f   :  { %v4539_v44 = vpop.permute.xlu1 %2542 }
0x3050   :  { %v4545_v58 = vsel %vm97_vm5, %v4539_v44, %v4491_v28 }
0x3051   :  { %2563 = vrot.lane.b32.xlu1 %v4545_v58, %s3444_s15 }
0x3053   :  { %v2538_v54 = vpop.permute.xlu0 %2537 }
0x3054   :  { %v2540_v51 = vsel %vm112_vm4, %v2538_v54, 0.0  ;;  %v4570_v46 = vsel %vm112_vm4, %v2538_v54, %v4522_v5  ;;  %v2001_v54 = vsel %vm109_vm6, %v4300_v35, 0.0 }
0x3055   :  { %v4552_v39 = vadd.f32 %v2540_v51, %v4501_v36  ;;  %v4557_v31 = vmax.f32 %v2424_v49, %v2540_v51  ;;  %v1879_v51 = vadd.f32 %v1865_v63, %v4212_v12 }
0x3057   :  { %v2555_v37 = vpop.permute.xlu0 %2554 }
0x3058   :  { %v2557_v28 = vsel %vm97_vm5, %v2555_v37, %v4508_v55  ;;  %v1881_v37 = vmax.f32 %v4212_v12, %v1865_v63  ;;  %v2545_v12 = vsel %vm97_vm5, %v4539_v44, 0.0 }
0x3059   :  { %2652 = vrot.lane.b32.xlu0 %v2557_v28, %s3444_s15  ;;  %v2137_v28 = vsel %vm106_vm8, %v4364_v16, 0.0 }
0x305b   :  { %v2549_v53 = vpop.permute.xlu0 %2548 }
0x305c   :  { %v2551_v43 = vsel %vm112_vm4, %v2549_v53, %v4515_v15  ;;  %v2015_v53 = vadd.f32 %v2001_v54, %v1879_v51 }
0x305d   :  { %2624 = vrot.lane.b32.xlu0 %v2551_v43, %s3444_s15  ;;  %v2017_v43 = vmax.f32 %v1881_v37, %v2001_v54 }
0x305e   :  { %v2151_v20 = vadd.f32 %v2137_v28, %v2015_v53 }
0x305f   :  { %v2153_v8 = vmax.f32 %v2017_v43, %v2137_v28 }
0x30c3   :  { %v2564_v57 = vpop.permute.xlu1 %2563 }
0x30c4   :  { %v2566_v36 = vsel %vm164_vm0, %v4570_v46, %v2564_v57  ;;  %v2273_v57 = vsel %vm103_vm9, %v4427_v52, 0.0 }
0x30c5   :  { %v2567_v49 = vpack.c.bf16 %v2566_v36, %v2566_v36  ;;  %v2287_v35 = vadd.f32 %v2273_v57, %v2151_v20  ;;  %v2289_v36 = vmax.f32 %v2153_v8, %v2273_v57 }
0x30c7   :  { %2967 = vmatmul.mubr.msk.bf16.vlgmr.msra.gmra.mrb[52].mxu1 %vm315_vm3, %v2567_v49  ;;  %v2423_v33 = vadd.f32 %v2409_v7, %v2287_v35  ;;  %v2425_v16 = vmax.f32 %v2289_v36, %v2409_v7  ;;  %v3064_v49 = vld [vmem:[%s4687_s6] sm:$0xff]  }
0x30c8   :  { %2818 = vmatpush1.bf16.msra.mxu0 %v3064_v49 }
0x30c9   :  { %v2559_v34 = vadd.f32 %v2545_v12, %v2423_v33  ;;  %v2561_v52 = vmax.f32 %v2425_v16, %v2545_v12  ;;  %2819 = vmatprep.subr.bf16.mxu0 %v3442_v1 }
0x30cb   :  { %v2653_v0 = vpop.permute.xlu0 %2652 }
0x30cc   :  { %2820 = vmatpush1.bf16.msra.mxu0 %v3065_v60 }
0x30cd   :  { %2821 = vmatprep.subr.bf16.mxu0 %v3442_v1 }
0x30cf   :  { %v2625_v26 = vpop.permute.xlu0 %2624 }
0x319a   :  { %v2605_v55 = vpop.f32.mrb[52].mxu1 }
0x319b   :  { %v2613_v17 = vadd.f32 %v2605_v55, %v4187_v9  ;;  %v2607_v50 = vpop.f32.mrb[53].mxu1 }
0x319c   :  { %v2615_v15 = vadd.f32 %v2607_v50, %v4160_v62  ;;  %v2609_v48 = vpop.f32.mrb[54].mxu1 }
0x319d   :  { %v2610_v18 = vpop.f32.mrb[55].mxu1  ;;  %v2968_v47 = vmul.f32 -1.442695, %v2613_v17  ;;  %v3067_v48 = vld [vmem:[%s4687_s6 + $0x18] sm:$0xff]  }
0x319e   :  { %3316 = vtanh.f32 %v2615_v15  ;;  %v2969_v32 = vmul.f32 -1.442695, %v2615_v15  ;;  %v3066_v15 = vld [vmem:[%s4687_s6 + $0x10] sm:$0xff]  }
0x319f   :  { %3318 = vtanh.f32 %v2613_v17  ;;  %2822 = vmatpush1.bf16.msra.mxu0 %v3066_v15  ;;  %v3070_v18 = vld [vmem:[%s4687_s6 + $0x30] sm:$0xff]  }
0x31a0   :  { %3320 = vpow2.f32 %v2969_v32  ;;  %2823 = vmatprep.subr.bf16.mxu0 %v3442_v1  ;;  %v3073_v32 = vld [vmem:[%s4687_s6 + $0x48] sm:$0xff]  }
0x31a1   :  { %3322 = vpow2.f32 %v2968_v47  ;;  %v3074_v47 = vld [vmem:[%s4687_s6 + $0x50] sm:$0xff]  }
0x31a3   :  { %2824 = vmatpush1.bf16.msra.mxu0 %v3067_v48 }
0x31a4   :  { %2825 = vmatprep.subr.bf16.mxu0 %v3442_v1 }
0x31a7   :  { %2826 = vmatpush1.bf16.msra.mxu0 %v3068_v61 }
0x31a8   :  { %v3317_v45 = vpop.eup %3316  ;;  %2827 = vmatprep.subr.bf16.mxu0 %v3442_v1 }
0x31a9   :  { %2657 = vrot.lane.b32.xlu1 %v3317_v45, %s3444_s15  ;;  %v3319_v5 = vpop.eup %3318  ;;  %v3071_v45 = vld [vmem:[%s4687_s6 + $0x38] sm:$0xff]  }
0x31aa   :  { %v3321_v3 = vpop.eup %3320 }
0x31ab   :  { %v2647_v6 = vadd.f32 1.0, %v3321_v3  ;;  %v3323_v9 = vpop.eup %3322  ;;  %v3075_v3 = vld [vmem:[%s4687_s6 + $0x58] sm:$0xff]  }
0x31ac   :  { %v2619_v42 = vadd.f32 1.0, %v3323_v9 }
0x31ad   :  { %2629 = vrot.lane.b32.xlu1 %v3319_v5, %s3444_s15  ;;  %3324 = vrcp.f32 %v2647_v6  ;;  %v3072_v5 = vld [vmem:[%s4687_s6 + $0x40] sm:$0xff]  }
0x31ae   :  { %3326 = vrcp.f32 %v2619_v42 }
0x31b7   :  { %v3325_v62 = vpop.eup %3324 }
0x31b8   :  { %v3327_v13 = vpop.eup %3326  ;;  %v2655_v38 = vmul.f32 %v3325_v62, %v2653_v0 }
0x31b9   :  { %v2627_v2 = vmul.f32 %v3327_v13, %v2625_v26 }
0x321b   :  { %v2658_v40 = vpop.permute.xlu1 %2657 }
0x321c   :  { %v2660_v56 = vmul.f32 %v3325_v62, %v2658_v40 }
0x321e   :  { %2662 = vrot.lane.b32.xlu1 %v2660_v56, %s3444_s15 }
0x321f   :  { %v2630_v25 = vpop.permute.xlu1 %2629 }
0x3220   :  { %v2632_v22 = vmul.f32 %v3327_v13, %v2630_v25 }
0x3222   :  { %2634 = vrot.lane.b32.xlu1 %v2632_v22, %s3444_s15 }
0x3290   :  { %v2663_v41 = vpop.permute.xlu1 %2662 }
0x3291   :  { %v2665_v23 = vadd.f32 %v2663_v41, %v2655_v38 }
0x3293   :  { %3328 = vtanh.f32 %v2665_v23 }
0x3294   :  { %v2635_v29 = vpop.permute.xlu1 %2634 }
0x3295   :  { %v2637_v27 = vadd.f32 %v2635_v29, %v2627_v2 }
0x3297   :  { %3330 = vtanh.f32 %v2637_v27 }
0x329d   :  { %v3329_v19 = vpop.eup %3328 }
0x329e   :  { %2668 = vrot.lane.b32.xlu0 %v3329_v19, %s3444_s15 }
0x32a1   :  { %v3331_v4 = vpop.eup %3330 }
0x32a2   :  { %2640 = vrot.lane.b32.xlu1 %v3331_v4, %s3444_s15  ;;  %v2984_v4 = vld [vmem:[%s4689_s8] ss:$0 sm:$0xff] }
0x3310   :  { %v2669_v24 = vpop.permute.xlu0 %2668 }
0x3311   :  { %v2671_v10 = vmul.f32 %v3325_v62, %v2669_v24 }
0x3313   :  { %2678 = vrot.lane.b32.xlu0 %v2671_v10, %s3445_s17 }
0x3314   :  { %v2641_v11 = vpop.permute.xlu1 %2640 }
0x3315   :  { %v2643_v14 = vmul.f32 %v3327_v13, %v2641_v11 }
0x3317   :  { %2673 = vrot.lane.b32.xlu1 %v2643_v14, %s3445_s17  ;;  %v2985_v14 = vld [vmem:[#allocation5] ss:$0 sm:$0xff] }
0x3385   :  { %v2679_v55 = vpop.permute.xlu0 %2678 }
0x3386   :  { %v2681_v30 = vsel %vm94_vm2, %v2679_v55, 0.0  ;;  %v2683_v17 = vsel %vm94_vm2, %v2679_v55, %v4545_v58  ;;  %v3069_v58 = vld [vmem:[%s4687_s6 + $0x28] sm:$0xff]  }
0x3387   :  { %v2687_v21 = vmax.f32 %v2561_v52, %v2681_v30  ;;  %v2685_v44 = vadd.f32 %v2681_v30, %v2559_v34  ;;  %2828 = vmatpush1.bf16.msra.mxu0 %v3069_v58 }
0x3388   :  { %2829 = vmatprep.subr.bf16.mxu0 %v3442_v1 }
0x3389   :  { %v3017_v50 = vpack.i.bf16 %v2687_v21, %v2683_v17  ;;  %2694 = vrot.lane.b32.xlu0 %v2685_v44, %s3444_s15  ;;  %v2674_v6 = vpop.permute.xlu1 %2673 }
0x338a   :  { %v2676_v9 = vsel %vm115_vm1, %v2674_v6, 0.0 }
0x338b   :  { %3018 = vrot.lane.b32.xlu1 %v3017_v50, %s3444_s15  ;;  %2830 = vmatpush1.bf16.msra.mxu0 %v3070_v18  ;;  %v2684_v42 = vadd.f32 %v2676_v9, %v4552_v39  ;;  %v2686_v25 = vmax.f32 %v4557_v31, %v2676_v9  ;;  %v2682_v39 = vsel %vm115_vm1, %v2674_v6, %v4570_v46  ;;  %v2970_v31 = vld [vmem:[%s4688_s7] ss:$0 sm:$0xff] }
0x338c   :  { %2831 = vmatprep.subr.bf16.mxu0 %v3442_v1 }
0x338f   :  { %2832 = vmatpush1.bf16.msra.mxu0 %v3071_v45 }
0x3390   :  { %2833 = vmatprep.subr.bf16.mxu0 %v3442_v1 }
0x3393   :  { %2834 = vmatpush1.bf16.msra.mxu0 %v3072_v5 }
0x3394   :  { %2835 = vmatprep.subr.bf16.mxu0 %v3442_v1 }
0x3397   :  { %2836 = vmatpush1.bf16.msra.mxu0 %v3073_v32 }
0x3398   :  { %2837 = vmatprep.subr.bf16.mxu0 %v3442_v1 }
0x339b   :  { %2838 = vmatpush1.bf16.msra.mxu0 %v3074_v47 }
0x339c   :  { %2839 = vmatprep.subr.bf16.mxu0 %v3442_v1 }
0x339f   :  { %2840 = vmatpush1.bf16.msra.mxu0 %v3075_v3 }
0x33fb   :  { %v2695_v62 = vpop.permute.xlu0 %2694 }
0x33fc   :  { %v2697_v40 = vsel %vm164_vm0, %v2684_v42, %v2695_v62 }
0x33fd   :  { %v2698_v56 = vmul.f32 0.125, %v2697_v40  ;;  %v3019_v13 = vpop.permute.xlu1 %3018 }
0x33fe   :  { %v3021_v22 = vunpack.i.h.bf16 %v3019_v13  ;;  %v3020_v38 = vunpack.i.l.bf16 %v3019_v13 }
0x33ff   :  { %2705 = vrot.lane.b32.xlu0 %v2698_v56, %s3445_s17 }
0x3400   :  { %v2703_v1 = vsel %vm164_vm0, %v2686_v25, %v3021_v22  ;;  %v2692_v41 = vsel %vm164_vm0, %v2682_v39, %v3020_v38 }
0x3401   :  { %v2710_v0 = vpack.c.bf16 %v2703_v1, %v2703_v1 }
0x3403   :  { %2983 = vmatprep.mubr.msk.bf16.mxu0 %vm315_vm3, %v2710_v0 }
0x3471   :  { %v2706_v23 = vpop.permute.xlu0 %2705 }
0x3472   :  { %v2708_v26 = vsel %vm315_vm3, %v2692_v41, %v2706_v23 }
0x3473   :  { %v2709_v2 = vpack.c.bf16 %v2708_v26, %v2708_v26 }
0x3475   :  { %2850 = vmatmul.mubr.bf16.vlgmr.msra.gmra.mrb[40].mxu0 %v2709_v2 }
0x3548   :  { %v2851_v29 = vpop.f32.mrb[40].mxu0 }
0x3549   :  { %v2852_v27 = vadd.f32 %v2970_v31, %v2851_v29  ;;  %v2853_v19 = vpop.f32.mrb[41].mxu0 }
0x354a   :  { %v2854_v59 = vpop.f32.mrb[42].mxu0 }
0x354b   :  { %v2857_v46 = vmax.f32 %v2852_v27, 0.0  ;;  %v2855_v24 = vpop.f32.mrb[43].mxu0 }
0x354d   :  { %v2865_v10 = vmul.f32 %v2984_v4, %v2857_v46 }
0x354f   :  { %v2867_v11 = vsel %vm2866_vm10, %v2865_v10, 0.0 }
0x3550   :  { %2868 = vadd.xlane.f32.xlu1 %v2867_v11 }
0x35dd   :  { %v2869_v63 = vpop.xlane.xlu1 %2868 }
0x35de   :  { %v2877_v54 = vadd.f32 %v2985_v14, %v2869_v63 }
0x35e0   :  { %2879 = vst.msk [vmem:[%s4691_s10] sm:$0xff] %vm2878_vm11, %v2877_v54 }
0x35e1   :  { %2884 = vsyncpa [#allocation7], 1 }
0x35e2   :  { %2885 = vsyncpa [#allocation9], 1 }
0x35e3   :  { %2886 = vsyncpa [#allocation12], 1 }

</bundles_post_ra>
